<compile_context>
chip_gen: v6e
topology: v6e:2x2x1
jax: 0.10.0
libtpu: 0.0.40
codegen_flags: <defaults>
</compile_context>

<pallas_src>
import functools

import jax
import jax.numpy as jnp
from jax import lax
from jax.experimental import pallas as pl
from jax.experimental.pallas import tpu as pltpu

VMEM_SPEC = pl.BlockSpec(memory_space=pltpu.MemorySpace.VMEM)
SMEM_SPEC = pl.BlockSpec(memory_space=pltpu.MemorySpace.SMEM)

LANE = 128  # TPU lane width; LSTM gates / hidden state padded to this.


# ---------------------------------------------------------------------------
# Pallas kernels
# ---------------------------------------------------------------------------
def conv_t_kernel(p_ref, w_ref, gamma_ref, beta_ref, o_ref, *, use_bn, use_lrelu):
    """Fused transposed conv stage: o = LeakyReLU(BN(W @ P)).

    p_ref:      (C_in*k*k, M) bf16 patches (M = N*Ho*Wo on lanes -> dense)
    w_ref:      (C_out, C_in*k*k) bf16 flattened conv weight (PyTorch order)
    gamma/beta: (C_out, 1) f32 (unused when use_bn=False)
    o_ref:      (C_out, M) bf16
    """
    y = jnp.dot(w_ref[...], p_ref[...], preferred_element_type=jnp.float32)
    if use_bn:
        # Training-mode BatchNorm2d: per-channel stats over all N*Ho*Wo
        # positions (full lane axis), biased variance, eps = 1e-5.  Exact
        # because M is not tiled.
        mean = jnp.mean(y, axis=1, keepdims=True)
        var = jnp.mean(jnp.square(y - mean), axis=1, keepdims=True)
        y = (y - mean) * lax.rsqrt(var + 1e-5) * gamma_ref[...] + beta_ref[...]
    if use_lrelu:
        y = jnp.where(y >= 0, y, 0.2 * y)
    o_ref[...] = y.astype(o_ref.dtype)


def lstm_head_kernel(num_layers, seq_len, batch, hp, *refs):
    """Fused multi-layer LSTM + Linear + Sigmoid head (time-major rows).

    refs layout:
      [0]            feats (S*B, D_in) bf16, rows ordered (t, b)
      [1 .. 3L]      per layer: w_ih_p (D_in_l, 4*hp) bf16, w_hh_p (hp, 4*hp)
                     bf16, b_p (1, 4*hp) f32   (gate g lives in lanes
                     [g*hp, g*hp + H); padded lanes are zero)
      [3L+1..3L+2]   w_lin_p (hp, 1) bf16, b_lin (1, 1) f32 in SMEM
      [3L+3]         o_ref (S*B, 1) f32
      scratch:       gx (S*B, 4*hp) f32, h_all_a / h_all_b (S*B, hp) f32,
                     h_state / c_state (batch, hp) f32
    """
    n_w = 3 * num_layers
    feats_ref = refs[0]
    layer_refs = refs[1:1 + n_w]
    wlin_ref = refs[1 + n_w]
    blin_ref = refs[2 + n_w]
    o_ref = refs[3 + n_w]
    gx_ref, ha_ref, hb_ref, h_ref, c_ref = refs[4 + n_w:]

    def run_layer(whh_ref, hout_ref):
        h_ref[...] = jnp.zeros(h_ref.shape, h_ref.dtype)
        c_ref[...] = jnp.zeros(c_ref.shape, c_ref.dtype)
        # Short fixed-length sequence: fully unrolled, static 2-row slices.
        for t in range(seq_len):
            r0, r1 = t * batch, (t + 1) * batch
            # The recurrent matmul is the only matmul left on the serial path.
            gates = gx_ref[r0:r1, :] + jnp.dot(
                h_ref[...].astype(whh_ref.dtype), whh_ref[...],
                preferred_element_type=jnp.float32)
            # Each gate occupies its own 128-lane tile -> vreg-aligned slices.
            i_g = jax.nn.sigmoid(gates[:, 0 * hp:1 * hp])
            f_g = jax.nn.sigmoid(gates[:, 1 * hp:2 * hp])
            g_g = jnp.tanh(gates[:, 2 * hp:3 * hp])
            o_g = jax.nn.sigmoid(gates[:, 3 * hp:4 * hp])
            c_new = f_g * c_ref[...] + i_g * g_g
            h_new = o_g * jnp.tanh(c_new)
            c_ref[...] = c_new
            h_ref[...] = h_new
            hout_ref[r0:r1, :] = h_new

    h_bufs = (ha_ref, hb_ref)
    x_ref = feats_ref
    for layer in range(num_layers):
        wih_ref, whh_ref, b_ref = layer_refs[3 * layer:3 * layer + 3]
        # Hoisted input projection for the whole sequence (one MXU matmul,
        # M = S*B instead of M = B per step).
        gx_ref[...] = jnp.dot(
            x_ref[...].astype(wih_ref.dtype), wih_ref[...],
            preferred_element_type=jnp.float32) + b_ref[...]
        run_layer(whh_ref, h_bufs[layer % 2])
        x_ref = h_bufs[layer % 2]

    h_last = h_bufs[(num_layers - 1) % 2][...]
    logits = jnp.dot(h_last.astype(wlin_ref.dtype), wlin_ref[...],
                     preferred_element_type=jnp.float32) + blin_ref[0, 0]
    o_ref[...] = jax.nn.sigmoid(logits)


# ---------------------------------------------------------------------------
# Wrappers (glue)
# ---------------------------------------------------------------------------
def im2col_t(act_t, k, stride, pad):
    """act_t: (C, N, H, W) -> transposed patches (C*k*k, N*Ho*Wo).

    Row order (c, i, j) matches PyTorch's weight.reshape(C_out, -1); column
    order (n, oh, ow).  Channel-major keeps the kernel output lane-dense.
    """
    if pad:
        act_t = jnp.pad(act_t, ((0, 0), (0, 0), (pad, pad), (pad, pad)))
    c, n, h, w = act_t.shape
    ho = (h - k) // stride + 1
    wo = (w - k) // stride + 1
    blocks = [act_t[:, :, i:i + stride * ho:stride, j:j + stride * wo:stride]
              for i in range(k) for j in range(k)]
    patches = jnp.stack(blocks, axis=1)                      # (C, k*k, N, Ho, Wo)
    return patches.reshape(c * k * k, n * ho * wo), ho, wo


def conv_stage(act_t, w_flat, gamma, beta, *, k, stride, pad, use_bn, use_lrelu):
    """act_t: (C_in, N, H, W) bf16 -> (C_out, N, Ho, Wo) bf16."""
    c_out = w_flat.shape[0]
    patches, ho, wo = im2col_t(act_t, k, stride, pad)
    kern = functools.partial(conv_t_kernel, use_bn=use_bn, use_lrelu=use_lrelu)
    y = pl.pallas_call(
        kern,
        out_shape=jax.ShapeDtypeStruct((c_out, patches.shape[1]), jnp.bfloat16),
        in_specs=[VMEM_SPEC] * 4,
        out_specs=VMEM_SPEC,
    )(patches, w_flat, gamma, beta)
    return y.reshape(c_out, act_t.shape[1], ho, wo)


def lstm_head(feats_tm, lstm_w, w_lin_p, b_lin, *, batch, seq_len, hp):
    """feats_tm: (S*B, D_in) bf16 time-major -> sigmoid(linear(lstm)) (S*B, 1)."""
    sb = feats_tm.shape[0]
    num_layers = len(lstm_w)
    flat_w = [a for layer in lstm_w for a in layer]
    kern = functools.partial(lstm_head_kernel, num_layers, seq_len, batch, hp)
    return pl.pallas_call(
        kern,
        out_shape=jax.ShapeDtypeStruct((sb, 1), jnp.float32),
        in_specs=[VMEM_SPEC] * (2 + 3 * num_layers) + [SMEM_SPEC],
        out_specs=VMEM_SPEC,
        scratch_shapes=[pltpu.VMEM((sb, 4 * hp), jnp.float32),
                        pltpu.VMEM((sb, hp), jnp.float32),
                        pltpu.VMEM((sb, hp), jnp.float32),
                        pltpu.VMEM((batch, hp), jnp.float32),
                        pltpu.VMEM((batch, hp), jnp.float32)],
    )(feats_tm, *flat_w, w_lin_p, b_lin)


def cnn_lstm_discriminator(x, prep, *, lstm_hidden_dim, cnn_features):
    """x: (B, S, 1, 32, 32) f32 -> (B, S, 1) f32."""
    batch, seq = x.shape[0], x.shape[1]
    f = cnn_features
    hp = ((lstm_hidden_dim + LANE - 1) // LANE) * LANE

    # Frames in channel-major (C, N, H, W) layout, bf16 for the MXU.
    frames = x.reshape(batch * seq, 1, 32, 32).astype(jnp.bfloat16)
    act = frames.transpose(1, 0, 2, 3)                       # (1, N, 32, 32)

    dummy1 = jnp.zeros((f, 1), jnp.float32)
    dummy4 = jnp.zeros((4 * f, 1), jnp.float32)
    act = conv_stage(act, prep["w1"], dummy1, dummy1,
                     k=4, stride=2, pad=1, use_bn=False, use_lrelu=True)
    act = conv_stage(act, prep["w2"], prep["gamma2"], prep["beta2"],
                     k=4, stride=2, pad=1, use_bn=True, use_lrelu=True)
    act = conv_stage(act, prep["w3"], prep["gamma3"], prep["beta3"],
                     k=4, stride=2, pad=1, use_bn=True, use_lrelu=True)
    act = conv_stage(act, prep["w4"], dummy4, dummy4,
                     k=4, stride=1, pad=0, use_bn=False, use_lrelu=False)
    # act: (4F, N, 1, 1) -> time-major LSTM features (S*B, 4F), rows = (t, b).
    feats = act.reshape(4 * f, batch, seq).transpose(2, 1, 0)
    feats_tm = feats.reshape(seq * batch, 4 * f)

    out = lstm_head(feats_tm, prep["lstm"], prep["w_lin"], prep["b_lin"],
                    batch=batch, seq_len=seq, hp=hp)          # (S*B, 1)
    return out.reshape(seq, batch).transpose(1, 0).reshape(batch, seq, 1)


# ---------------------------------------------------------------------------
# Parameter construction / one-time preparation
# ---------------------------------------------------------------------------
def make_params(key, lstm_hidden_dim, lstm_layers, cnn_features):
    f, h = cnn_features, lstm_hidden_dim
    keys = jax.random.split(key, 16 + 4 * lstm_layers)
    ki = iter(range(len(keys)))

    def u(shape, bound):
        return jax.random.uniform(keys[next(ki)], shape, jnp.float32, -bound, bound)

    params = {
        "w1": u((f, 1, 4, 4), 0.25),
        "w2": u((2 * f, f, 4, 4), 1.0 / (f * 16) ** 0.5),
        "w3": u((4 * f, 2 * f, 4, 4), 1.0 / (2 * f * 16) ** 0.5),
        "w4": u((4 * f, 4 * f, 4, 4), 1.0 / (4 * f * 16) ** 0.5),
        "gamma2": u((2 * f,), 1.0) * 0.1 + 1.0,
        "beta2": u((2 * f,), 0.1),
        "gamma3": u((4 * f,), 1.0) * 0.1 + 1.0,
        "beta3": u((4 * f,), 0.1),
    }
    lstm = []
    for layer in range(lstm_layers):
        d_in = 4 * f if layer == 0 else h
        bound = 1.0 / h ** 0.5
        w_ih = u((d_in, 4 * h), bound)
        w_hh = u((h, 4 * h), bound)
        b = u((1, 4 * h), bound) + u((1, 4 * h), bound)       # b_ih + b_hh
        lstm.append((w_ih, w_hh, b))
    params["lstm"] = lstm
    params["w_lin"] = u((h, 1), 1.0 / h ** 0.5)
    params["b_lin"] = u((1, 1), 1.0 / h ** 0.5)
    return params


def prepare_params(params, *, lstm_hidden_dim):
    """One-time weight prep (flatten / pad / cast) outside the forward graph."""
    h = lstm_hidden_dim
    hp = ((h + LANE - 1) // LANE) * LANE

    def flat_conv(w):                 # (C_out, C_in, k, k) -> (C_out, C_in*k*k)
        return w.reshape(w.shape[0], -1).astype(jnp.bfloat16)

    def pad_gate_cols(w):             # (D, 4H) -> (D, 4*hp): gate g at [g*hp, g*hp+H)
        out = jnp.zeros((w.shape[0], 4 * hp), w.dtype)
        for g in range(4):
            out = out.at[:, g * hp:g * hp + h].set(w[:, g * h:(g + 1) * h])
        return out

    def pad_rows(w, rows):
        return jnp.zeros((rows, w.shape[1]), w.dtype).at[:w.shape[0]].set(w)

    lstm = []
    for layer, (w_ih, w_hh, b) in enumerate(params["lstm"]):
        w_ih_p = pad_gate_cols(w_ih)
        if layer > 0:                 # layer input is the hp-padded hidden state
            w_ih_p = pad_rows(w_ih_p, hp)
        w_hh_p = pad_rows(pad_gate_cols(w_hh), hp)
        b_p = pad_gate_cols(b)        # zero-padded lanes keep padded h/c == 0
        lstm.append((w_ih_p.astype(jnp.bfloat16), w_hh_p.astype(jnp.bfloat16),
                     b_p.astype(jnp.float32)))

    return {
        "w1": flat_conv(params["w1"]), "w2": flat_conv(params["w2"]),
        "w3": flat_conv(params["w3"]), "w4": flat_conv(params["w4"]),
        "gamma2": params["gamma2"].reshape(-1, 1).astype(jnp.float32),
        "beta2": params["beta2"].reshape(-1, 1).astype(jnp.float32),
        "gamma3": params["gamma3"].reshape(-1, 1).astype(jnp.float32),
        "beta3": params["beta3"].reshape(-1, 1).astype(jnp.float32),
        "lstm": lstm,
        "w_lin": pad_rows(params["w_lin"], hp).astype(jnp.bfloat16),
        "b_lin": params["b_lin"].astype(jnp.float32),
    }


# ---------------------------------------------------------------------------
if __name__ == "__main__":
    BATCH, SEQ = 2, 8
    LSTM_HIDDEN, LSTM_LAYERS, CNN_FEATURES = 32, 2, 4

    root = jax.random.PRNGKey(0)
    k_params, k_input = jax.random.split(root)
    params = make_params(k_params, LSTM_HIDDEN, LSTM_LAYERS, CNN_FEATURES)
    prep = prepare_params(params, lstm_hidden_dim=LSTM_HIDDEN)
    x = jax.random.normal(k_input, (BATCH, SEQ, 1, 32, 32), jnp.float32)

    fwd = jax.jit(functools.partial(cnn_lstm_discriminator,
                                    lstm_hidden_dim=LSTM_HIDDEN,
                                    cnn_features=CNN_FEATURES))
    out = fwd(x, prep)
    jax.block_until_ready(out)
    assert out.shape == (BATCH, SEQ, 1)
    assert bool(jnp.all(jnp.isfinite(out)))
    assert bool(jnp.all((out >= 0.0) & (out <= 1.0)))
    print("KERNEL_OK")
</pallas_src>

<mosaic_0001>
module attributes {stable_mosaic.version = 11 : i64} {
  func.func @conv_t_kernel(%arg0: memref<16x4096xbf16, #tpu.memory_space<vmem>>, %arg1: memref<4x16xbf16, #tpu.memory_space<vmem>>, %arg2: memref<4x1xf32, #tpu.memory_space<vmem>>, %arg3: memref<4x1xf32, #tpu.memory_space<vmem>>, %arg4: memref<4x4096xbf16, #tpu.memory_space<vmem>>) attributes {dimension_semantics = [], scalar_prefetch = 0 : i64, scratch_operands = 0 : i64, tpu.core_type = #tpu.core_type<tc>} {
    %c0 = arith.constant 0 : index
    %c0_0 = arith.constant 0 : index
    %0 = vector.load %arg1[%c0, %c0_0] : memref<4x16xbf16, #tpu.memory_space<vmem>>, vector<4x16xbf16>
    %c0_1 = arith.constant 0 : index
    %c0_2 = arith.constant 0 : index
    %1 = vector.load %arg0[%c0_1, %c0_2] : memref<16x4096xbf16, #tpu.memory_space<vmem>>, vector<16x4096xbf16>
    %cst = arith.constant dense<0.000000e+00> : vector<4x4096xf32>
    %2 = tpu.matmul %0, %1, %cst {dimension_numbers = #tpu.dot_dimension_numbers<[1], [0], [0], [1], [0, 0, 1, 1], [], []>} : vector<4x16xbf16>, vector<16x4096xbf16>, vector<4x4096xf32> -> vector<4x4096xf32>
    %cst_3 = arith.constant 0.000000e+00 : f32
    %3 = vector.broadcast %cst_3 : f32 to vector<4x4096xf32>
    %4 = arith.cmpf oge, %2, %3 : vector<4x4096xf32>
    %cst_4 = arith.constant 2.000000e-01 : f32
    %5 = vector.broadcast %cst_4 : f32 to vector<4x4096xf32>
    %6 = arith.mulf %5, %2 : vector<4x4096xf32>
    %7 = arith.select %4, %2, %6 : vector<4x4096xi1>, vector<4x4096xf32>
    %8 = arith.truncf %7 : vector<4x4096xf32> to vector<4x4096xbf16>
    %c0_5 = arith.constant 0 : index
    %c0_6 = arith.constant 0 : index
    %9 = vector.load %arg4[%c0_5, %c0_6] : memref<4x4096xbf16, #tpu.memory_space<vmem>>, vector<4x4096xbf16>
    tpu.vector_store %arg4[%c0_5, %c0_6], %8 {strides = array<i32>} : memref<4x4096xbf16, #tpu.memory_space<vmem>>, vector<4x4096xbf16>,
    return
  }
}

module attributes {stable_mosaic.version = 11 : i64} {
  func.func @conv_t_kernel(%arg0: memref<64x1024xbf16, #tpu.memory_space<vmem>>, %arg1: memref<8x64xbf16, #tpu.memory_space<vmem>>, %arg2: memref<8x1xf32, #tpu.memory_space<vmem>>, %arg3: memref<8x1xf32, #tpu.memory_space<vmem>>, %arg4: memref<8x1024xbf16, #tpu.memory_space<vmem>>) attributes {dimension_semantics = [], scalar_prefetch = 0 : i64, scratch_operands = 0 : i64, tpu.core_type = #tpu.core_type<tc>} {
    %c0 = arith.constant 0 : index
    %c0_0 = arith.constant 0 : index
    %0 = vector.load %arg1[%c0, %c0_0] : memref<8x64xbf16, #tpu.memory_space<vmem>>, vector<8x64xbf16>
    %c0_1 = arith.constant 0 : index
    %c0_2 = arith.constant 0 : index
    %1 = vector.load %arg0[%c0_1, %c0_2] : memref<64x1024xbf16, #tpu.memory_space<vmem>>, vector<64x1024xbf16>
    %cst = arith.constant dense<0.000000e+00> : vector<8x1024xf32>
    %2 = tpu.matmul %0, %1, %cst {dimension_numbers = #tpu.dot_dimension_numbers<[1], [0], [0], [1], [0, 0, 1, 1], [], []>} : vector<8x64xbf16>, vector<64x1024xbf16>, vector<8x1024xf32> -> vector<8x1024xf32>
    %cst_3 = arith.constant dense<0.000000e+00> : vector<8xf32>
    %3 = vector.multi_reduction <add>, %2, %cst_3 [1] : vector<8x1024xf32> to vector<8xf32>
    %4 = vector.shape_cast %3 : vector<8xf32> to vector<8x1xf32>
    %cst_4 = arith.constant 1.024000e+03 : f32
    %5 = vector.broadcast %cst_4 : f32 to vector<8x1xf32>
    %6 = arith.divf %4, %5 : vector<8x1xf32>
    %7 = vector.broadcast %6 : vector<8x1xf32> to vector<8x1024xf32>
    %8 = arith.subf %2, %7 : vector<8x1024xf32>
    %9 = arith.mulf %8, %8 : vector<8x1024xf32>
    %cst_5 = arith.constant dense<0.000000e+00> : vector<8xf32>
    %10 = vector.multi_reduction <add>, %9, %cst_5 [1] : vector<8x1024xf32> to vector<8xf32>
    %11 = vector.shape_cast %10 : vector<8xf32> to vector<8x1xf32>
    %cst_6 = arith.constant 1.024000e+03 : f32
    %12 = vector.broadcast %cst_6 : f32 to vector<8x1xf32>
    %13 = arith.divf %11, %12 : vector<8x1xf32>
    %14 = vector.broadcast %6 : vector<8x1xf32> to vector<8x1024xf32>
    %15 = arith.subf %2, %14 : vector<8x1024xf32>
    %cst_7 = arith.constant 9.99999974E-6 : f32
    %16 = vector.broadcast %cst_7 : f32 to vector<8x1xf32>
    %17 = arith.addf %13, %16 : vector<8x1xf32>
    %18 = math.rsqrt %17 : vector<8x1xf32>
    %19 = vector.broadcast %18 : vector<8x1xf32> to vector<8x1024xf32>
    %20 = arith.mulf %15, %19 : vector<8x1024xf32>
    %c0_8 = arith.constant 0 : index
    %c0_9 = arith.constant 0 : index
    %21 = vector.load %arg2[%c0_8, %c0_9] : memref<8x1xf32, #tpu.memory_space<vmem>>, vector<8x1xf32>
    %22 = vector.broadcast %21 : vector<8x1xf32> to vector<8x1024xf32>
    %23 = arith.mulf %20, %22 : vector<8x1024xf32>
    %c0_10 = arith.constant 0 : index
    %c0_11 = arith.constant 0 : index
    %24 = vector.load %arg3[%c0_10, %c0_11] : memref<8x1xf32, #tpu.memory_space<vmem>>, vector<8x1xf32>
    %25 = vector.broadcast %24 : vector<8x1xf32> to vector<8x1024xf32>
    %26 = arith.addf %23, %25 : vector<8x1024xf32>
    %cst_12 = arith.constant 0.000000e+00 : f32
    %27 = vector.broadcast %cst_12 : f32 to vector<8x1024xf32>
    %28 = arith.cmpf oge, %26, %27 : vector<8x1024xf32>
    %cst_13 = arith.constant 2.000000e-01 : f32
    %29 = vector.broadcast %cst_13 : f32 to vector<8x1024xf32>
    %30 = arith.mulf %29, %26 : vector<8x1024xf32>
    %31 = arith.select %28, %26, %30 : vector<8x1024xi1>, vector<8x1024xf32>
    %32 = arith.truncf %31 : vector<8x1024xf32> to vector<8x1024xbf16>
    %c0_14 = arith.constant 0 : index
    %c0_15 = arith.constant 0 : index
    %33 = vector.load %arg4[%c0_14, %c0_15] : memref<8x1024xbf16, #tpu.memory_space<vmem>>, vector<8x1024xbf16>
    tpu.vector_store %arg4[%c0_14, %c0_15], %32 {strides = array<i32>} : memref<8x1024xbf16, #tpu.memory_space<vmem>>, vector<8x1024xbf16>,
    return
  }
}

module attributes {stable_mosaic.version = 11 : i64} {
  func.func @conv_t_kernel(%arg0: memref<128x256xbf16, #tpu.memory_space<vmem>>, %arg1: memref<16x128xbf16, #tpu.memory_space<vmem>>, %arg2: memref<16x1xf32, #tpu.memory_space<vmem>>, %arg3: memref<16x1xf32, #tpu.memory_space<vmem>>, %arg4: memref<16x256xbf16, #tpu.memory_space<vmem>>) attributes {dimension_semantics = [], scalar_prefetch = 0 : i64, scratch_operands = 0 : i64, tpu.core_type = #tpu.core_type<tc>} {
    %c0 = arith.constant 0 : index
    %c0_0 = arith.constant 0 : index
    %0 = vector.load %arg1[%c0, %c0_0] : memref<16x128xbf16, #tpu.memory_space<vmem>>, vector<16x128xbf16>
    %c0_1 = arith.constant 0 : index
    %c0_2 = arith.constant 0 : index
    %1 = vector.load %arg0[%c0_1, %c0_2] : memref<128x256xbf16, #tpu.memory_space<vmem>>, vector<128x256xbf16>
    %cst = arith.constant dense<0.000000e+00> : vector<16x256xf32>
    %2 = tpu.matmul %0, %1, %cst {dimension_numbers = #tpu.dot_dimension_numbers<[1], [0], [0], [1], [0, 0, 1, 1], [], []>} : vector<16x128xbf16>, vector<128x256xbf16>, vector<16x256xf32> -> vector<16x256xf32>
    %cst_3 = arith.constant dense<0.000000e+00> : vector<16xf32>
    %3 = vector.multi_reduction <add>, %2, %cst_3 [1] : vector<16x256xf32> to vector<16xf32>
    %4 = vector.shape_cast %3 : vector<16xf32> to vector<16x1xf32>
    %cst_4 = arith.constant 2.560000e+02 : f32
    %5 = vector.broadcast %cst_4 : f32 to vector<16x1xf32>
    %6 = arith.divf %4, %5 : vector<16x1xf32>
    %7 = vector.broadcast %6 : vector<16x1xf32> to vector<16x256xf32>
    %8 = arith.subf %2, %7 : vector<16x256xf32>
    %9 = arith.mulf %8, %8 : vector<16x256xf32>
    %cst_5 = arith.constant dense<0.000000e+00> : vector<16xf32>
    %10 = vector.multi_reduction <add>, %9, %cst_5 [1] : vector<16x256xf32> to vector<16xf32>
    %11 = vector.shape_cast %10 : vector<16xf32> to vector<16x1xf32>
    %cst_6 = arith.constant 2.560000e+02 : f32
    %12 = vector.broadcast %cst_6 : f32 to vector<16x1xf32>
    %13 = arith.divf %11, %12 : vector<16x1xf32>
    %14 = vector.broadcast %6 : vector<16x1xf32> to vector<16x256xf32>
    %15 = arith.subf %2, %14 : vector<16x256xf32>
    %cst_7 = arith.constant 9.99999974E-6 : f32
    %16 = vector.broadcast %cst_7 : f32 to vector<16x1xf32>
    %17 = arith.addf %13, %16 : vector<16x1xf32>
    %18 = math.rsqrt %17 : vector<16x1xf32>
    %19 = vector.broadcast %18 : vector<16x1xf32> to vector<16x256xf32>
    %20 = arith.mulf %15, %19 : vector<16x256xf32>
    %c0_8 = arith.constant 0 : index
    %c0_9 = arith.constant 0 : index
    %21 = vector.load %arg2[%c0_8, %c0_9] : memref<16x1xf32, #tpu.memory_space<vmem>>, vector<16x1xf32>
    %22 = vector.broadcast %21 : vector<16x1xf32> to vector<16x256xf32>
    %23 = arith.mulf %20, %22 : vector<16x256xf32>
    %c0_10 = arith.constant 0 : index
    %c0_11 = arith.constant 0 : index
    %24 = vector.load %arg3[%c0_10, %c0_11] : memref<16x1xf32, #tpu.memory_space<vmem>>, vector<16x1xf32>
    %25 = vector.broadcast %24 : vector<16x1xf32> to vector<16x256xf32>
    %26 = arith.addf %23, %25 : vector<16x256xf32>
    %cst_12 = arith.constant 0.000000e+00 : f32
    %27 = vector.broadcast %cst_12 : f32 to vector<16x256xf32>
    %28 = arith.cmpf oge, %26, %27 : vector<16x256xf32>
    %cst_13 = arith.constant 2.000000e-01 : f32
    %29 = vector.broadcast %cst_13 : f32 to vector<16x256xf32>
    %30 = arith.mulf %29, %26 : vector<16x256xf32>
    %31 = arith.select %28, %26, %30 : vector<16x256xi1>, vector<16x256xf32>
    %32 = arith.truncf %31 : vector<16x256xf32> to vector<16x256xbf16>
    %c0_14 = arith.constant 0 : index
    %c0_15 = arith.constant 0 : index
    %33 = vector.load %arg4[%c0_14, %c0_15] : memref<16x256xbf16, #tpu.memory_space<vmem>>, vector<16x256xbf16>
    tpu.vector_store %arg4[%c0_14, %c0_15], %32 {strides = array<i32>} : memref<16x256xbf16, #tpu.memory_space<vmem>>, vector<16x256xbf16>,
    return
  }
}

module attributes {stable_mosaic.version = 11 : i64} {
  func.func @conv_t_kernel(%arg0: memref<256x16xbf16, #tpu.memory_space<vmem>>, %arg1: memref<16x256xbf16, #tpu.memory_space<vmem>>, %arg2: memref<16x1xf32, #tpu.memory_space<vmem>>, %arg3: memref<16x1xf32, #tpu.memory_space<vmem>>, %arg4: memref<16x16xbf16, #tpu.memory_space<vmem>>) attributes {dimension_semantics = [], scalar_prefetch = 0 : i64, scratch_operands = 0 : i64, tpu.core_type = #tpu.core_type<tc>} {
    %c0 = arith.constant 0 : index
    %c0_0 = arith.constant 0 : index
    %0 = vector.load %arg1[%c0, %c0_0] : memref<16x256xbf16, #tpu.memory_space<vmem>>, vector<16x256xbf16>
    %c0_1 = arith.constant 0 : index
    %c0_2 = arith.constant 0 : index
    %1 = vector.load %arg0[%c0_1, %c0_2] : memref<256x16xbf16, #tpu.memory_space<vmem>>, vector<256x16xbf16>
    %cst = arith.constant dense<0.000000e+00> : vector<16x16xf32>
    %2 = tpu.matmul %0, %1, %cst {dimension_numbers = #tpu.dot_dimension_numbers<[1], [0], [0], [1], [0, 0, 1, 1], [], []>} : vector<16x256xbf16>, vector<256x16xbf16>, vector<16x16xf32> -> vector<16x16xf32>
    %3 = arith.truncf %2 : vector<16x16xf32> to vector<16x16xbf16>
    %c0_3 = arith.constant 0 : index
    %c0_4 = arith.constant 0 : index
    %4 = vector.load %arg4[%c0_3, %c0_4] : memref<16x16xbf16, #tpu.memory_space<vmem>>, vector<16x16xbf16>
    tpu.vector_store %arg4[%c0_3, %c0_4], %3 {strides = array<i32>} : memref<16x16xbf16, #tpu.memory_space<vmem>>, vector<16x16xbf16>,
    return
  }
}

module attributes {stable_mosaic.version = 11 : i64} {
  func.func @lstm_head_kernel(%arg0: memref<16x16xbf16, #tpu.memory_space<vmem>>, %arg1: memref<16x512xbf16, #tpu.memory_space<vmem>>, %arg2: memref<128x512xbf16, #tpu.memory_space<vmem>>, %arg3: memref<1x512xf32, #tpu.memory_space<vmem>>, %arg4: memref<128x512xbf16, #tpu.memory_space<vmem>>, %arg5: memref<128x512xbf16, #tpu.memory_space<vmem>>, %arg6: memref<1x512xf32, #tpu.memory_space<vmem>>, %arg7: memref<128x1xbf16, #tpu.memory_space<vmem>>, %arg8: memref<1x1xf32, #tpu.memory_space<smem>>, %arg9: memref<16x1xf32, #tpu.memory_space<vmem>>, %arg10: memref<16x512xf32, #tpu.memory_space<vmem>>, %arg11: memref<16x128xf32, #tpu.memory_space<vmem>>, %arg12: memref<16x128xf32, #tpu.memory_space<vmem>>, %arg13: memref<2x128xf32, #tpu.memory_space<vmem>>, %arg14: memref<2x128xf32, #tpu.memory_space<vmem>>) attributes {dimension_semantics = [], scalar_prefetch = 0 : i64, scratch_operands = 5 : i64, tpu.core_type = #tpu.core_type<tc>} {
    %c0 = arith.constant 0 : index
    %c0_0 = arith.constant 0 : index
    %0 = vector.load %arg0[%c0, %c0_0] : memref<16x16xbf16, #tpu.memory_space<vmem>>, vector<16x16xbf16>
    %c0_1 = arith.constant 0 : index
    %c0_2 = arith.constant 0 : index
    %1 = vector.load %arg1[%c0_1, %c0_2] : memref<16x512xbf16, #tpu.memory_space<vmem>>, vector<16x512xbf16>
    %cst = arith.constant dense<0.000000e+00> : vector<16x512xf32>
    %2 = tpu.matmul %0, %1, %cst {dimension_numbers = #tpu.dot_dimension_numbers<[1], [0], [0], [1], [0, 0, 1, 1], [], []>} : vector<16x16xbf16>, vector<16x512xbf16>, vector<16x512xf32> -> vector<16x512xf32>
    %c0_3 = arith.constant 0 : index
    %c0_4 = arith.constant 0 : index
    %3 = vector.load %arg3[%c0_3, %c0_4] : memref<1x512xf32, #tpu.memory_space<vmem>>, vector<1x512xf32>
    %4 = vector.broadcast %3 : vector<1x512xf32> to vector<16x512xf32>
    %5 = arith.addf %2, %4 : vector<16x512xf32>
    %c0_5 = arith.constant 0 : index
    %c0_6 = arith.constant 0 : index
    %6 = vector.load %arg10[%c0_5, %c0_6] : memref<16x512xf32, #tpu.memory_space<vmem>>, vector<16x512xf32>
    tpu.vector_store %arg10[%c0_5, %c0_6], %5 {strides = array<i32>} : memref<16x512xf32, #tpu.memory_space<vmem>>, vector<16x512xf32>,
    %cst_7 = arith.constant 0.000000e+00 : f32
    %7 = vector.broadcast %cst_7 : f32 to vector<2x128xf32>
    %c0_8 = arith.constant 0 : index
    %c0_9 = arith.constant 0 : index
    %8 = vector.load %arg13[%c0_8, %c0_9] : memref<2x128xf32, #tpu.memory_space<vmem>>, vector<2x128xf32>
    tpu.vector_store %arg13[%c0_8, %c0_9], %7 {strides = array<i32>} : memref<2x128xf32, #tpu.memory_space<vmem>>, vector<2x128xf32>,
    %cst_10 = arith.constant 0.000000e+00 : f32
    %9 = vector.broadcast %cst_10 : f32 to vector<2x128xf32>
    %c0_11 = arith.constant 0 : index
    %c0_12 = arith.constant 0 : index
    %10 = vector.load %arg14[%c0_11, %c0_12] : memref<2x128xf32, #tpu.memory_space<vmem>>, vector<2x128xf32>
    tpu.vector_store %arg14[%c0_11, %c0_12], %9 {strides = array<i32>} : memref<2x128xf32, #tpu.memory_space<vmem>>, vector<2x128xf32>,
    %c0_13 = arith.constant 0 : index
    %c0_14 = arith.constant 0 : index
    %11 = vector.load %arg10[%c0_13, %c0_14] : memref<16x512xf32, #tpu.memory_space<vmem>>, vector<2x512xf32>
    %c0_15 = arith.constant 0 : index
    %c0_16 = arith.constant 0 : index
    %12 = vector.load %arg13[%c0_15, %c0_16] : memref<2x128xf32, #tpu.memory_space<vmem>>, vector<2x128xf32>
    %13 = arith.truncf %12 : vector<2x128xf32> to vector<2x128xbf16>
    %c0_17 = arith.constant 0 : index
    %c0_18 = arith.constant 0 : index
    %14 = vector.load %arg2[%c0_17, %c0_18] : memref<128x512xbf16, #tpu.memory_space<vmem>>, vector<128x512xbf16>
    %cst_19 = arith.constant dense<0.000000e+00> : vector<2x512xf32>
    %15 = tpu.matmul %13, %14, %cst_19 {dimension_numbers = #tpu.dot_dimension_numbers<[1], [0], [0], [1], [0, 0, 1, 1], [], []>} : vector<2x128xbf16>, vector<128x512xbf16>, vector<2x512xf32> -> vector<2x512xf32>
    %16 = arith.addf %11, %15 : vector<2x512xf32>
    %17 = vector.extract_strided_slice %16 {offsets = [0, 0], sizes = [2, 128], strides = [1, 1]} : vector<2x512xf32> to vector<2x128xf32>
    %18 = arith.negf %17 : vector<2x128xf32>
    %19 = math.exp %18 : vector<2x128xf32>
    %cst_20 = arith.constant 1.000000e+00 : f32
    %20 = vector.broadcast %cst_20 : f32 to vector<2x128xf32>
    %21 = arith.addf %20, %19 : vector<2x128xf32>
    %22 = arith.divf %20, %21 : vector<2x128xf32>
    %23 = vector.extract_strided_slice %16 {offsets = [0, 128], sizes = [2, 128], strides = [1, 1]} : vector<2x512xf32> to vector<2x128xf32>
    %24 = arith.negf %23 : vector<2x128xf32>
    %25 = math.exp %24 : vector<2x128xf32>
    %cst_21 = arith.constant 1.000000e+00 : f32
    %26 = vector.broadcast %cst_21 : f32 to vector<2x128xf32>
    %27 = arith.addf %26, %25 : vector<2x128xf32>
    %28 = arith.divf %26, %27 : vector<2x128xf32>
    %29 = vector.extract_strided_slice %16 {offsets = [0, 256], sizes = [2, 128], strides = [1, 1]} : vector<2x512xf32> to vector<2x128xf32>
    %30 = math.tanh %29 : vector<2x128xf32>
    %31 = vector.extract_strided_slice %16 {offsets = [0, 384], sizes = [2, 128], strides = [1, 1]} : vector<2x512xf32> to vector<2x128xf32>
    %32 = arith.negf %31 : vector<2x128xf32>
    %33 = math.exp %32 : vector<2x128xf32>
    %cst_22 = arith.constant 1.000000e+00 : f32
    %34 = vector.broadcast %cst_22 : f32 to vector<2x128xf32>
    %35 = arith.addf %34, %33 : vector<2x128xf32>
    %36 = arith.divf %34, %35 : vector<2x128xf32>
    %c0_23 = arith.constant 0 : index
    %c0_24 = arith.constant 0 : index
    %37 = vector.load %arg14[%c0_23, %c0_24] : memref<2x128xf32, #tpu.memory_space<vmem>>, vector<2x128xf32>
    %38 = arith.mulf %28, %37 : vector<2x128xf32>
    %39 = arith.mulf %22, %30 : vector<2x128xf32>
    %40 = arith.addf %38, %39 : vector<2x128xf32>
    %41 = math.tanh %40 : vector<2x128xf32>
    %42 = arith.mulf %36, %41 : vector<2x128xf32>
    %c0_25 = arith.constant 0 : index
    %c0_26 = arith.constant 0 : index
    %43 = vector.load %arg14[%c0_25, %c0_26] : memref<2x128xf32, #tpu.memory_space<vmem>>, vector<2x128xf32>
    tpu.vector_store %arg14[%c0_25, %c0_26], %40 {strides = array<i32>} : memref<2x128xf32, #tpu.memory_space<vmem>>, vector<2x128xf32>,
    %c0_27 = arith.constant 0 : index
    %c0_28 = arith.constant 0 : index
    %44 = vector.load %arg13[%c0_27, %c0_28] : memref<2x128xf32, #tpu.memory_space<vmem>>, vector<2x128xf32>
    tpu.vector_store %arg13[%c0_27, %c0_28], %42 {strides = array<i32>} : memref<2x128xf32, #tpu.memory_space<vmem>>, vector<2x128xf32>,
    %c0_29 = arith.constant 0 : index
    %c0_30 = arith.constant 0 : index
    %45 = vector.load %arg11[%c0_29, %c0_30] : memref<16x128xf32, #tpu.memory_space<vmem>>, vector<2x128xf32>
    tpu.vector_store %arg11[%c0_29, %c0_30], %42 {strides = array<i32>} : memref<16x128xf32, #tpu.memory_space<vmem>>, vector<2x128xf32>,
    %c2 = arith.constant 2 : index
    %c0_31 = arith.constant 0 : index
    %46 = vector.load %arg10[%c2, %c0_31] : memref<16x512xf32, #tpu.memory_space<vmem>>, vector<2x512xf32>
    %c0_32 = arith.constant 0 : index
    %c0_33 = arith.constant 0 : index
    %47 = vector.load %arg13[%c0_32, %c0_33] : memref<2x128xf32, #tpu.memory_space<vmem>>, vector<2x128xf32>
    %48 = arith.truncf %47 : vector<2x128xf32> to vector<2x128xbf16>
    %c0_34 = arith.constant 0 : index
    %c0_35 = arith.constant 0 : index
    %49 = vector.load %arg2[%c0_34, %c0_35] : memref<128x512xbf16, #tpu.memory_space<vmem>>, vector<128x512xbf16>
    %cst_36 = arith.constant dense<0.000000e+00> : vector<2x512xf32>
    %50 = tpu.matmul %48, %49, %cst_36 {dimension_numbers = #tpu.dot_dimension_numbers<[1], [0], [0], [1], [0, 0, 1, 1], [], []>} : vector<2x128xbf16>, vector<128x512xbf16>, vector<2x512xf32> -> vector<2x512xf32>
    %51 = arith.addf %46, %50 : vector<2x512xf32>
    %52 = vector.extract_strided_slice %51 {offsets = [0, 0], sizes = [2, 128], strides = [1, 1]} : vector<2x512xf32> to vector<2x128xf32>
    %53 = arith.negf %52 : vector<2x128xf32>
    %54 = math.exp %53 : vector<2x128xf32>
    %cst_37 = arith.constant 1.000000e+00 : f32
    %55 = vector.broadcast %cst_37 : f32 to vector<2x128xf32>
    %56 = arith.addf %55, %54 : vector<2x128xf32>
    %57 = arith.divf %55, %56 : vector<2x128xf32>
    %58 = vector.extract_strided_slice %51 {offsets = [0, 128], sizes = [2, 128], strides = [1, 1]} : vector<2x512xf32> to vector<2x128xf32>
    %59 = arith.negf %58 : vector<2x128xf32>
    %60 = math.exp %59 : vector<2x128xf32>
    %cst_38 = arith.constant 1.000000e+00 : f32
    %61 = vector.broadcast %cst_38 : f32 to vector<2x128xf32>
    %62 = arith.addf %61, %60 : vector<2x128xf32>
    %63 = arith.divf %61, %62 : vector<2x128xf32>
    %64 = vector.extract_strided_slice %51 {offsets = [0, 256], sizes = [2, 128], strides = [1, 1]} : vector<2x512xf32> to vector<2x128xf32>
    %65 = math.tanh %64 : vector<2x128xf32>
    %66 = vector.extract_strided_slice %51 {offsets = [0, 384], sizes = [2, 128], strides = [1, 1]} : vector<2x512xf32> to vector<2x128xf32>
    %67 = arith.negf %66 : vector<2x128xf32>
    %68 = math.exp %67 : vector<2x128xf32>
    %cst_39 = arith.constant 1.000000e+00 : f32
    %69 = vector.broadcast %cst_39 : f32 to vector<2x128xf32>
    %70 = arith.addf %69, %68 : vector<2x128xf32>
    %71 = arith.divf %69, %70 : vector<2x128xf32>
    %c0_40 = arith.constant 0 : index
    %c0_41 = arith.constant 0 : index
    %72 = vector.load %arg14[%c0_40, %c0_41] : memref<2x128xf32, #tpu.memory_space<vmem>>, vector<2x128xf32>
    %73 = arith.mulf %63, %72 : vector<2x128xf32>
    %74 = arith.mulf %57, %65 : vector<2x128xf32>
    %75 = arith.addf %73, %74 : vector<2x128xf32>
    %76 = math.tanh %75 : vector<2x128xf32>
    %77 = arith.mulf %71, %76 : vector<2x128xf32>
    %c0_42 = arith.constant 0 : index
    %c0_43 = arith.constant 0 : index
    %78 = vector.load %arg14[%c0_42, %c0_43] : memref<2x128xf32, #tpu.memory_space<vmem>>, vector<2x128xf32>
    tpu.vector_store %arg14[%c0_42, %c0_43], %75 {strides = array<i32>} : memref<2x128xf32, #tpu.memory_space<vmem>>, vector<2x128xf32>,
    %c0_44 = arith.constant 0 : index
    %c0_45 = arith.constant 0 : index
    %79 = vector.load %arg13[%c0_44, %c0_45] : memref<2x128xf32, #tpu.memory_space<vmem>>, vector<2x128xf32>
    tpu.vector_store %arg13[%c0_44, %c0_45], %77 {strides = array<i32>} : memref<2x128xf32, #tpu.memory_space<vmem>>, vector<2x128xf32>,
    %c2_46 = arith.constant 2 : index
    %c0_47 = arith.constant 0 : index
    %80 = vector.load %arg11[%c2_46, %c0_47] : memref<16x128xf32, #tpu.memory_space<vmem>>, vector<2x128xf32>
    tpu.vector_store %arg11[%c2_46, %c0_47], %77 {strides = array<i32>} : memref<16x128xf32, #tpu.memory_space<vmem>>, vector<2x128xf32>,
    %c4 = arith.constant 4 : index
    %c0_48 = arith.constant 0 : index
    %81 = vector.load %arg10[%c4, %c0_48] : memref<16x512xf32, #tpu.memory_space<vmem>>, vector<2x512xf32>
    %c0_49 = arith.constant 0 : index
    %c0_50 = arith.constant 0 : index
    %82 = vector.load %arg13[%c0_49, %c0_50] : memref<2x128xf32, #tpu.memory_space<vmem>>, vector<2x128xf32>
    %83 = arith.truncf %82 : vector<2x128xf32> to vector<2x128xbf16>
    %c0_51 = arith.constant 0 : index
    %c0_52 = arith.constant 0 : index
    %84 = vector.load %arg2[%c0_51, %c0_52] : memref<128x512xbf16, #tpu.memory_space<vmem>>, vector<128x512xbf16>
    %cst_53 = arith.constant dense<0.000000e+00> : vector<2x512xf32>
    %85 = tpu.matmul %83, %84, %cst_53 {dimension_numbers = #tpu.dot_dimension_numbers<[1], [0], [0], [1], [0, 0, 1, 1], [], []>} : vector<2x128xbf16>, vector<128x512xbf16>, vector<2x512xf32> -> vector<2x512xf32>
    %86 = arith.addf %81, %85 : vector<2x512xf32>
    %87 = vector.extract_strided_slice %86 {offsets = [0, 0], sizes = [2, 128], strides = [1, 1]} : vector<2x512xf32> to vector<2x128xf32>
    %88 = arith.negf %87 : vector<2x128xf32>
    %89 = math.exp %88 : vector<2x128xf32>
    %cst_54 = arith.constant 1.000000e+00 : f32
    %90 = vector.broadcast %cst_54 : f32 to vector<2x128xf32>
    %91 = arith.addf %90, %89 : vector<2x128xf32>
    %92 = arith.divf %90, %91 : vector<2x128xf32>
    %93 = vector.extract_strided_slice %86 {offsets = [0, 128], sizes = [2, 128], strides = [1, 1]} : vector<2x512xf32> to vector<2x128xf32>
    %94 = arith.negf %93 : vector<2x128xf32>
    %95 = math.exp %94 : vector<2x128xf32>
    %cst_55 = arith.constant 1.000000e+00 : f32
    %96 = vector.broadcast %cst_55 : f32 to vector<2x128xf32>
    %97 = arith.addf %96, %95 : vector<2x128xf32>
    %98 = arith.divf %96, %97 : vector<2x128xf32>
    %99 = vector.extract_strided_slice %86 {offsets = [0, 256], sizes = [2, 128], strides = [1, 1]} : vector<2x512xf32> to vector<2x128xf32>
    %100 = math.tanh %99 : vector<2x128xf32>
    %101 = vector.extract_strided_slice %86 {offsets = [0, 384], sizes = [2, 128], strides = [1, 1]} : vector<2x512xf32> to vector<2x128xf32>
    %102 = arith.negf %101 : vector<2x128xf32>
    %103 = math.exp %102 : vector<2x128xf32>
    %cst_56 = arith.constant 1.000000e+00 : f32
    %104 = vector.broadcast %cst_56 : f32 to vector<2x128xf32>
    %105 = arith.addf %104, %103 : vector<2x128xf32>
    %106 = arith.divf %104, %105 : vector<2x128xf32>
    %c0_57 = arith.constant 0 : index
    %c0_58 = arith.constant 0 : index
    %107 = vector.load %arg14[%c0_57, %c0_58] : memref<2x128xf32, #tpu.memory_space<vmem>>, vector<2x128xf32>
    %108 = arith.mulf %98, %107 : vector<2x128xf32>
    %109 = arith.mulf %92, %100 : vector<2x128xf32>
    %110 = arith.addf %108, %109 : vector<2x128xf32>
    %111 = math.tanh %110 : vector<2x128xf32>
    %112 = arith.mulf %106, %111 : vector<2x128xf32>
    %c0_59 = arith.constant 0 : index
    %c0_60 = arith.constant 0 : index
    %113 = vector.load %arg14[%c0_59, %c0_60] : memref<2x128xf32, #tpu.memory_space<vmem>>, vector<2x128xf32>
    tpu.vector_store %arg14[%c0_59, %c0_60], %110 {strides = array<i32>} : memref<2x128xf32, #tpu.memory_space<vmem>>, vector<2x128xf32>,
    %c0_61 = arith.constant 0 : index
    %c0_62 = arith.constant 0 : index
    %114 = vector.load %arg13[%c0_61, %c0_62] : memref<2x128xf32, #tpu.memory_space<vmem>>, vector<2x128xf32>
    tpu.vector_store %arg13[%c0_61, %c0_62], %112 {strides = array<i32>} : memref<2x128xf32, #tpu.memory_space<vmem>>, vector<2x128xf32>,
    %c4_63 = arith.constant 4 : index
    %c0_64 = arith.constant 0 : index
    %115 = vector.load %arg11[%c4_63, %c0_64] : memref<16x128xf32, #tpu.memory_space<vmem>>, vector<2x128xf32>
    tpu.vector_store %arg11[%c4_63, %c0_64], %112 {strides = array<i32>} : memref<16x128xf32, #tpu.memory_space<vmem>>, vector<2x128xf32>,
    %c6 = arith.constant 6 : index
    %c0_65 = arith.constant 0 : index
    %116 = vector.load %arg10[%c6, %c0_65] : memref<16x512xf32, #tpu.memory_space<vmem>>, vector<2x512xf32>
    %c0_66 = arith.constant 0 : index
    %c0_67 = arith.constant 0 : index
    %117 = vector.load %arg13[%c0_66, %c0_67] : memref<2x128xf32, #tpu.memory_space<vmem>>, vector<2x128xf32>
    %118 = arith.truncf %117 : vector<2x128xf32> to vector<2x128xbf16>
    %c0_68 = arith.constant 0 : index
    %c0_69 = arith.constant 0 : index
    %119 = vector.load %arg2[%c0_68, %c0_69] : memref<128x512xbf16, #tpu.memory_space<vmem>>, vector<128x512xbf16>
    %cst_70 = arith.constant dense<0.000000e+00> : vector<2x512xf32>
    %120 = tpu.matmul %118, %119, %cst_70 {dimension_numbers = #tpu.dot_dimension_numbers<[1], [0], [0], [1], [0, 0, 1, 1], [], []>} : vector<2x128xbf16>, vector<128x512xbf16>, vector<2x512xf32> -> vector<2x512xf32>
    %121 = arith.addf %116, %120 : vector<2x512xf32>
    %122 = vector.extract_strided_slice %121 {offsets = [0, 0], sizes = [2, 128], strides = [1, 1]} : vector<2x512xf32> to vector<2x128xf32>
    %123 = arith.negf %122 : vector<2x128xf32>
    %124 = math.exp %123 : vector<2x128xf32>
    %cst_71 = arith.constant 1.000000e+00 : f32
    %125 = vector.broadcast %cst_71 : f32 to vector<2x128xf32>
    %126 = arith.addf %125, %124 : vector<2x128xf32>
    %127 = arith.divf %125, %126 : vector<2x128xf32>
    %128 = vector.extract_strided_slice %121 {offsets = [0, 128], sizes = [2, 128], strides = [1, 1]} : vector<2x512xf32> to vector<2x128xf32>
    %129 = arith.negf %128 : vector<2x128xf32>
    %130 = math.exp %129 : vector<2x128xf32>
    %cst_72 = arith.constant 1.000000e+00 : f32
    %131 = vector.broadcast %cst_72 : f32 to vector<2x128xf32>
    %132 = arith.addf %131, %130 : vector<2x128xf32>
    %133 = arith.divf %131, %132 : vector<2x128xf32>
    %134 = vector.extract_strided_slice %121 {offsets = [0, 256], sizes = [2, 128], strides = [1, 1]} : vector<2x512xf32> to vector<2x128xf32>
    %135 = math.tanh %134 : vector<2x128xf32>
    %136 = vector.extract_strided_slice %121 {offsets = [0, 384], sizes = [2, 128], strides = [1, 1]} : vector<2x512xf32> to vector<2x128xf32>
    %137 = arith.negf %136 : vector<2x128xf32>
    %138 = math.exp %137 : vector<2x128xf32>
    %cst_73 = arith.constant 1.000000e+00 : f32
    %139 = vector.broadcast %cst_73 : f32 to vector<2x128xf32>
    %140 = arith.addf %139, %138 : vector<2x128xf32>
    %141 = arith.divf %139, %140 : vector<2x128xf32>
    %c0_74 = arith.constant 0 : index
    %c0_75 = arith.constant 0 : index
    %142 = vector.load %arg14[%c0_74, %c0_75] : memref<2x128xf32, #tpu.memory_space<vmem>>, vector<2x128xf32>
    %143 = arith.mulf %133, %142 : vector<2x128xf32>
    %144 = arith.mulf %127, %135 : vector<2x128xf32>
    %145 = arith.addf %143, %144 : vector<2x128xf32>
    %146 = math.tanh %145 : vector<2x128xf32>
    %147 = arith.mulf %141, %146 : vector<2x128xf32>
    %c0_76 = arith.constant 0 : index
    %c0_77 = arith.constant 0 : index
    %148 = vector.load %arg14[%c0_76, %c0_77] : memref<2x128xf32, #tpu.memory_space<vmem>>, vector<2x128xf32>
    tpu.vector_store %arg14[%c0_76, %c0_77], %145 {strides = array<i32>} : memref<2x128xf32, #tpu.memory_space<vmem>>, vector<2x128xf32>,
    %c0_78 = arith.constant 0 : index
    %c0_79 = arith.constant 0 : index
    %149 = vector.load %arg13[%c0_78, %c0_79] : memref<2x128xf32, #tpu.memory_space<vmem>>, vector<2x128xf32>
    tpu.vector_store %arg13[%c0_78, %c0_79], %147 {strides = array<i32>} : memref<2x128xf32, #tpu.memory_space<vmem>>, vector<2x128xf32>,
    %c6_80 = arith.constant 6 : index
    %c0_81 = arith.constant 0 : index
    %150 = vector.load %arg11[%c6_80, %c0_81] : memref<16x128xf32, #tpu.memory_space<vmem>>, vector<2x128xf32>
    tpu.vector_store %arg11[%c6_80, %c0_81], %147 {strides = array<i32>} : memref<16x128xf32, #tpu.memory_space<vmem>>, vector<2x128xf32>,
    %c8 = arith.constant 8 : index
    %c0_82 = arith.constant 0 : index
    %151 = vector.load %arg10[%c8, %c0_82] : memref<16x512xf32, #tpu.memory_space<vmem>>, vector<2x512xf32>
    %c0_83 = arith.constant 0 : index
    %c0_84 = arith.constant 0 : index
    %152 = vector.load %arg13[%c0_83, %c0_84] : memref<2x128xf32, #tpu.memory_space<vmem>>, vector<2x128xf32>
    %153 = arith.truncf %152 : vector<2x128xf32> to vector<2x128xbf16>
    %c0_85 = arith.constant 0 : index
    %c0_86 = arith.constant 0 : index
    %154 = vector.load %arg2[%c0_85, %c0_86] : memref<128x512xbf16, #tpu.memory_space<vmem>>, vector<128x512xbf16>
    %cst_87 = arith.constant dense<0.000000e+00> : vector<2x512xf32>
    %155 = tpu.matmul %153, %154, %cst_87 {dimension_numbers = #tpu.dot_dimension_numbers<[1], [0], [0], [1], [0, 0, 1, 1], [], []>} : vector<2x128xbf16>, vector<128x512xbf16>, vector<2x512xf32> -> vector<2x512xf32>
    %156 = arith.addf %151, %155 : vector<2x512xf32>
    %157 = vector.extract_strided_slice %156 {offsets = [0, 0], sizes = [2, 128], strides = [1, 1]} : vector<2x512xf32> to vector<2x128xf32>
    %158 = arith.negf %157 : vector<2x128xf32>
    %159 = math.exp %158 : vector<2x128xf32>
    %cst_88 = arith.constant 1.000000e+00 : f32
    %160 = vector.broadcast %cst_88 : f32 to vector<2x128xf32>
    %161 = arith.addf %160, %159 : vector<2x128xf32>
    %162 = arith.divf %160, %161 : vector<2x128xf32>
    %163 = vector.extract_strided_slice %156 {offsets = [0, 128], sizes = [2, 128], strides = [1, 1]} : vector<2x512xf32> to vector<2x128xf32>
    %164 = arith.negf %163 : vector<2x128xf32>
    %165 = math.exp %164 : vector<2x128xf32>
    %cst_89 = arith.constant 1.000000e+00 : f32
    %166 = vector.broadcast %cst_89 : f32 to vector<2x128xf32>
    %167 = arith.addf %166, %165 : vector<2x128xf32>
    %168 = arith.divf %166, %167 : vector<2x128xf32>
    %169 = vector.extract_strided_slice %156 {offsets = [0, 256], sizes = [2, 128], strides = [1, 1]} : vector<2x512xf32> to vector<2x128xf32>
    %170 = math.tanh %169 : vector<2x128xf32>
    %171 = vector.extract_strided_slice %156 {offsets = [0, 384], sizes = [2, 128], strides = [1, 1]} : vector<2x512xf32> to vector<2x128xf32>
    %172 = arith.negf %171 : vector<2x128xf32>
    %173 = math.exp %172 : vector<2x128xf32>
    %cst_90 = arith.constant 1.000000e+00 : f32
    %174 = vector.broadcast %cst_90 : f32 to vector<2x128xf32>
    %175 = arith.addf %174, %173 : vector<2x128xf32>
    %176 = arith.divf %174, %175 : vector<2x128xf32>
    %c0_91 = arith.constant 0 : index
    %c0_92 = arith.constant 0 : index
    %177 = vector.load %arg14[%c0_91, %c0_92] : memref<2x128xf32, #tpu.memory_space<vmem>>, vector<2x128xf32>
    %178 = arith.mulf %168, %177 : vector<2x128xf32>
    %179 = arith.mulf %162, %170 : vector<2x128xf32>
    %180 = arith.addf %178, %179 : vector<2x128xf32>
    %181 = math.tanh %180 : vector<2x128xf32>
    %182 = arith.mulf %176, %181 : vector<2x128xf32>
    %c0_93 = arith.constant 0 : index
    %c0_94 = arith.constant 0 : index
    %183 = vector.load %arg14[%c0_93, %c0_94] : memref<2x128xf32, #tpu.memory_space<vmem>>, vector<2x128xf32>
    tpu.vector_store %arg14[%c0_93, %c0_94], %180 {strides = array<i32>} : memref<2x128xf32, #tpu.memory_space<vmem>>, vector<2x128xf32>,
    %c0_95 = arith.constant 0 : index
    %c0_96 = arith.constant 0 : index
    %184 = vector.load %arg13[%c0_95, %c0_96] : memref<2x128xf32, #tpu.memory_space<vmem>>, vector<2x128xf32>
    tpu.vector_store %arg13[%c0_95, %c0_96], %182 {strides = array<i32>} : memref<2x128xf32, #tpu.memory_space<vmem>>, vector<2x128xf32>,
    %c8_97 = arith.constant 8 : index
    %c0_98 = arith.constant 0 : index
    %185 = vector.load %arg11[%c8_97, %c0_98] : memref<16x128xf32, #tpu.memory_space<vmem>>, vector<2x128xf32>
    tpu.vector_store %arg11[%c8_97, %c0_98], %182 {strides = array<i32>} : memref<16x128xf32, #tpu.memory_space<vmem>>, vector<2x128xf32>,
    %c10 = arith.constant 10 : index
    %c0_99 = arith.constant 0 : index
    %186 = vector.load %arg10[%c10, %c0_99] : memref<16x512xf32, #tpu.memory_space<vmem>>, vector<2x512xf32>
    %c0_100 = arith.constant 0 : index
    %c0_101 = arith.constant 0 : index
    %187 = vector.load %arg13[%c0_100, %c0_101] : memref<2x128xf32, #tpu.memory_space<vmem>>, vector<2x128xf32>
    %188 = arith.truncf %187 : vector<2x128xf32> to vector<2x128xbf16>
    %c0_102 = arith.constant 0 : index
    %c0_103 = arith.constant 0 : index
    %189 = vector.load %arg2[%c0_102, %c0_103] : memref<128x512xbf16, #tpu.memory_space<vmem>>, vector<128x512xbf16>
    %cst_104 = arith.constant dense<0.000000e+00> : vector<2x512xf32>
    %190 = tpu.matmul %188, %189, %cst_104 {dimension_numbers = #tpu.dot_dimension_numbers<[1], [0], [0], [1], [0, 0, 1, 1], [], []>} : vector<2x128xbf16>, vector<128x512xbf16>, vector<2x512xf32> -> vector<2x512xf32>
    %191 = arith.addf %186, %190 : vector<2x512xf32>
    %192 = vector.extract_strided_slice %191 {offsets = [0, 0], sizes = [2, 128], strides = [1, 1]} : vector<2x512xf32> to vector<2x128xf32>
    %193 = arith.negf %192 : vector<2x128xf32>
    %194 = math.exp %193 : vector<2x128xf32>
    %cst_105 = arith.constant 1.000000e+00 : f32
    %195 = vector.broadcast %cst_105 : f32 to vector<2x128xf32>
    %196 = arith.addf %195, %194 : vector<2x128xf32>
    %197 = arith.divf %195, %196 : vector<2x128xf32>
    %198 = vector.extract_strided_slice %191 {offsets = [0, 128], sizes = [2, 128], strides = [1, 1]} : vector<2x512xf32> to vector<2x128xf32>
    %199 = arith.negf %198 : vector<2x128xf32>
    %200 = math.exp %199 : vector<2x128xf32>
    %cst_106 = arith.constant 1.000000e+00 : f32
    %201 = vector.broadcast %cst_106 : f32 to vector<2x128xf32>
    %202 = arith.addf %201, %200 : vector<2x128xf32>
    %203 = arith.divf %201, %202 : vector<2x128xf32>
    %204 = vector.extract_strided_slice %191 {offsets = [0, 256], sizes = [2, 128], strides = [1, 1]} : vector<2x512xf32> to vector<2x128xf32>
    %205 = math.tanh %204 : vector<2x128xf32>
    %206 = vector.extract_strided_slice %191 {offsets = [0, 384], sizes = [2, 128], strides = [1, 1]} : vector<2x512xf32> to vector<2x128xf32>
    %207 = arith.negf %206 : vector<2x128xf32>
    %208 = math.exp %207 : vector<2x128xf32>
    %cst_107 = arith.constant 1.000000e+00 : f32
    %209 = vector.broadcast %cst_107 : f32 to vector<2x128xf32>
    %210 = arith.addf %209, %208 : vector<2x128xf32>
    %211 = arith.divf %209, %210 : vector<2x128xf32>
    %c0_108 = arith.constant 0 : index
    %c0_109 = arith.constant 0 : index
    %212 = vector.load %arg14[%c0_108, %c0_109] : memref<2x128xf32, #tpu.memory_space<vmem>>, vector<2x128xf32>
    %213 = arith.mulf %203, %212 : vector<2x128xf32>
    %214 = arith.mulf %197, %205 : vector<2x128xf32>
    %215 = arith.addf %213, %214 : vector<2x128xf32>
    %216 = math.tanh %215 : vector<2x128xf32>
    %217 = arith.mulf %211, %216 : vector<2x128xf32>
    %c0_110 = arith.constant 0 : index
    %c0_111 = arith.constant 0 : index
    %218 = vector.load %arg14[%c0_110, %c0_111] : memref<2x128xf32, #tpu.memory_space<vmem>>, vector<2x128xf32>
    tpu.vector_store %arg14[%c0_110, %c0_111], %215 {strides = array<i32>} : memref<2x128xf32, #tpu.memory_space<vmem>>, vector<2x128xf32>,
    %c0_112 = arith.constant 0 : index
    %c0_113 = arith.constant 0 : index
    %219 = vector.load %arg13[%c0_112, %c0_113] : memref<2x128xf32, #tpu.memory_space<vmem>>, vector<2x128xf32>
    tpu.vector_store %arg13[%c0_112, %c0_113], %217 {strides = array<i32>} : memref<2x128xf32, #tpu.memory_space<vmem>>, vector<2x128xf32>,
    %c10_114 = arith.constant 10 : index
    %c0_115 = arith.constant 0 : index
    %220 = vector.load %arg11[%c10_114, %c0_115] : memref<16x128xf32, #tpu.memory_space<vmem>>, vector<2x128xf32>
    tpu.vector_store %arg11[%c10_114, %c0_115], %217 {strides = array<i32>} : memref<16x128xf32, #tpu.memory_space<vmem>>, vector<2x128xf32>,
    %c12 = arith.constant 12 : index
    %c0_116 = arith.constant 0 : index
    %221 = vector.load %arg10[%c12, %c0_116] : memref<16x512xf32, #tpu.memory_space<vmem>>, vector<2x512xf32>
    %c0_117 = arith.constant 0 : index
    %c0_118 = arith.constant 0 : index
    %222 = vector.load %arg13[%c0_117, %c0_118] : memref<2x128xf32, #tpu.memory_space<vmem>>, vector<2x128xf32>
    %223 = arith.truncf %222 : vector<2x128xf32> to vector<2x128xbf16>
    %c0_119 = arith.constant 0 : index
    %c0_120 = arith.constant 0 : index
    %224 = vector.load %arg2[%c0_119, %c0_120] : memref<128x512xbf16, #tpu.memory_space<vmem>>, vector<128x512xbf16>
    %cst_121 = arith.constant dense<0.000000e+00> : vector<2x512xf32>
    %225 = tpu.matmul %223, %224, %cst_121 {dimension_numbers = #tpu.dot_dimension_numbers<[1], [0], [0], [1], [0, 0, 1, 1], [], []>} : vector<2x128xbf16>, vector<128x512xbf16>, vector<2x512xf32> -> vector<2x512xf32>
    %226 = arith.addf %221, %225 : vector<2x512xf32>
    %227 = vector.extract_strided_slice %226 {offsets = [0, 0], sizes = [2, 128], strides = [1, 1]} : vector<2x512xf32> to vector<2x128xf32>
    %228 = arith.negf %227 : vector<2x128xf32>
    %229 = math.exp %228 : vector<2x128xf32>
    %cst_122 = arith.constant 1.000000e+00 : f32
    %230 = vector.broadcast %cst_122 : f32 to vector<2x128xf32>
    %231 = arith.addf %230, %229 : vector<2x128xf32>
    %232 = arith.divf %230, %231 : vector<2x128xf32>
    %233 = vector.extract_strided_slice %226 {offsets = [0, 128], sizes = [2, 128], strides = [1, 1]} : vector<2x512xf32> to vector<2x128xf32>
    %234 = arith.negf %233 : vector<2x128xf32>
    %235 = math.exp %234 : vector<2x128xf32>
    %cst_123 = arith.constant 1.000000e+00 : f32
    %236 = vector.broadcast %cst_123 : f32 to vector<2x128xf32>
    %237 = arith.addf %236, %235 : vector<2x128xf32>
    %238 = arith.divf %236, %237 : vector<2x128xf32>
    %239 = vector.extract_strided_slice %226 {offsets = [0, 256], sizes = [2, 128], strides = [1, 1]} : vector<2x512xf32> to vector<2x128xf32>
    %240 = math.tanh %239 : vector<2x128xf32>
    %241 = vector.extract_strided_slice %226 {offsets = [0, 384], sizes = [2, 128], strides = [1, 1]} : vector<2x512xf32> to vector<2x128xf32>
    %242 = arith.negf %241 : vector<2x128xf32>
    %243 = math.exp %242 : vector<2x128xf32>
    %cst_124 = arith.constant 1.000000e+00 : f32
    %244 = vector.broadcast %cst_124 : f32 to vector<2x128xf32>
    %245 = arith.addf %244, %243 : vector<2x128xf32>
    %246 = arith.divf %244, %245 : vector<2x128xf32>
    %c0_125 = arith.constant 0 : index
    %c0_126 = arith.constant 0 : index
    %247 = vector.load %arg14[%c0_125, %c0_126] : memref<2x128xf32, #tpu.memory_space<vmem>>, vector<2x128xf32>
    %248 = arith.mulf %238, %247 : vector<2x128xf32>
    %249 = arith.mulf %232, %240 : vector<2x128xf32>
    %250 = arith.addf %248, %249 : vector<2x128xf32>
    %251 = math.tanh %250 : vector<2x128xf32>
    %252 = arith.mulf %246, %251 : vector<2x128xf32>
    %c0_127 = arith.constant 0 : index
    %c0_128 = arith.constant 0 : index
    %253 = vector.load %arg14[%c0_127, %c0_128] : memref<2x128xf32, #tpu.memory_space<vmem>>, vector<2x128xf32>
    tpu.vector_store %arg14[%c0_127, %c0_128], %250 {strides = array<i32>} : memref<2x128xf32, #tpu.memory_space<vmem>>, vector<2x128xf32>,
    %c0_129 = arith.constant 0 : index
    %c0_130 = arith.constant 0 : index
    %254 = vector.load %arg13[%c0_129, %c0_130] : memref<2x128xf32, #tpu.memory_space<vmem>>, vector<2x128xf32>
    tpu.vector_store %arg13[%c0_129, %c0_130], %252 {strides = array<i32>} : memref<2x128xf32, #tpu.memory_space<vmem>>, vector<2x128xf32>,
    %c12_131 = arith.constant 12 : index
    %c0_132 = arith.constant 0 : index
    %255 = vector.load %arg11[%c12_131, %c0_132] : memref<16x128xf32, #tpu.memory_space<vmem>>, vector<2x128xf32>
    tpu.vector_store %arg11[%c12_131, %c0_132], %252 {strides = array<i32>} : memref<16x128xf32, #tpu.memory_space<vmem>>, vector<2x128xf32>,
    %c14 = arith.constant 14 : index
    %c0_133 = arith.constant 0 : index
    %256 = vector.load %arg10[%c14, %c0_133] : memref<16x512xf32, #tpu.memory_space<vmem>>, vector<2x512xf32>
    %c0_134 = arith.constant 0 : index
    %c0_135 = arith.constant 0 : index
    %257 = vector.load %arg13[%c0_134, %c0_135] : memref<2x128xf32, #tpu.memory_space<vmem>>, vector<2x128xf32>
    %258 = arith.truncf %257 : vector<2x128xf32> to vector<2x128xbf16>
    %c0_136 = arith.constant 0 : index
    %c0_137 = arith.constant 0 : index
    %259 = vector.load %arg2[%c0_136, %c0_137] : memref<128x512xbf16, #tpu.memory_space<vmem>>, vector<128x512xbf16>
    %cst_138 = arith.constant dense<0.000000e+00> : vector<2x512xf32>
    %260 = tpu.matmul %258, %259, %cst_138 {dimension_numbers = #tpu.dot_dimension_numbers<[1], [0], [0], [1], [0, 0, 1, 1], [], []>} : vector<2x128xbf16>, vector<128x512xbf16>, vector<2x512xf32> -> vector<2x512xf32>
    %261 = arith.addf %256, %260 : vector<2x512xf32>
    %262 = vector.extract_strided_slice %261 {offsets = [0, 0], sizes = [2, 128], strides = [1, 1]} : vector<2x512xf32> to vector<2x128xf32>
    %263 = arith.negf %262 : vector<2x128xf32>
    %264 = math.exp %263 : vector<2x128xf32>
    %cst_139 = arith.constant 1.000000e+00 : f32
    %265 = vector.broadcast %cst_139 : f32 to vector<2x128xf32>
    %266 = arith.addf %265, %264 : vector<2x128xf32>
    %267 = arith.divf %265, %266 : vector<2x128xf32>
    %268 = vector.extract_strided_slice %261 {offsets = [0, 128], sizes = [2, 128], strides = [1, 1]} : vector<2x512xf32> to vector<2x128xf32>
    %269 = arith.negf %268 : vector<2x128xf32>
    %270 = math.exp %269 : vector<2x128xf32>
    %cst_140 = arith.constant 1.000000e+00 : f32
    %271 = vector.broadcast %cst_140 : f32 to vector<2x128xf32>
    %272 = arith.addf %271, %270 : vector<2x128xf32>
    %273 = arith.divf %271, %272 : vector<2x128xf32>
    %274 = vector.extract_strided_slice %261 {offsets = [0, 256], sizes = [2, 128], strides = [1, 1]} : vector<2x512xf32> to vector<2x128xf32>
    %275 = math.tanh %274 : vector<2x128xf32>
    %276 = vector.extract_strided_slice %261 {offsets = [0, 384], sizes = [2, 128], strides = [1, 1]} : vector<2x512xf32> to vector<2x128xf32>
    %277 = arith.negf %276 : vector<2x128xf32>
    %278 = math.exp %277 : vector<2x128xf32>
    %cst_141 = arith.constant 1.000000e+00 : f32
    %279 = vector.broadcast %cst_141 : f32 to vector<2x128xf32>
    %280 = arith.addf %279, %278 : vector<2x128xf32>
    %281 = arith.divf %279, %280 : vector<2x128xf32>
    %c0_142 = arith.constant 0 : index
    %c0_143 = arith.constant 0 : index
    %282 = vector.load %arg14[%c0_142, %c0_143] : memref<2x128xf32, #tpu.memory_space<vmem>>, vector<2x128xf32>
    %283 = arith.mulf %273, %282 : vector<2x128xf32>
    %284 = arith.mulf %267, %275 : vector<2x128xf32>
    %285 = arith.addf %283, %284 : vector<2x128xf32>
    %286 = math.tanh %285 : vector<2x128xf32>
    %287 = arith.mulf %281, %286 : vector<2x128xf32>
    %c0_144 = arith.constant 0 : index
    %c0_145 = arith.constant 0 : index
    %288 = vector.load %arg14[%c0_144, %c0_145] : memref<2x128xf32, #tpu.memory_space<vmem>>, vector<2x128xf32>
    tpu.vector_store %arg14[%c0_144, %c0_145], %285 {strides = array<i32>} : memref<2x128xf32, #tpu.memory_space<vmem>>, vector<2x128xf32>,
    %c0_146 = arith.constant 0 : index
    %c0_147 = arith.constant 0 : index
    %289 = vector.load %arg13[%c0_146, %c0_147] : memref<2x128xf32, #tpu.memory_space<vmem>>, vector<2x128xf32>
    tpu.vector_store %arg13[%c0_146, %c0_147], %287 {strides = array<i32>} : memref<2x128xf32, #tpu.memory_space<vmem>>, vector<2x128xf32>,
    %c14_148 = arith.constant 14 : index
    %c0_149 = arith.constant 0 : index
    %290 = vector.load %arg11[%c14_148, %c0_149] : memref<16x128xf32, #tpu.memory_space<vmem>>, vector<2x128xf32>
    tpu.vector_store %arg11[%c14_148, %c0_149], %287 {strides = array<i32>} : memref<16x128xf32, #tpu.memory_space<vmem>>, vector<2x128xf32>,
    %c0_150 = arith.constant 0 : index
    %c0_151 = arith.constant 0 : index
    %291 = vector.load %arg11[%c0_150, %c0_151] : memref<16x128xf32, #tpu.memory_space<vmem>>, vector<16x128xf32>
    %292 = arith.truncf %291 : vector<16x128xf32> to vector<16x128xbf16>
    %c0_152 = arith.constant 0 : index
    %c0_153 = arith.constant 0 : index
    %293 = vector.load %arg4[%c0_152, %c0_153] : memref<128x512xbf16, #tpu.memory_space<vmem>>, vector<128x512xbf16>
    %cst_154 = arith.constant dense<0.000000e+00> : vector<16x512xf32>
    %294 = tpu.matmul %292, %293, %cst_154 {dimension_numbers = #tpu.dot_dimension_numbers<[1], [0], [0], [1], [0, 0, 1, 1], [], []>} : vector<16x128xbf16>, vector<128x512xbf16>, vector<16x512xf32> -> vector<16x512xf32>
    %c0_155 = arith.constant 0 : index
    %c0_156 = arith.constant 0 : index
    %295 = vector.load %arg6[%c0_155, %c0_156] : memref<1x512xf32, #tpu.memory_space<vmem>>, vector<1x512xf32>
    %296 = vector.broadcast %295 : vector<1x512xf32> to vector<16x512xf32>
    %297 = arith.addf %294, %296 : vector<16x512xf32>
    %c0_157 = arith.constant 0 : index
    %c0_158 = arith.constant 0 : index
    %298 = vector.load %arg10[%c0_157, %c0_158] : memref<16x512xf32, #tpu.memory_space<vmem>>, vector<16x512xf32>
    tpu.vector_store %arg10[%c0_157, %c0_158], %297 {strides = array<i32>} : memref<16x512xf32, #tpu.memory_space<vmem>>, vector<16x512xf32>,
    %cst_159 = arith.constant 0.000000e+00 : f32
    %299 = vector.broadcast %cst_159 : f32 to vector<2x128xf32>
    %c0_160 = arith.constant 0 : index
    %c0_161 = arith.constant 0 : index
    %300 = vector.load %arg13[%c0_160, %c0_161] : memref<2x128xf32, #tpu.memory_space<vmem>>, vector<2x128xf32>
    tpu.vector_store %arg13[%c0_160, %c0_161], %299 {strides = array<i32>} : memref<2x128xf32, #tpu.memory_space<vmem>>, vector<2x128xf32>,
    %cst_162 = arith.constant 0.000000e+00 : f32
    %301 = vector.broadcast %cst_162 : f32 to vector<2x128xf32>
    %c0_163 = arith.constant 0 : index
    %c0_164 = arith.constant 0 : index
    %302 = vector.load %arg14[%c0_163, %c0_164] : memref<2x128xf32, #tpu.memory_space<vmem>>, vector<2x128xf32>
    tpu.vector_store %arg14[%c0_163, %c0_164], %301 {strides = array<i32>} : memref<2x128xf32, #tpu.memory_space<vmem>>, vector<2x128xf32>,
    %c0_165 = arith.constant 0 : index
    %c0_166 = arith.constant 0 : index
    %303 = vector.load %arg10[%c0_165, %c0_166] : memref<16x512xf32, #tpu.memory_space<vmem>>, vector<2x512xf32>
    %c0_167 = arith.constant 0 : index
    %c0_168 = arith.constant 0 : index
    %304 = vector.load %arg13[%c0_167, %c0_168] : memref<2x128xf32, #tpu.memory_space<vmem>>, vector<2x128xf32>
    %305 = arith.truncf %304 : vector<2x128xf32> to vector<2x128xbf16>
    %c0_169 = arith.constant 0 : index
    %c0_170 = arith.constant 0 : index
    %306 = vector.load %arg5[%c0_169, %c0_170] : memref<128x512xbf16, #tpu.memory_space<vmem>>, vector<128x512xbf16>
    %cst_171 = arith.constant dense<0.000000e+00> : vector<2x512xf32>
    %307 = tpu.matmul %305, %306, %cst_171 {dimension_numbers = #tpu.dot_dimension_numbers<[1], [0], [0], [1], [0, 0, 1, 1], [], []>} : vector<2x128xbf16>, vector<128x512xbf16>, vector<2x512xf32> -> vector<2x512xf32>
    %308 = arith.addf %303, %307 : vector<2x512xf32>
    %309 = vector.extract_strided_slice %308 {offsets = [0, 0], sizes = [2, 128], strides = [1, 1]} : vector<2x512xf32> to vector<2x128xf32>
    %310 = arith.negf %309 : vector<2x128xf32>
    %311 = math.exp %310 : vector<2x128xf32>
    %cst_172 = arith.constant 1.000000e+00 : f32
    %312 = vector.broadcast %cst_172 : f32 to vector<2x128xf32>
    %313 = arith.addf %312, %311 : vector<2x128xf32>
    %314 = arith.divf %312, %313 : vector<2x128xf32>
    %315 = vector.extract_strided_slice %308 {offsets = [0, 128], sizes = [2, 128], strides = [1, 1]} : vector<2x512xf32> to vector<2x128xf32>
    %316 = arith.negf %315 : vector<2x128xf32>
    %317 = math.exp %316 : vector<2x128xf32>
    %cst_173 = arith.constant 1.000000e+00 : f32
    %318 = vector.broadcast %cst_173 : f32 to vector<2x128xf32>
    %319 = arith.addf %318, %317 : vector<2x128xf32>
    %320 = arith.divf %318, %319 : vector<2x128xf32>
    %321 = vector.extract_strided_slice %308 {offsets = [0, 256], sizes = [2, 128], strides = [1, 1]} : vector<2x512xf32> to vector<2x128xf32>
    %322 = math.tanh %321 : vector<2x128xf32>
    %323 = vector.extract_strided_slice %308 {offsets = [0, 384], sizes = [2, 128], strides = [1, 1]} : vector<2x512xf32> to vector<2x128xf32>
    %324 = arith.negf %323 : vector<2x128xf32>
    %325 = math.exp %324 : vector<2x128xf32>
    %cst_174 = arith.constant 1.000000e+00 : f32
    %326 = vector.broadcast %cst_174 : f32 to vector<2x128xf32>
    %327 = arith.addf %326, %325 : vector<2x128xf32>
    %328 = arith.divf %326, %327 : vector<2x128xf32>
    %c0_175 = arith.constant 0 : index
    %c0_176 = arith.constant 0 : index
    %329 = vector.load %arg14[%c0_175, %c0_176] : memref<2x128xf32, #tpu.memory_space<vmem>>, vector<2x128xf32>
    %330 = arith.mulf %320, %329 : vector<2x128xf32>
    %331 = arith.mulf %314, %322 : vector<2x128xf32>
    %332 = arith.addf %330, %331 : vector<2x128xf32>
    %333 = math.tanh %332 : vector<2x128xf32>
    %334 = arith.mulf %328, %333 : vector<2x128xf32>
    %c0_177 = arith.constant 0 : index
    %c0_178 = arith.constant 0 : index
    %335 = vector.load %arg14[%c0_177, %c0_178] : memref<2x128xf32, #tpu.memory_space<vmem>>, vector<2x128xf32>
    tpu.vector_store %arg14[%c0_177, %c0_178], %332 {strides = array<i32>} : memref<2x128xf32, #tpu.memory_space<vmem>>, vector<2x128xf32>,
    %c0_179 = arith.constant 0 : index
    %c0_180 = arith.constant 0 : index
    %336 = vector.load %arg13[%c0_179, %c0_180] : memref<2x128xf32, #tpu.memory_space<vmem>>, vector<2x128xf32>
    tpu.vector_store %arg13[%c0_179, %c0_180], %334 {strides = array<i32>} : memref<2x128xf32, #tpu.memory_space<vmem>>, vector<2x128xf32>,
    %c0_181 = arith.constant 0 : index
    %c0_182 = arith.constant 0 : index
    %337 = vector.load %arg12[%c0_181, %c0_182] : memref<16x128xf32, #tpu.memory_space<vmem>>, vector<2x128xf32>
    tpu.vector_store %arg12[%c0_181, %c0_182], %334 {strides = array<i32>} : memref<16x128xf32, #tpu.memory_space<vmem>>, vector<2x128xf32>,
    %c2_183 = arith.constant 2 : index
    %c0_184 = arith.constant 0 : index
    %338 = vector.load %arg10[%c2_183, %c0_184] : memref<16x512xf32, #tpu.memory_space<vmem>>, vector<2x512xf32>
    %c0_185 = arith.constant 0 : index
    %c0_186 = arith.constant 0 : index
    %339 = vector.load %arg13[%c0_185, %c0_186] : memref<2x128xf32, #tpu.memory_space<vmem>>, vector<2x128xf32>
    %340 = arith.truncf %339 : vector<2x128xf32> to vector<2x128xbf16>
    %c0_187 = arith.constant 0 : index
    %c0_188 = arith.constant 0 : index
    %341 = vector.load %arg5[%c0_187, %c0_188] : memref<128x512xbf16, #tpu.memory_space<vmem>>, vector<128x512xbf16>
    %cst_189 = arith.constant dense<0.000000e+00> : vector<2x512xf32>
    %342 = tpu.matmul %340, %341, %cst_189 {dimension_numbers = #tpu.dot_dimension_numbers<[1], [0], [0], [1], [0, 0, 1, 1], [], []>} : vector<2x128xbf16>, vector<128x512xbf16>, vector<2x512xf32> -> vector<2x512xf32>
    %343 = arith.addf %338, %342 : vector<2x512xf32>
    %344 = vector.extract_strided_slice %343 {offsets = [0, 0], sizes = [2, 128], strides = [1, 1]} : vector<2x512xf32> to vector<2x128xf32>
    %345 = arith.negf %344 : vector<2x128xf32>
    %346 = math.exp %345 : vector<2x128xf32>
    %cst_190 = arith.constant 1.000000e+00 : f32
    %347 = vector.broadcast %cst_190 : f32 to vector<2x128xf32>
    %348 = arith.addf %347, %346 : vector<2x128xf32>
    %349 = arith.divf %347, %348 : vector<2x128xf32>
    %350 = vector.extract_strided_slice %343 {offsets = [0, 128], sizes = [2, 128], strides = [1, 1]} : vector<2x512xf32> to vector<2x128xf32>
    %351 = arith.negf %350 : vector<2x128xf32>
    %352 = math.exp %351 : vector<2x128xf32>
    %cst_191 = arith.constant 1.000000e+00 : f32
    %353 = vector.broadcast %cst_191 : f32 to vector<2x128xf32>
    %354 = arith.addf %353, %352 : vector<2x128xf32>
    %355 = arith.divf %353, %354 : vector<2x128xf32>
    %356 = vector.extract_strided_slice %343 {offsets = [0, 256], sizes = [2, 128], strides = [1, 1]} : vector<2x512xf32> to vector<2x128xf32>
    %357 = math.tanh %356 : vector<2x128xf32>
    %358 = vector.extract_strided_slice %343 {offsets = [0, 384], sizes = [2, 128], strides = [1, 1]} : vector<2x512xf32> to vector<2x128xf32>
    %359 = arith.negf %358 : vector<2x128xf32>
    %360 = math.exp %359 : vector<2x128xf32>
    %cst_192 = arith.constant 1.000000e+00 : f32
    %361 = vector.broadcast %cst_192 : f32 to vector<2x128xf32>
    %362 = arith.addf %361, %360 : vector<2x128xf32>
    %363 = arith.divf %361, %362 : vector<2x128xf32>
    %c0_193 = arith.constant 0 : index
    %c0_194 = arith.constant 0 : index
    %364 = vector.load %arg14[%c0_193, %c0_194] : memref<2x128xf32, #tpu.memory_space<vmem>>, vector<2x128xf32>
    %365 = arith.mulf %355, %364 : vector<2x128xf32>
    %366 = arith.mulf %349, %357 : vector<2x128xf32>
    %367 = arith.addf %365, %366 : vector<2x128xf32>
    %368 = math.tanh %367 : vector<2x128xf32>
    %369 = arith.mulf %363, %368 : vector<2x128xf32>
    %c0_195 = arith.constant 0 : index
    %c0_196 = arith.constant 0 : index
    %370 = vector.load %arg14[%c0_195, %c0_196] : memref<2x128xf32, #tpu.memory_space<vmem>>, vector<2x128xf32>
    tpu.vector_store %arg14[%c0_195, %c0_196], %367 {strides = array<i32>} : memref<2x128xf32, #tpu.memory_space<vmem>>, vector<2x128xf32>,
    %c0_197 = arith.constant 0 : index
    %c0_198 = arith.constant 0 : index
    %371 = vector.load %arg13[%c0_197, %c0_198] : memref<2x128xf32, #tpu.memory_space<vmem>>, vector<2x128xf32>
    tpu.vector_store %arg13[%c0_197, %c0_198], %369 {strides = array<i32>} : memref<2x128xf32, #tpu.memory_space<vmem>>, vector<2x128xf32>,
    %c2_199 = arith.constant 2 : index
    %c0_200 = arith.constant 0 : index
    %372 = vector.load %arg12[%c2_199, %c0_200] : memref<16x128xf32, #tpu.memory_space<vmem>>, vector<2x128xf32>
    tpu.vector_store %arg12[%c2_199, %c0_200], %369 {strides = array<i32>} : memref<16x128xf32, #tpu.memory_space<vmem>>, vector<2x128xf32>,
    %c4_201 = arith.constant 4 : index
    %c0_202 = arith.constant 0 : index
    %373 = vector.load %arg10[%c4_201, %c0_202] : memref<16x512xf32, #tpu.memory_space<vmem>>, vector<2x512xf32>
    %c0_203 = arith.constant 0 : index
    %c0_204 = arith.constant 0 : index
    %374 = vector.load %arg13[%c0_203, %c0_204] : memref<2x128xf32, #tpu.memory_space<vmem>>, vector<2x128xf32>
    %375 = arith.truncf %374 : vector<2x128xf32> to vector<2x128xbf16>
    %c0_205 = arith.constant 0 : index
    %c0_206 = arith.constant 0 : index
    %376 = vector.load %arg5[%c0_205, %c0_206] : memref<128x512xbf16, #tpu.memory_space<vmem>>, vector<128x512xbf16>
    %cst_207 = arith.constant dense<0.000000e+00> : vector<2x512xf32>
    %377 = tpu.matmul %375, %376, %cst_207 {dimension_numbers = #tpu.dot_dimension_numbers<[1], [0], [0], [1], [0, 0, 1, 1], [], []>} : vector<2x128xbf16>, vector<128x512xbf16>, vector<2x512xf32> -> vector<2x512xf32>
    %378 = arith.addf %373, %377 : vector<2x512xf32>
    %379 = vector.extract_strided_slice %378 {offsets = [0, 0], sizes = [2, 128], strides = [1, 1]} : vector<2x512xf32> to vector<2x128xf32>
    %380 = arith.negf %379 : vector<2x128xf32>
    %381 = math.exp %380 : vector<2x128xf32>
    %cst_208 = arith.constant 1.000000e+00 : f32
    %382 = vector.broadcast %cst_208 : f32 to vector<2x128xf32>
    %383 = arith.addf %382, %381 : vector<2x128xf32>
    %384 = arith.divf %382, %383 : vector<2x128xf32>
    %385 = vector.extract_strided_slice %378 {offsets = [0, 128], sizes = [2, 128], strides = [1, 1]} : vector<2x512xf32> to vector<2x128xf32>
    %386 = arith.negf %385 : vector<2x128xf32>
    %387 = math.exp %386 : vector<2x128xf32>
    %cst_209 = arith.constant 1.000000e+00 : f32
    %388 = vector.broadcast %cst_209 : f32 to vector<2x128xf32>
    %389 = arith.addf %388, %387 : vector<2x128xf32>
    %390 = arith.divf %388, %389 : vector<2x128xf32>
    %391 = vector.extract_strided_slice %378 {offsets = [0, 256], sizes = [2, 128], strides = [1, 1]} : vector<2x512xf32> to vector<2x128xf32>
    %392 = math.tanh %391 : vector<2x128xf32>
    %393 = vector.extract_strided_slice %378 {offsets = [0, 384], sizes = [2, 128], strides = [1, 1]} : vector<2x512xf32> to vector<2x128xf32>
    %394 = arith.negf %393 : vector<2x128xf32>
    %395 = math.exp %394 : vector<2x128xf32>
    %cst_210 = arith.constant 1.000000e+00 : f32
    %396 = vector.broadcast %cst_210 : f32 to vector<2x128xf32>
    %397 = arith.addf %396, %395 : vector<2x128xf32>
    %398 = arith.divf %396, %397 : vector<2x128xf32>
    %c0_211 = arith.constant 0 : index
    %c0_212 = arith.constant 0 : index
    %399 = vector.load %arg14[%c0_211, %c0_212] : memref<2x128xf32, #tpu.memory_space<vmem>>, vector<2x128xf32>
    %400 = arith.mulf %390, %399 : vector<2x128xf32>
    %401 = arith.mulf %384, %392 : vector<2x128xf32>
    %402 = arith.addf %400, %401 : vector<2x128xf32>
    %403 = math.tanh %402 : vector<2x128xf32>
    %404 = arith.mulf %398, %403 : vector<2x128xf32>
    %c0_213 = arith.constant 0 : index
    %c0_214 = arith.constant 0 : index
    %405 = vector.load %arg14[%c0_213, %c0_214] : memref<2x128xf32, #tpu.memory_space<vmem>>, vector<2x128xf32>
    tpu.vector_store %arg14[%c0_213, %c0_214], %402 {strides = array<i32>} : memref<2x128xf32, #tpu.memory_space<vmem>>, vector<2x128xf32>,
    %c0_215 = arith.constant 0 : index
    %c0_216 = arith.constant 0 : index
    %406 = vector.load %arg13[%c0_215, %c0_216] : memref<2x128xf32, #tpu.memory_space<vmem>>, vector<2x128xf32>
    tpu.vector_store %arg13[%c0_215, %c0_216], %404 {strides = array<i32>} : memref<2x128xf32, #tpu.memory_space<vmem>>, vector<2x128xf32>,
    %c4_217 = arith.constant 4 : index
    %c0_218 = arith.constant 0 : index
    %407 = vector.load %arg12[%c4_217, %c0_218] : memref<16x128xf32, #tpu.memory_space<vmem>>, vector<2x128xf32>
    tpu.vector_store %arg12[%c4_217, %c0_218], %404 {strides = array<i32>} : memref<16x128xf32, #tpu.memory_space<vmem>>, vector<2x128xf32>,
    %c6_219 = arith.constant 6 : index
    %c0_220 = arith.constant 0 : index
    %408 = vector.load %arg10[%c6_219, %c0_220] : memref<16x512xf32, #tpu.memory_space<vmem>>, vector<2x512xf32>
    %c0_221 = arith.constant 0 : index
    %c0_222 = arith.constant 0 : index
    %409 = vector.load %arg13[%c0_221, %c0_222] : memref<2x128xf32, #tpu.memory_space<vmem>>, vector<2x128xf32>
    %410 = arith.truncf %409 : vector<2x128xf32> to vector<2x128xbf16>
    %c0_223 = arith.constant 0 : index
    %c0_224 = arith.constant 0 : index
    %411 = vector.load %arg5[%c0_223, %c0_224] : memref<128x512xbf16, #tpu.memory_space<vmem>>, vector<128x512xbf16>
    %cst_225 = arith.constant dense<0.000000e+00> : vector<2x512xf32>
    %412 = tpu.matmul %410, %411, %cst_225 {dimension_numbers = #tpu.dot_dimension_numbers<[1], [0], [0], [1], [0, 0, 1, 1], [], []>} : vector<2x128xbf16>, vector<128x512xbf16>, vector<2x512xf32> -> vector<2x512xf32>
    %413 = arith.addf %408, %412 : vector<2x512xf32>
    %414 = vector.extract_strided_slice %413 {offsets = [0, 0], sizes = [2, 128], strides = [1, 1]} : vector<2x512xf32> to vector<2x128xf32>
    %415 = arith.negf %414 : vector<2x128xf32>
    %416 = math.exp %415 : vector<2x128xf32>
    %cst_226 = arith.constant 1.000000e+00 : f32
    %417 = vector.broadcast %cst_226 : f32 to vector<2x128xf32>
    %418 = arith.addf %417, %416 : vector<2x128xf32>
    %419 = arith.divf %417, %418 : vector<2x128xf32>
    %420 = vector.extract_strided_slice %413 {offsets = [0, 128], sizes = [2, 128], strides = [1, 1]} : vector<2x512xf32> to vector<2x128xf32>
    %421 = arith.negf %420 : vector<2x128xf32>
    %422 = math.exp %421 : vector<2x128xf32>
    %cst_227 = arith.constant 1.000000e+00 : f32
    %423 = vector.broadcast %cst_227 : f32 to vector<2x128xf32>
    %424 = arith.addf %423, %422 : vector<2x128xf32>
    %425 = arith.divf %423, %424 : vector<2x128xf32>
    %426 = vector.extract_strided_slice %413 {offsets = [0, 256], sizes = [2, 128], strides = [1, 1]} : vector<2x512xf32> to vector<2x128xf32>
    %427 = math.tanh %426 : vector<2x128xf32>
    %428 = vector.extract_strided_slice %413 {offsets = [0, 384], sizes = [2, 128], strides = [1, 1]} : vector<2x512xf32> to vector<2x128xf32>
    %429 = arith.negf %428 : vector<2x128xf32>
    %430 = math.exp %429 : vector<2x128xf32>
    %cst_228 = arith.constant 1.000000e+00 : f32
    %431 = vector.broadcast %cst_228 : f32 to vector<2x128xf32>
    %432 = arith.addf %431, %430 : vector<2x128xf32>
    %433 = arith.divf %431, %432 : vector<2x128xf32>
    %c0_229 = arith.constant 0 : index
    %c0_230 = arith.constant 0 : index
    %434 = vector.load %arg14[%c0_229, %c0_230] : memref<2x128xf32, #tpu.memory_space<vmem>>, vector<2x128xf32>
    %435 = arith.mulf %425, %434 : vector<2x128xf32>
    %436 = arith.mulf %419, %427 : vector<2x128xf32>
    %437 = arith.addf %435, %436 : vector<2x128xf32>
    %438 = math.tanh %437 : vector<2x128xf32>
    %439 = arith.mulf %433, %438 : vector<2x128xf32>
    %c0_231 = arith.constant 0 : index
    %c0_232 = arith.constant 0 : index
    %440 = vector.load %arg14[%c0_231, %c0_232] : memref<2x128xf32, #tpu.memory_space<vmem>>, vector<2x128xf32>
    tpu.vector_store %arg14[%c0_231, %c0_232], %437 {strides = array<i32>} : memref<2x128xf32, #tpu.memory_space<vmem>>, vector<2x128xf32>,
    %c0_233 = arith.constant 0 : index
    %c0_234 = arith.constant 0 : index
    %441 = vector.load %arg13[%c0_233, %c0_234] : memref<2x128xf32, #tpu.memory_space<vmem>>, vector<2x128xf32>
    tpu.vector_store %arg13[%c0_233, %c0_234], %439 {strides = array<i32>} : memref<2x128xf32, #tpu.memory_space<vmem>>, vector<2x128xf32>,
    %c6_235 = arith.constant 6 : index
    %c0_236 = arith.constant 0 : index
    %442 = vector.load %arg12[%c6_235, %c0_236] : memref<16x128xf32, #tpu.memory_space<vmem>>, vector<2x128xf32>
    tpu.vector_store %arg12[%c6_235, %c0_236], %439 {strides = array<i32>} : memref<16x128xf32, #tpu.memory_space<vmem>>, vector<2x128xf32>,
    %c8_237 = arith.constant 8 : index
    %c0_238 = arith.constant 0 : index
    %443 = vector.load %arg10[%c8_237, %c0_238] : memref<16x512xf32, #tpu.memory_space<vmem>>, vector<2x512xf32>
    %c0_239 = arith.constant 0 : index
    %c0_240 = arith.constant 0 : index
    %444 = vector.load %arg13[%c0_239, %c0_240] : memref<2x128xf32, #tpu.memory_space<vmem>>, vector<2x128xf32>
    %445 = arith.truncf %444 : vector<2x128xf32> to vector<2x128xbf16>
    %c0_241 = arith.constant 0 : index
    %c0_242 = arith.constant 0 : index
    %446 = vector.load %arg5[%c0_241, %c0_242] : memref<128x512xbf16, #tpu.memory_space<vmem>>, vector<128x512xbf16>
    %cst_243 = arith.constant dense<0.000000e+00> : vector<2x512xf32>
    %447 = tpu.matmul %445, %446, %cst_243 {dimension_numbers = #tpu.dot_dimension_numbers<[1], [0], [0], [1], [0, 0, 1, 1], [], []>} : vector<2x128xbf16>, vector<128x512xbf16>, vector<2x512xf32> -> vector<2x512xf32>
    %448 = arith.addf %443, %447 : vector<2x512xf32>
    %449 = vector.extract_strided_slice %448 {offsets = [0, 0], sizes = [2, 128], strides = [1, 1]} : vector<2x512xf32> to vector<2x128xf32>
    %450 = arith.negf %449 : vector<2x128xf32>
    %451 = math.exp %450 : vector<2x128xf32>
    %cst_244 = arith.constant 1.000000e+00 : f32
    %452 = vector.broadcast %cst_244 : f32 to vector<2x128xf32>
    %453 = arith.addf %452, %451 : vector<2x128xf32>
    %454 = arith.divf %452, %453 : vector<2x128xf32>
    %455 = vector.extract_strided_slice %448 {offsets = [0, 128], sizes = [2, 128], strides = [1, 1]} : vector<2x512xf32> to vector<2x128xf32>
    %456 = arith.negf %455 : vector<2x128xf32>
    %457 = math.exp %456 : vector<2x128xf32>
    %cst_245 = arith.constant 1.000000e+00 : f32
    %458 = vector.broadcast %cst_245 : f32 to vector<2x128xf32>
    %459 = arith.addf %458, %457 : vector<2x128xf32>
    %460 = arith.divf %458, %459 : vector<2x128xf32>
    %461 = vector.extract_strided_slice %448 {offsets = [0, 256], sizes = [2, 128], strides = [1, 1]} : vector<2x512xf32> to vector<2x128xf32>
    %462 = math.tanh %461 : vector<2x128xf32>
    %463 = vector.extract_strided_slice %448 {offsets = [0, 384], sizes = [2, 128], strides = [1, 1]} : vector<2x512xf32> to vector<2x128xf32>
    %464 = arith.negf %463 : vector<2x128xf32>
    %465 = math.exp %464 : vector<2x128xf32>
    %cst_246 = arith.constant 1.000000e+00 : f32
    %466 = vector.broadcast %cst_246 : f32 to vector<2x128xf32>
    %467 = arith.addf %466, %465 : vector<2x128xf32>
    %468 = arith.divf %466, %467 : vector<2x128xf32>
    %c0_247 = arith.constant 0 : index
    %c0_248 = arith.constant 0 : index
    %469 = vector.load %arg14[%c0_247, %c0_248] : memref<2x128xf32, #tpu.memory_space<vmem>>, vector<2x128xf32>
    %470 = arith.mulf %460, %469 : vector<2x128xf32>
    %471 = arith.mulf %454, %462 : vector<2x128xf32>
    %472 = arith.addf %470, %471 : vector<2x128xf32>
    %473 = math.tanh %472 : vector<2x128xf32>
    %474 = arith.mulf %468, %473 : vector<2x128xf32>
    %c0_249 = arith.constant 0 : index
    %c0_250 = arith.constant 0 : index
    %475 = vector.load %arg14[%c0_249, %c0_250] : memref<2x128xf32, #tpu.memory_space<vmem>>, vector<2x128xf32>
    tpu.vector_store %arg14[%c0_249, %c0_250], %472 {strides = array<i32>} : memref<2x128xf32, #tpu.memory_space<vmem>>, vector<2x128xf32>,
    %c0_251 = arith.constant 0 : index
    %c0_252 = arith.constant 0 : index
    %476 = vector.load %arg13[%c0_251, %c0_252] : memref<2x128xf32, #tpu.memory_space<vmem>>, vector<2x128xf32>
    tpu.vector_store %arg13[%c0_251, %c0_252], %474 {strides = array<i32>} : memref<2x128xf32, #tpu.memory_space<vmem>>, vector<2x128xf32>,
    %c8_253 = arith.constant 8 : index
    %c0_254 = arith.constant 0 : index
    %477 = vector.load %arg12[%c8_253, %c0_254] : memref<16x128xf32, #tpu.memory_space<vmem>>, vector<2x128xf32>
    tpu.vector_store %arg12[%c8_253, %c0_254], %474 {strides = array<i32>} : memref<16x128xf32, #tpu.memory_space<vmem>>, vector<2x128xf32>,
    %c10_255 = arith.constant 10 : index
    %c0_256 = arith.constant 0 : index
    %478 = vector.load %arg10[%c10_255, %c0_256] : memref<16x512xf32, #tpu.memory_space<vmem>>, vector<2x512xf32>
    %c0_257 = arith.constant 0 : index
    %c0_258 = arith.constant 0 : index
    %479 = vector.load %arg13[%c0_257, %c0_258] : memref<2x128xf32, #tpu.memory_space<vmem>>, vector<2x128xf32>
    %480 = arith.truncf %479 : vector<2x128xf32> to vector<2x128xbf16>
    %c0_259 = arith.constant 0 : index
    %c0_260 = arith.constant 0 : index
    %481 = vector.load %arg5[%c0_259, %c0_260] : memref<128x512xbf16, #tpu.memory_space<vmem>>, vector<128x512xbf16>
    %cst_261 = arith.constant dense<0.000000e+00> : vector<2x512xf32>
    %482 = tpu.matmul %480, %481, %cst_261 {dimension_numbers = #tpu.dot_dimension_numbers<[1], [0], [0], [1], [0, 0, 1, 1], [], []>} : vector<2x128xbf16>, vector<128x512xbf16>, vector<2x512xf32> -> vector<2x512xf32>
    %483 = arith.addf %478, %482 : vector<2x512xf32>
    %484 = vector.extract_strided_slice %483 {offsets = [0, 0], sizes = [2, 128], strides = [1, 1]} : vector<2x512xf32> to vector<2x128xf32>
    %485 = arith.negf %484 : vector<2x128xf32>
    %486 = math.exp %485 : vector<2x128xf32>
    %cst_262 = arith.constant 1.000000e+00 : f32
    %487 = vector.broadcast %cst_262 : f32 to vector<2x128xf32>
    %488 = arith.addf %487, %486 : vector<2x128xf32>
    %489 = arith.divf %487, %488 : vector<2x128xf32>
    %490 = vector.extract_strided_slice %483 {offsets = [0, 128], sizes = [2, 128], strides = [1, 1]} : vector<2x512xf32> to vector<2x128xf32>
    %491 = arith.negf %490 : vector<2x128xf32>
    %492 = math.exp %491 : vector<2x128xf32>
    %cst_263 = arith.constant 1.000000e+00 : f32
    %493 = vector.broadcast %cst_263 : f32 to vector<2x128xf32>
    %494 = arith.addf %493, %492 : vector<2x128xf32>
    %495 = arith.divf %493, %494 : vector<2x128xf32>
    %496 = vector.extract_strided_slice %483 {offsets = [0, 256], sizes = [2, 128], strides = [1, 1]} : vector<2x512xf32> to vector<2x128xf32>
    %497 = math.tanh %496 : vector<2x128xf32>
    %498 = vector.extract_strided_slice %483 {offsets = [0, 384], sizes = [2, 128], strides = [1, 1]} : vector<2x512xf32> to vector<2x128xf32>
    %499 = arith.negf %498 : vector<2x128xf32>
    %500 = math.exp %499 : vector<2x128xf32>
    %cst_264 = arith.constant 1.000000e+00 : f32
    %501 = vector.broadcast %cst_264 : f32 to vector<2x128xf32>
    %502 = arith.addf %501, %500 : vector<2x128xf32>
    %503 = arith.divf %501, %502 : vector<2x128xf32>
    %c0_265 = arith.constant 0 : index
    %c0_266 = arith.constant 0 : index
    %504 = vector.load %arg14[%c0_265, %c0_266] : memref<2x128xf32, #tpu.memory_space<vmem>>, vector<2x128xf32>
    %505 = arith.mulf %495, %504 : vector<2x128xf32>
    %506 = arith.mulf %489, %497 : vector<2x128xf32>
    %507 = arith.addf %505, %506 : vector<2x128xf32>
    %508 = math.tanh %507 : vector<2x128xf32>
    %509 = arith.mulf %503, %508 : vector<2x128xf32>
    %c0_267 = arith.constant 0 : index
    %c0_268 = arith.constant 0 : index
    %510 = vector.load %arg14[%c0_267, %c0_268] : memref<2x128xf32, #tpu.memory_space<vmem>>, vector<2x128xf32>
    tpu.vector_store %arg14[%c0_267, %c0_268], %507 {strides = array<i32>} : memref<2x128xf32, #tpu.memory_space<vmem>>, vector<2x128xf32>,
    %c0_269 = arith.constant 0 : index
    %c0_270 = arith.constant 0 : index
    %511 = vector.load %arg13[%c0_269, %c0_270] : memref<2x128xf32, #tpu.memory_space<vmem>>, vector<2x128xf32>
    tpu.vector_store %arg13[%c0_269, %c0_270], %509 {strides = array<i32>} : memref<2x128xf32, #tpu.memory_space<vmem>>, vector<2x128xf32>,
    %c10_271 = arith.constant 10 : index
    %c0_272 = arith.constant 0 : index
    %512 = vector.load %arg12[%c10_271, %c0_272] : memref<16x128xf32, #tpu.memory_space<vmem>>, vector<2x128xf32>
    tpu.vector_store %arg12[%c10_271, %c0_272], %509 {strides = array<i32>} : memref<16x128xf32, #tpu.memory_space<vmem>>, vector<2x128xf32>,
    %c12_273 = arith.constant 12 : index
    %c0_274 = arith.constant 0 : index
    %513 = vector.load %arg10[%c12_273, %c0_274] : memref<16x512xf32, #tpu.memory_space<vmem>>, vector<2x512xf32>
    %c0_275 = arith.constant 0 : index
    %c0_276 = arith.constant 0 : index
    %514 = vector.load %arg13[%c0_275, %c0_276] : memref<2x128xf32, #tpu.memory_space<vmem>>, vector<2x128xf32>
    %515 = arith.truncf %514 : vector<2x128xf32> to vector<2x128xbf16>
    %c0_277 = arith.constant 0 : index
    %c0_278 = arith.constant 0 : index
    %516 = vector.load %arg5[%c0_277, %c0_278] : memref<128x512xbf16, #tpu.memory_space<vmem>>, vector<128x512xbf16>
    %cst_279 = arith.constant dense<0.000000e+00> : vector<2x512xf32>
    %517 = tpu.matmul %515, %516, %cst_279 {dimension_numbers = #tpu.dot_dimension_numbers<[1], [0], [0], [1], [0, 0, 1, 1], [], []>} : vector<2x128xbf16>, vector<128x512xbf16>, vector<2x512xf32> -> vector<2x512xf32>
    %518 = arith.addf %513, %517 : vector<2x512xf32>
    %519 = vector.extract_strided_slice %518 {offsets = [0, 0], sizes = [2, 128], strides = [1, 1]} : vector<2x512xf32> to vector<2x128xf32>
    %520 = arith.negf %519 : vector<2x128xf32>
    %521 = math.exp %520 : vector<2x128xf32>
    %cst_280 = arith.constant 1.000000e+00 : f32
    %522 = vector.broadcast %cst_280 : f32 to vector<2x128xf32>
    %523 = arith.addf %522, %521 : vector<2x128xf32>
    %524 = arith.divf %522, %523 : vector<2x128xf32>
    %525 = vector.extract_strided_slice %518 {offsets = [0, 128], sizes = [2, 128], strides = [1, 1]} : vector<2x512xf32> to vector<2x128xf32>
    %526 = arith.negf %525 : vector<2x128xf32>
    %527 = math.exp %526 : vector<2x128xf32>
    %cst_281 = arith.constant 1.000000e+00 : f32
    %528 = vector.broadcast %cst_281 : f32 to vector<2x128xf32>
    %529 = arith.addf %528, %527 : vector<2x128xf32>
    %530 = arith.divf %528, %529 : vector<2x128xf32>
    %531 = vector.extract_strided_slice %518 {offsets = [0, 256], sizes = [2, 128], strides = [1, 1]} : vector<2x512xf32> to vector<2x128xf32>
    %532 = math.tanh %531 : vector<2x128xf32>
    %533 = vector.extract_strided_slice %518 {offsets = [0, 384], sizes = [2, 128], strides = [1, 1]} : vector<2x512xf32> to vector<2x128xf32>
    %534 = arith.negf %533 : vector<2x128xf32>
    %535 = math.exp %534 : vector<2x128xf32>
    %cst_282 = arith.constant 1.000000e+00 : f32
    %536 = vector.broadcast %cst_282 : f32 to vector<2x128xf32>
    %537 = arith.addf %536, %535 : vector<2x128xf32>
    %538 = arith.divf %536, %537 : vector<2x128xf32>
    %c0_283 = arith.constant 0 : index
    %c0_284 = arith.constant 0 : index
    %539 = vector.load %arg14[%c0_283, %c0_284] : memref<2x128xf32, #tpu.memory_space<vmem>>, vector<2x128xf32>
    %540 = arith.mulf %530, %539 : vector<2x128xf32>
    %541 = arith.mulf %524, %532 : vector<2x128xf32>
    %542 = arith.addf %540, %541 : vector<2x128xf32>
    %543 = math.tanh %542 : vector<2x128xf32>
    %544 = arith.mulf %538, %543 : vector<2x128xf32>
    %c0_285 = arith.constant 0 : index
    %c0_286 = arith.constant 0 : index
    %545 = vector.load %arg14[%c0_285, %c0_286] : memref<2x128xf32, #tpu.memory_space<vmem>>, vector<2x128xf32>
    tpu.vector_store %arg14[%c0_285, %c0_286], %542 {strides = array<i32>} : memref<2x128xf32, #tpu.memory_space<vmem>>, vector<2x128xf32>,
    %c0_287 = arith.constant 0 : index
    %c0_288 = arith.constant 0 : index
    %546 = vector.load %arg13[%c0_287, %c0_288] : memref<2x128xf32, #tpu.memory_space<vmem>>, vector<2x128xf32>
    tpu.vector_store %arg13[%c0_287, %c0_288], %544 {strides = array<i32>} : memref<2x128xf32, #tpu.memory_space<vmem>>, vector<2x128xf32>,
    %c12_289 = arith.constant 12 : index
    %c0_290 = arith.constant 0 : index
    %547 = vector.load %arg12[%c12_289, %c0_290] : memref<16x128xf32, #tpu.memory_space<vmem>>, vector<2x128xf32>
    tpu.vector_store %arg12[%c12_289, %c0_290], %544 {strides = array<i32>} : memref<16x128xf32, #tpu.memory_space<vmem>>, vector<2x128xf32>,
    %c14_291 = arith.constant 14 : index
    %c0_292 = arith.constant 0 : index
    %548 = vector.load %arg10[%c14_291, %c0_292] : memref<16x512xf32, #tpu.memory_space<vmem>>, vector<2x512xf32>
    %c0_293 = arith.constant 0 : index
    %c0_294 = arith.constant 0 : index
    %549 = vector.load %arg13[%c0_293, %c0_294] : memref<2x128xf32, #tpu.memory_space<vmem>>, vector<2x128xf32>
    %550 = arith.truncf %549 : vector<2x128xf32> to vector<2x128xbf16>
    %c0_295 = arith.constant 0 : index
    %c0_296 = arith.constant 0 : index
    %551 = vector.load %arg5[%c0_295, %c0_296] : memref<128x512xbf16, #tpu.memory_space<vmem>>, vector<128x512xbf16>
    %cst_297 = arith.constant dense<0.000000e+00> : vector<2x512xf32>
    %552 = tpu.matmul %550, %551, %cst_297 {dimension_numbers = #tpu.dot_dimension_numbers<[1], [0], [0], [1], [0, 0, 1, 1], [], []>} : vector<2x128xbf16>, vector<128x512xbf16>, vector<2x512xf32> -> vector<2x512xf32>
    %553 = arith.addf %548, %552 : vector<2x512xf32>
    %554 = vector.extract_strided_slice %553 {offsets = [0, 0], sizes = [2, 128], strides = [1, 1]} : vector<2x512xf32> to vector<2x128xf32>
    %555 = arith.negf %554 : vector<2x128xf32>
    %556 = math.exp %555 : vector<2x128xf32>
    %cst_298 = arith.constant 1.000000e+00 : f32
    %557 = vector.broadcast %cst_298 : f32 to vector<2x128xf32>
    %558 = arith.addf %557, %556 : vector<2x128xf32>
    %559 = arith.divf %557, %558 : vector<2x128xf32>
    %560 = vector.extract_strided_slice %553 {offsets = [0, 128], sizes = [2, 128], strides = [1, 1]} : vector<2x512xf32> to vector<2x128xf32>
    %561 = arith.negf %560 : vector<2x128xf32>
    %562 = math.exp %561 : vector<2x128xf32>
    %cst_299 = arith.constant 1.000000e+00 : f32
    %563 = vector.broadcast %cst_299 : f32 to vector<2x128xf32>
    %564 = arith.addf %563, %562 : vector<2x128xf32>
    %565 = arith.divf %563, %564 : vector<2x128xf32>
    %566 = vector.extract_strided_slice %553 {offsets = [0, 256], sizes = [2, 128], strides = [1, 1]} : vector<2x512xf32> to vector<2x128xf32>
    %567 = math.tanh %566 : vector<2x128xf32>
    %568 = vector.extract_strided_slice %553 {offsets = [0, 384], sizes = [2, 128], strides = [1, 1]} : vector<2x512xf32> to vector<2x128xf32>
    %569 = arith.negf %568 : vector<2x128xf32>
    %570 = math.exp %569 : vector<2x128xf32>
    %cst_300 = arith.constant 1.000000e+00 : f32
    %571 = vector.broadcast %cst_300 : f32 to vector<2x128xf32>
    %572 = arith.addf %571, %570 : vector<2x128xf32>
    %573 = arith.divf %571, %572 : vector<2x128xf32>
    %c0_301 = arith.constant 0 : index
    %c0_302 = arith.constant 0 : index
    %574 = vector.load %arg14[%c0_301, %c0_302] : memref<2x128xf32, #tpu.memory_space<vmem>>, vector<2x128xf32>
    %575 = arith.mulf %565, %574 : vector<2x128xf32>
    %576 = arith.mulf %559, %567 : vector<2x128xf32>
    %577 = arith.addf %575, %576 : vector<2x128xf32>
    %578 = math.tanh %577 : vector<2x128xf32>
    %579 = arith.mulf %573, %578 : vector<2x128xf32>
    %c0_303 = arith.constant 0 : index
    %c0_304 = arith.constant 0 : index
    %580 = vector.load %arg14[%c0_303, %c0_304] : memref<2x128xf32, #tpu.memory_space<vmem>>, vector<2x128xf32>
    tpu.vector_store %arg14[%c0_303, %c0_304], %577 {strides = array<i32>} : memref<2x128xf32, #tpu.memory_space<vmem>>, vector<2x128xf32>,
    %c0_305 = arith.constant 0 : index
    %c0_306 = arith.constant 0 : index
    %581 = vector.load %arg13[%c0_305, %c0_306] : memref<2x128xf32, #tpu.memory_space<vmem>>, vector<2x128xf32>
    tpu.vector_store %arg13[%c0_305, %c0_306], %579 {strides = array<i32>} : memref<2x128xf32, #tpu.memory_space<vmem>>, vector<2x128xf32>,
    %c14_307 = arith.constant 14 : index
    %c0_308 = arith.constant 0 : index
    %582 = vector.load %arg12[%c14_307, %c0_308] : memref<16x128xf32, #tpu.memory_space<vmem>>, vector<2x128xf32>
    tpu.vector_store %arg12[%c14_307, %c0_308], %579 {strides = array<i32>} : memref<16x128xf32, #tpu.memory_space<vmem>>, vector<2x128xf32>,
    %c0_309 = arith.constant 0 : index
    %c0_310 = arith.constant 0 : index
    %583 = vector.load %arg12[%c0_309, %c0_310] : memref<16x128xf32, #tpu.memory_space<vmem>>, vector<16x128xf32>
    %584 = arith.truncf %583 : vector<16x128xf32> to vector<16x128xbf16>
    %c0_311 = arith.constant 0 : index
    %c0_312 = arith.constant 0 : index
    %585 = vector.load %arg7[%c0_311, %c0_312] : memref<128x1xbf16, #tpu.memory_space<vmem>>, vector<128x1xbf16>
    %cst_313 = arith.constant dense<0.000000e+00> : vector<16x1xf32>
    %586 = tpu.matmul %584, %585, %cst_313 {dimension_numbers = #tpu.dot_dimension_numbers<[1], [0], [0], [1], [0, 0, 1, 1], [], []>} : vector<16x128xbf16>, vector<128x1xbf16>, vector<16x1xf32> -> vector<16x1xf32>
    %c0_314 = arith.constant 0 : index
    %c0_315 = arith.constant 0 : index
    %587 = memref.load %arg8[%c0_314, %c0_315] : memref<1x1xf32, #tpu.memory_space<smem>>
    %588 = vector.broadcast %587 : f32 to vector<16x1xf32>
    %589 = arith.addf %586, %588 : vector<16x1xf32>
    %590 = arith.negf %589 : vector<16x1xf32>
    %591 = math.exp %590 : vector<16x1xf32>
    %cst_316 = arith.constant 1.000000e+00 : f32
    %592 = vector.broadcast %cst_316 : f32 to vector<16x1xf32>
    %593 = arith.addf %592, %591 : vector<16x1xf32>
    %594 = arith.divf %592, %593 : vector<16x1xf32>
    %c0_317 = arith.constant 0 : index
    %c0_318 = arith.constant 0 : index
    %595 = vector.load %arg9[%c0_317, %c0_318] : memref<16x1xf32, #tpu.memory_space<vmem>>, vector<16x1xf32>
    tpu.vector_store %arg9[%c0_317, %c0_318], %594 {strides = array<i32>} : memref<16x1xf32, #tpu.memory_space<vmem>>, vector<16x1xf32>,
    return
  }
}

</mosaic_0001>

<bundles_post_ra>
// kernel: cnn_lstm_discriminator.5
= control target key start
LH: loop header
LB: loop body
LE: loop exit
PB: predicated region body
PF: predicated region fallthrough
CT: control target
= control target key end

     0   :  { %v1253_v3 = vmov 0   ;;  %vm211_vm0 = vcmask 130048   ;;  %s1471_s0 = inlined_call_operand.vmem [shape: bf16[16,4096], index: 0, kind: input, shape index: {}]   ;;  %s1472_s2 = inlined_call_operand.vmem [shape: f32[4,1], index: 2, kind: input, shape index: {}, may-alias: {2,3}]   ;;  %s1473_s3 = inlined_call_operand.vmem [shape: f32[4,1], index: 3, kind: input, shape index: {}, may-alias: {2,3}]   ;;  %s1474_s1 = inlined_call_operand.vmem [shape: bf16[4,16], index: 1, kind: input, shape index: {}]   ;;  %s1475_s4 = inlined_call_operand.vmem [shape: bf16[4,4096], index: 4, kind: output, shape index: {}]  }
   0x1   :  { %v19_v0 = vld [vmem:[%s1471_s0] sm:$0xff]  ;;  %v20_v2 = vld [vmem:[%s1471_s0 + $0x8] sm:$0xff]  ;;  %247 = vmatprep.mubr.bf16.mxu0 %v1253_v3  ;;  %288 = vmatprep.mubr.bf16.mxu1 %v1253_v3  ;;  %v21_v7 = vld [vmem:[%s1471_s0 + $0x10] sm:$0xff] }
   0x2   :  { %v35_v1 = vld [vmem:[%s1471_s0 + $0x80] sm:$0xff]  ;;  %v36_v5 = vld [vmem:[%s1471_s0 + $0x88] sm:$0xff]  ;;  %v37_v10 = vld [vmem:[%s1471_s0 + $0x90] sm:$0xff] }
   0x3   :  { %v1188_v4 = vcombine.high %v19_v0, %v35_v1  ;;  %v1187_v6 = vcombine.low %v19_v0, %v35_v1  ;;  %v1190_v8 = vcombine.high %v20_v2, %v36_v5  ;;  %v1189_v9 = vcombine.low %v20_v2, %v36_v5  ;;  %v22_v11 = vld [vmem:[%s1471_s0 + $0x18] sm:$0xff]  ;;  %v23_v15 = vld [vmem:[%s1471_s0 + $0x20] sm:$0xff]  ;;  %v24_v19 = vld [vmem:[%s1471_s0 + $0x28] sm:$0xff] }
   0x4   :  { %v38_v12 = vld [vmem:[%s1471_s0 + $0x98] sm:$0xff]  ;;  %v1192_v13 = vcombine.high %v21_v7, %v37_v10  ;;  %v39_v16 = vld [vmem:[%s1471_s0 + $0xa0] sm:$0xff]  ;;  %v1191_v18 = vcombine.low %v21_v7, %v37_v10  ;;  %v40_v20 = vld [vmem:[%s1471_s0 + $0xa8] sm:$0xff]  ;;  %v1254_v2 = vmov 1983009808   ;;  %v1036_v5 = vlaneseq }
   0x5   :  { %229 = vmatprep.subr.bf16.mxu0 %v1188_v4  ;;  %v1194_v14 = vcombine.high %v22_v11, %v38_v12  ;;  %270 = vmatprep.subr.bf16.mxu1 %v1190_v8  ;;  %v1315_v17 = vld [vmem:[%s1474_s1] sm:$0x3]  ;;  %v1193_v21 = vcombine.low %v22_v11, %v38_v12  ;;  %v1196_v22 = vcombine.high %v23_v15, %v39_v16  ;;  %v25_v24 = vld [vmem:[%s1471_s0 + $0x30] sm:$0xff]  ;;  %v26_v27 = vld [vmem:[%s1471_s0 + $0x38] sm:$0xff]  ;;  %v1034_v4 = vunpack.c.l.s4 %v1254_v2 }
   0x6   :  { %230 = vmatpush1.bf16.msra.mxu0 %v1187_v6  ;;  %271 = vmatpush1.bf16.msra.mxu1 %v1189_v9  ;;  %v1198_v23 = vcombine.high %v24_v19, %v40_v20  ;;  %v41_v25 = vld [vmem:[%s1471_s0 + $0xb0] sm:$0xff]  ;;  %v1195_v26 = vcombine.low %v23_v15, %v39_v16  ;;  %v42_v28 = vld [vmem:[%s1471_s0 + $0xb8] sm:$0xff]  ;;  %v1197_v29 = vcombine.low %v24_v19, %v40_v20  ;;  %v27_v32 = vld [vmem:[%s1471_s0 + $0x40] sm:$0xff]  ;;  %v1037_v8 = vshrl.u32 %v1036_v5, 7 }
   0x7   :  { %311 = vmatprep.subr.bf16.mxu0 %v1192_v13  ;;  %352 = vmatprep.subr.bf16.mxu1 %v1194_v14  ;;  %v1200_v30 = vcombine.high %v25_v24, %v41_v25  ;;  %v1202_v31 = vcombine.high %v26_v27, %v42_v28  ;;  %v43_v33 = vld [vmem:[%s1471_s0 + $0xc0] sm:$0xff]  ;;  %v1199_v34 = vcombine.low %v25_v24, %v41_v25  ;;  %v28_v35 = vld [vmem:[%s1471_s0 + $0x48] sm:$0xff]  ;;  %v29_v40 = vld [vmem:[%s1471_s0 + $0x50] sm:$0xff]  ;;  %v1035_v7 = vunpack.c.0.s8 %v1034_v4 }
   0x8   :  { %v44_v36 = vld [vmem:[%s1471_s0 + $0xc8] sm:$0xff]  ;;  %v1201_v37 = vcombine.low %v26_v27, %v42_v28  ;;  %v1204_v38 = vcombine.high %v27_v32, %v43_v33  ;;  %v45_v41 = vld [vmem:[%s1471_s0 + $0xd0] sm:$0xff]  ;;  %v1203_v42 = vcombine.low %v27_v32, %v43_v33  ;;  %v30_v43 = vld [vmem:[%s1471_s0 + $0x58] sm:$0xff] }
   0x9   :  { %1219 = vmatmul.mubr.msk.bf16.vlgmr.msra.gmra.mxu0 %vm211_vm0, %v1315_v17  ;;  %1220 = vmatmul.mubr.msk.bf16.vlgmr.msra.gmra.mxu1 %vm211_vm0, %v1315_v17  ;;  %v1206_v39 = vcombine.high %v28_v35, %v44_v36  ;;  %v46_v44 = vld [vmem:[%s1471_s0 + $0xd8] sm:$0xff]  ;;  %v1205_v45 = vcombine.low %v28_v35, %v44_v36  ;;  %v1208_v46 = vcombine.high %v29_v40, %v45_v41  ;;  %v31_v48 = vld [vmem:[%s1471_s0 + $0x60] sm:$0xff]  ;;  %v32_v51 = vld [vmem:[%s1471_s0 + $0x68] sm:$0xff] }
   0xa   :  { %312 = vmatpush1.bf16.msra.mxu0 %v1191_v18  ;;  %353 = vmatpush1.bf16.msra.mxu1 %v1193_v21  ;;  %v1210_v47 = vcombine.high %v30_v43, %v46_v44  ;;  %v47_v49 = vld [vmem:[%s1471_s0 + $0xe0] sm:$0xff]  ;;  %v1207_v50 = vcombine.low %v29_v40, %v45_v41  ;;  %v48_v52 = vld [vmem:[%s1471_s0 + $0xe8] sm:$0xff]  ;;  %v1209_v53 = vcombine.low %v30_v43, %v46_v44  ;;  %v33_v56 = vld [vmem:[%s1471_s0 + $0x70] sm:$0xff] }
   0xb   :  { %329 = vmatprep.mubr.bf16.mxu0 %v1253_v3  ;;  %370 = vmatprep.mubr.bf16.mxu1 %v1253_v3  ;;  %v1212_v54 = vcombine.high %v31_v48, %v47_v49  ;;  %v1214_v55 = vcombine.high %v32_v51, %v48_v52  ;;  %v49_v57 = vld [vmem:[%s1471_s0 + $0xf0] sm:$0xff]  ;;  %v1211_v58 = vcombine.low %v31_v48, %v47_v49  ;;  %v34_v59 = vld [vmem:[%s1471_s0 + $0x78] sm:$0xff] }
   0xc   :  { %393 = vmatprep.subr.bf16.mxu0 %v1196_v22  ;;  %434 = vmatprep.subr.bf16.mxu1 %v1198_v23  ;;  %v50_v60 = vld [vmem:[%s1471_s0 + $0xf8] sm:$0xff]  ;;  %v1213_v61 = vcombine.low %v32_v51, %v48_v52  ;;  %v1216_v62 = vcombine.high %v33_v56, %v49_v57  ;;  %v1215_v0 = vcombine.low %v33_v56, %v49_v57 }
   0xd   :  { %v1218_v63 = vcombine.high %v34_v59, %v50_v60  ;;  %v1217_v1 = vcombine.low %v34_v59, %v50_v60  ;;  %v1429_v14 = vsub.s32 %v1035_v7, %v1037_v8 }
  0x11   :  { %1221 = vmatmul.mubr.msk.bf16.vlgmr.msra.gmra.mxu0 %vm211_vm0, %v1315_v17  ;;  %1222 = vmatmul.mubr.msk.bf16.vlgmr.msra.gmra.mxu1 %vm211_vm0, %v1315_v17 }
  0x12   :  { %394 = vmatpush1.bf16.msra.mxu0 %v1195_v26  ;;  %435 = vmatpush1.bf16.msra.mxu1 %v1197_v29 }
  0x13   :  { %411 = vmatprep.mubr.bf16.mxu0 %v1253_v3  ;;  %452 = vmatprep.mubr.bf16.mxu1 %v1253_v3 }
  0x14   :  { %475 = vmatprep.subr.bf16.mxu0 %v1200_v30  ;;  %516 = vmatprep.subr.bf16.mxu1 %v1202_v31 }
  0x19   :  { %1223 = vmatmul.mubr.msk.bf16.vlgmr.msra.gmra.mxu0 %vm211_vm0, %v1315_v17  ;;  %1224 = vmatmul.mubr.msk.bf16.vlgmr.msra.gmra.mxu1 %vm211_vm0, %v1315_v17 }
  0x1a   :  { %476 = vmatpush1.bf16.msra.mxu0 %v1199_v34  ;;  %517 = vmatpush1.bf16.msra.mxu1 %v1201_v37 }
  0x1b   :  { %493 = vmatprep.mubr.bf16.mxu0 %v1253_v3  ;;  %534 = vmatprep.mubr.bf16.mxu1 %v1253_v3 }
  0x1c   :  { %557 = vmatprep.subr.bf16.mxu0 %v1204_v38  ;;  %598 = vmatprep.subr.bf16.mxu1 %v1206_v39 }
  0x21   :  { %1225 = vmatmul.mubr.msk.bf16.vlgmr.msra.gmra.mxu0 %vm211_vm0, %v1315_v17  ;;  %1226 = vmatmul.mubr.msk.bf16.vlgmr.msra.gmra.mxu1 %vm211_vm0, %v1315_v17 }
  0x22   :  { %558 = vmatpush1.bf16.msra.mxu0 %v1203_v42  ;;  %599 = vmatpush1.bf16.msra.mxu1 %v1205_v45 }
  0x23   :  { %575 = vmatprep.mubr.bf16.mxu0 %v1253_v3  ;;  %616 = vmatprep.mubr.bf16.mxu1 %v1253_v3 }
  0x24   :  { %639 = vmatprep.subr.bf16.mxu0 %v1208_v46  ;;  %680 = vmatprep.subr.bf16.mxu1 %v1210_v47 }
  0x29   :  { %1227 = vmatmul.mubr.msk.bf16.vlgmr.msra.gmra.mxu0 %vm211_vm0, %v1315_v17  ;;  %1228 = vmatmul.mubr.msk.bf16.vlgmr.msra.gmra.mxu1 %vm211_vm0, %v1315_v17 }
  0x2a   :  { %640 = vmatpush1.bf16.msra.mxu0 %v1207_v50  ;;  %681 = vmatpush1.bf16.msra.mxu1 %v1209_v53 }
  0x2b   :  { %657 = vmatprep.mubr.bf16.mxu0 %v1253_v3  ;;  %698 = vmatprep.mubr.bf16.mxu1 %v1253_v3 }
  0x2c   :  { %721 = vmatprep.subr.bf16.mxu0 %v1212_v54  ;;  %762 = vmatprep.subr.bf16.mxu1 %v1214_v55 }
  0x31   :  { %1229 = vmatmul.mubr.msk.bf16.vlgmr.msra.gmra.mxu0 %vm211_vm0, %v1315_v17  ;;  %1230 = vmatmul.mubr.msk.bf16.vlgmr.msra.gmra.mxu1 %vm211_vm0, %v1315_v17 }
  0x32   :  { %722 = vmatpush1.bf16.msra.mxu0 %v1211_v58  ;;  %763 = vmatpush1.bf16.msra.mxu1 %v1213_v61 }
  0x33   :  { %739 = vmatprep.mubr.bf16.mxu0 %v1253_v3  ;;  %780 = vmatprep.mubr.bf16.mxu1 %v1253_v3 }
  0x34   :  { %803 = vmatprep.subr.bf16.mxu0 %v1216_v62  ;;  %844 = vmatprep.subr.bf16.mxu1 %v1218_v63 }
  0x39   :  { %1231 = vmatmul.mubr.msk.bf16.vlgmr.msra.gmra.mxu0 %vm211_vm0, %v1315_v17  ;;  %1232 = vmatmul.mubr.msk.bf16.vlgmr.msra.gmra.mxu1 %vm211_vm0, %v1315_v17 }
  0x3a   :  { %804 = vmatpush1.bf16.msra.mxu0 %v1215_v0  ;;  %845 = vmatpush1.bf16.msra.mxu1 %v1217_v1 }
  0x3b   :  { %821 = vmatprep.mubr.bf16.mxu0 %v1253_v3  ;;  %862 = vmatprep.mubr.bf16.mxu1 %v1253_v3 }
  0x41   :  { %1233 = vmatmul.mubr.msk.bf16.vlgmr.msra.gmra.mxu0 %vm211_vm0, %v1315_v17  ;;  %1234 = vmatmul.mubr.msk.bf16.vlgmr.msra.gmra.mxu1 %vm211_vm0, %v1315_v17 }
  0xc9   :  { %v249_v6 = vpop.f32.mrf.mxu0  ;;  %v290_v10 = vpop.f32.mrf.mxu1 }
  0xca   :  { %v903_v9 = vmul.f32 0.2, %v249_v6  ;;  %vm871_vm1 = vcmp.ge.f32.partialorder %v249_v6, 0.0  ;;  %v905_v11 = vmul.f32 0.2, %v290_v10  ;;  %vm873_vm2 = vcmp.ge.f32.partialorder %v290_v10, 0.0 }
  0xcb   :  { %v251_v12 = vpop.f32.mrf.mxu0  ;;  %v292_v13 = vpop.f32.mrf.mxu1 }
  0xcc   :  { %vm872_vm3 = vcmp.ge.f32.partialorder %v251_v12, 0.0  ;;  %v904_v3 = vmul.f32 0.2, %v251_v12  ;;  %vm874_vm4 = vcmp.ge.f32.partialorder %v292_v13, 0.0  ;;  %v906_v15 = vmul.f32 0.2, %v292_v13 }
  0xcd   :  { %v253_v16 = vpop.f32.mrf.mxu0  ;;  %v935_v17 = vsel %vm871_vm1, %v249_v6, %v903_v9  ;;  %v294_v19 = vpop.f32.mrf.mxu1  ;;  %v937_v20 = vsel %vm873_vm2, %v290_v10, %v905_v11 }
  0xce   :  { %v936_v18 = vsel %vm872_vm3, %v251_v12, %v904_v3  ;;  %v938_v22 = vsel %vm874_vm4, %v292_v13, %v906_v15 }
  0xcf   :  { %v1235_v21 = vpack.c.bf16 %v936_v18, %v935_v17  ;;  %v254_v23 = vpop.f32.mrf.mxu0  ;;  %v1236_v24 = vpack.c.bf16 %v938_v22, %v937_v20  ;;  %v295_v25 = vpop.f32.mrf.mxu1 }
  0xd1   :  { %v1039_v26 = vrot.slane %v1235_v21, %v1429_v14  ;;  %v331_v27 = vpop.f32.mrf.mxu0  ;;  %v1046_v28 = vrot.slane %v1236_v24, %v1429_v14  ;;  %v372_v30 = vpop.f32.mrf.mxu1 }
  0xd2   :  { %v907_v29 = vmul.f32 0.2, %v331_v27  ;;  %vm875_vm5 = vcmp.ge.f32.partialorder %v331_v27, 0.0  ;;  %v909_v31 = vmul.f32 0.2, %v372_v30  ;;  %vm877_vm6 = vcmp.ge.f32.partialorder %v372_v30, 0.0 }
  0xd3   :  { %v333_v32 = vpop.f32.mrf.mxu0  ;;  %v1047_v33 = vcombine.low %v1039_v26, %v1046_v28  ;;  %v374_v35 = vpop.f32.mrf.mxu1 }
  0xd4   :  { %vm876_vm7 = vcmp.ge.f32.partialorder %v333_v32, 0.0  ;;  %v908_v34 = vmul.f32 0.2, %v333_v32  ;;  %vm878_vm8 = vcmp.ge.f32.partialorder %v374_v35, 0.0  ;;  %v910_v36 = vmul.f32 0.2, %v374_v35 }
  0xd5   :  { %v335_v37 = vpop.f32.mrf.mxu0  ;;  %1175 = vst [vmem:[%s1475_s4] sm:$0xff] %v1047_v33  ;;  %v939_v38 = vsel %vm875_vm5, %v331_v27, %v907_v29  ;;  %v376_v40 = vpop.f32.mrf.mxu1  ;;  %v941_v41 = vsel %vm877_vm6, %v372_v30, %v909_v31 }
  0xd6   :  { %v940_v39 = vsel %vm876_vm7, %v333_v32, %v908_v34  ;;  %v942_v43 = vsel %vm878_vm8, %v374_v35, %v910_v36 }
  0xd7   :  { %v1237_v42 = vpack.c.bf16 %v940_v39, %v939_v38  ;;  %v336_v44 = vpop.f32.mrf.mxu0  ;;  %v1238_v45 = vpack.c.bf16 %v942_v43, %v941_v41  ;;  %v377_v46 = vpop.f32.mrf.mxu1 }
  0xd9   :  { %v1056_v47 = vrot.slane %v1237_v42, %v1429_v14  ;;  %v413_v48 = vpop.f32.mrf.mxu0  ;;  %v1063_v49 = vrot.slane %v1238_v45, %v1429_v14  ;;  %v454_v51 = vpop.f32.mrf.mxu1 }
  0xda   :  { %v911_v50 = vmul.f32 0.2, %v413_v48  ;;  %vm879_vm9 = vcmp.ge.f32.partialorder %v413_v48, 0.0  ;;  %v913_v52 = vmul.f32 0.2, %v454_v51  ;;  %vm881_vm10 = vcmp.ge.f32.partialorder %v454_v51, 0.0 }
  0xdb   :  { %v415_v53 = vpop.f32.mrf.mxu0  ;;  %v1064_v54 = vcombine.low %v1056_v47, %v1063_v49  ;;  %v456_v56 = vpop.f32.mrf.mxu1 }
  0xdc   :  { %vm880_vm11 = vcmp.ge.f32.partialorder %v415_v53, 0.0  ;;  %v912_v55 = vmul.f32 0.2, %v415_v53  ;;  %vm882_vm12 = vcmp.ge.f32.partialorder %v456_v56, 0.0  ;;  %v914_v57 = vmul.f32 0.2, %v456_v56 }
  0xdd   :  { %v417_v58 = vpop.f32.mrf.mxu0  ;;  %1176 = vst [vmem:[%s1475_s4 + $0x8] sm:$0xff] %v1064_v54  ;;  %v943_v59 = vsel %vm879_vm9, %v413_v48, %v911_v50  ;;  %v458_v61 = vpop.f32.mrf.mxu1  ;;  %v945_v62 = vsel %vm881_vm10, %v454_v51, %v913_v52 }
  0xde   :  { %v944_v60 = vsel %vm880_vm11, %v415_v53, %v912_v55  ;;  %v946_v0 = vsel %vm882_vm12, %v456_v56, %v914_v57 }
  0xdf   :  { %v1239_v63 = vpack.c.bf16 %v944_v60, %v943_v59  ;;  %v418_v1 = vpop.f32.mrf.mxu0  ;;  %v1240_v2 = vpack.c.bf16 %v946_v0, %v945_v62  ;;  %v459_v4 = vpop.f32.mrf.mxu1 }
  0xe1   :  { %v1073_v5 = vrot.slane %v1239_v63, %v1429_v14  ;;  %v495_v6 = vpop.f32.mrf.mxu0  ;;  %v1080_v7 = vrot.slane %v1240_v2, %v1429_v14  ;;  %v536_v9 = vpop.f32.mrf.mxu1 }
  0xe2   :  { %v915_v8 = vmul.f32 0.2, %v495_v6  ;;  %vm883_vm13 = vcmp.ge.f32.partialorder %v495_v6, 0.0  ;;  %v917_v10 = vmul.f32 0.2, %v536_v9  ;;  %vm885_vm14 = vcmp.ge.f32.partialorder %v536_v9, 0.0 }
  0xe3   :  { %v497_v11 = vpop.f32.mrf.mxu0  ;;  %v1081_v12 = vcombine.low %v1073_v5, %v1080_v7  ;;  %v538_v13 = vpop.f32.mrf.mxu1 }
  0xe4   :  { %vm884_vm15 = vcmp.ge.f32.partialorder %v497_v11, 0.0  ;;  %v916_v3 = vmul.f32 0.2, %v497_v11  ;;  %vm886_vm0 = vcmp.ge.f32.partialorder %v538_v13, 0.0  ;;  %v918_v15 = vmul.f32 0.2, %v538_v13 }
  0xe5   :  { %v499_v16 = vpop.f32.mrf.mxu0  ;;  %1177 = vst [vmem:[%s1475_s4 + $0x10] sm:$0xff] %v1081_v12  ;;  %v947_v17 = vsel %vm883_vm13, %v495_v6, %v915_v8  ;;  %v540_v19 = vpop.f32.mrf.mxu1  ;;  %v949_v20 = vsel %vm885_vm14, %v536_v9, %v917_v10 }
  0xe6   :  { %v948_v18 = vsel %vm884_vm15, %v497_v11, %v916_v3  ;;  %v950_v22 = vsel %vm886_vm0, %v538_v13, %v918_v15 }
  0xe7   :  { %v1241_v21 = vpack.c.bf16 %v948_v18, %v947_v17  ;;  %v500_v23 = vpop.f32.mrf.mxu0  ;;  %v1242_v24 = vpack.c.bf16 %v950_v22, %v949_v20  ;;  %v541_v25 = vpop.f32.mrf.mxu1 }
  0xe9   :  { %v1090_v26 = vrot.slane %v1241_v21, %v1429_v14  ;;  %v577_v27 = vpop.f32.mrf.mxu0  ;;  %v1097_v28 = vrot.slane %v1242_v24, %v1429_v14  ;;  %v618_v30 = vpop.f32.mrf.mxu1 }
  0xea   :  { %v919_v29 = vmul.f32 0.2, %v577_v27  ;;  %vm887_vm1 = vcmp.ge.f32.partialorder %v577_v27, 0.0  ;;  %v921_v31 = vmul.f32 0.2, %v618_v30  ;;  %vm889_vm2 = vcmp.ge.f32.partialorder %v618_v30, 0.0 }
  0xeb   :  { %v579_v32 = vpop.f32.mrf.mxu0  ;;  %v1098_v33 = vcombine.low %v1090_v26, %v1097_v28  ;;  %v620_v35 = vpop.f32.mrf.mxu1 }
  0xec   :  { %vm888_vm3 = vcmp.ge.f32.partialorder %v579_v32, 0.0  ;;  %v920_v34 = vmul.f32 0.2, %v579_v32  ;;  %vm890_vm4 = vcmp.ge.f32.partialorder %v620_v35, 0.0  ;;  %v922_v36 = vmul.f32 0.2, %v620_v35 }
  0xed   :  { %v581_v37 = vpop.f32.mrf.mxu0  ;;  %1178 = vst [vmem:[%s1475_s4 + $0x18] sm:$0xff] %v1098_v33  ;;  %v951_v38 = vsel %vm887_vm1, %v577_v27, %v919_v29  ;;  %v622_v40 = vpop.f32.mrf.mxu1  ;;  %v953_v41 = vsel %vm889_vm2, %v618_v30, %v921_v31 }
  0xee   :  { %v952_v39 = vsel %vm888_vm3, %v579_v32, %v920_v34  ;;  %v954_v43 = vsel %vm890_vm4, %v620_v35, %v922_v36 }
  0xef   :  { %v1243_v42 = vpack.c.bf16 %v952_v39, %v951_v38  ;;  %v582_v44 = vpop.f32.mrf.mxu0  ;;  %v1244_v45 = vpack.c.bf16 %v954_v43, %v953_v41  ;;  %v623_v46 = vpop.f32.mrf.mxu1 }
  0xf1   :  { %v1107_v47 = vrot.slane %v1243_v42, %v1429_v14  ;;  %v659_v48 = vpop.f32.mrf.mxu0  ;;  %v1114_v49 = vrot.slane %v1244_v45, %v1429_v14  ;;  %v700_v51 = vpop.f32.mrf.mxu1 }
  0xf2   :  { %v923_v50 = vmul.f32 0.2, %v659_v48  ;;  %vm891_vm5 = vcmp.ge.f32.partialorder %v659_v48, 0.0  ;;  %v925_v52 = vmul.f32 0.2, %v700_v51  ;;  %vm893_vm6 = vcmp.ge.f32.partialorder %v700_v51, 0.0 }
  0xf3   :  { %v661_v53 = vpop.f32.mrf.mxu0  ;;  %v1115_v54 = vcombine.low %v1107_v47, %v1114_v49  ;;  %v702_v56 = vpop.f32.mrf.mxu1 }
  0xf4   :  { %vm892_vm7 = vcmp.ge.f32.partialorder %v661_v53, 0.0  ;;  %v924_v55 = vmul.f32 0.2, %v661_v53  ;;  %vm894_vm8 = vcmp.ge.f32.partialorder %v702_v56, 0.0  ;;  %v926_v57 = vmul.f32 0.2, %v702_v56 }
  0xf5   :  { %v663_v58 = vpop.f32.mrf.mxu0  ;;  %1179 = vst [vmem:[%s1475_s4 + $0x20] sm:$0xff] %v1115_v54  ;;  %v955_v59 = vsel %vm891_vm5, %v659_v48, %v923_v50  ;;  %v704_v61 = vpop.f32.mrf.mxu1  ;;  %v957_v62 = vsel %vm893_vm6, %v700_v51, %v925_v52 }
  0xf6   :  { %v956_v60 = vsel %vm892_vm7, %v661_v53, %v924_v55  ;;  %v958_v0 = vsel %vm894_vm8, %v702_v56, %v926_v57 }
  0xf7   :  { %v1245_v63 = vpack.c.bf16 %v956_v60, %v955_v59  ;;  %v664_v1 = vpop.f32.mrf.mxu0  ;;  %v1246_v2 = vpack.c.bf16 %v958_v0, %v957_v62  ;;  %v705_v4 = vpop.f32.mrf.mxu1 }
  0xf9   :  { %v1124_v5 = vrot.slane %v1245_v63, %v1429_v14  ;;  %v741_v6 = vpop.f32.mrf.mxu0  ;;  %v1131_v7 = vrot.slane %v1246_v2, %v1429_v14  ;;  %v782_v9 = vpop.f32.mrf.mxu1 }
  0xfa   :  { %v927_v8 = vmul.f32 0.2, %v741_v6  ;;  %vm895_vm9 = vcmp.ge.f32.partialorder %v741_v6, 0.0  ;;  %v929_v10 = vmul.f32 0.2, %v782_v9  ;;  %vm897_vm10 = vcmp.ge.f32.partialorder %v782_v9, 0.0 }
  0xfb   :  { %v743_v11 = vpop.f32.mrf.mxu0  ;;  %v1132_v12 = vcombine.low %v1124_v5, %v1131_v7  ;;  %v784_v13 = vpop.f32.mrf.mxu1 }
  0xfc   :  { %vm896_vm11 = vcmp.ge.f32.partialorder %v743_v11, 0.0  ;;  %v928_v3 = vmul.f32 0.2, %v743_v11  ;;  %vm898_vm12 = vcmp.ge.f32.partialorder %v784_v13, 0.0  ;;  %v930_v15 = vmul.f32 0.2, %v784_v13 }
  0xfd   :  { %v745_v16 = vpop.f32.mrf.mxu0  ;;  %1180 = vst [vmem:[%s1475_s4 + $0x28] sm:$0xff] %v1132_v12  ;;  %v959_v17 = vsel %vm895_vm9, %v741_v6, %v927_v8  ;;  %v786_v19 = vpop.f32.mrf.mxu1  ;;  %v961_v20 = vsel %vm897_vm10, %v782_v9, %v929_v10 }
  0xfe   :  { %v960_v18 = vsel %vm896_vm11, %v743_v11, %v928_v3  ;;  %v962_v22 = vsel %vm898_vm12, %v784_v13, %v930_v15 }
  0xff   :  { %v1247_v21 = vpack.c.bf16 %v960_v18, %v959_v17  ;;  %v746_v23 = vpop.f32.mrf.mxu0  ;;  %v1248_v24 = vpack.c.bf16 %v962_v22, %v961_v20  ;;  %v787_v25 = vpop.f32.mrf.mxu1 }
 0x101   :  { %v1141_v26 = vrot.slane %v1247_v21, %v1429_v14  ;;  %v823_v27 = vpop.f32.mrf.mxu0  ;;  %v1148_v28 = vrot.slane %v1248_v24, %v1429_v14  ;;  %v864_v30 = vpop.f32.mrf.mxu1 }
 0x102   :  { %v931_v29 = vmul.f32 0.2, %v823_v27  ;;  %vm899_vm13 = vcmp.ge.f32.partialorder %v823_v27, 0.0  ;;  %v933_v31 = vmul.f32 0.2, %v864_v30  ;;  %vm901_vm14 = vcmp.ge.f32.partialorder %v864_v30, 0.0 }
 0x103   :  { %v825_v32 = vpop.f32.mrf.mxu0  ;;  %v1149_v33 = vcombine.low %v1141_v26, %v1148_v28  ;;  %v866_v35 = vpop.f32.mrf.mxu1 }
 0x104   :  { %vm900_vm15 = vcmp.ge.f32.partialorder %v825_v32, 0.0  ;;  %v932_v34 = vmul.f32 0.2, %v825_v32  ;;  %vm902_vm0 = vcmp.ge.f32.partialorder %v866_v35, 0.0  ;;  %v934_v36 = vmul.f32 0.2, %v866_v35 }
 0x105   :  { %v827_v37 = vpop.f32.mrf.mxu0  ;;  %1181 = vst [vmem:[%s1475_s4 + $0x30] sm:$0xff] %v1149_v33  ;;  %v963_v38 = vsel %vm899_vm13, %v823_v27, %v931_v29  ;;  %v868_v40 = vpop.f32.mrf.mxu1  ;;  %v965_v41 = vsel %vm901_vm14, %v864_v30, %v933_v31 }
 0x106   :  { %v964_v39 = vsel %vm900_vm15, %v825_v32, %v932_v34  ;;  %v966_v43 = vsel %vm902_vm0, %v866_v35, %v934_v36 }
 0x107   :  { %v1249_v42 = vpack.c.bf16 %v964_v39, %v963_v38  ;;  %v828_v44 = vpop.f32.mrf.mxu0  ;;  %v1250_v45 = vpack.c.bf16 %v966_v43, %v965_v41  ;;  %v869_v46 = vpop.f32.mrf.mxu1 }
 0x109   :  { %v1158_v47 = vrot.slane %v1249_v42, %v1429_v14  ;;  %v1165_v48 = vrot.slane %v1250_v45, %v1429_v14 }
 0x10b   :  { %v1166_v49 = vcombine.low %v1158_v47, %v1165_v48 }
 0x10d   :  { %1182 = vst [vmem:[%s1475_s4 + $0x38] sm:$0xff] %v1166_v49 }

// kernel: cnn_lstm_discriminator.6
= control target key start
LH: loop header
LB: loop body
LE: loop exit
PB: predicated region body
PF: predicated region fallthrough
CT: control target
= control target key end

     0   :  { %v567_v3 = vmov 0   ;;  %vm211_vm0 = vcmask 523264   ;;  %s728_s0 = inlined_call_operand.vmem [shape: bf16[64,1024], index: 0, kind: input, shape index: {}]   ;;  %s729_s1 = inlined_call_operand.vmem [shape: bf16[8,64], index: 1, kind: input, shape index: {}]   ;;  %s730_s2 = inlined_call_operand.vmem [shape: f32[8,1], index: 2, kind: input, shape index: {}]   ;;  %s731_s3 = inlined_call_operand.vmem [shape: f32[8,1], index: 3, kind: input, shape index: {}]   ;;  %s732_s4 = inlined_call_operand.vmem [shape: bf16[8,1024], index: 4, kind: output, shape index: {}]  }
   0x1   :  { %v43_v0 = vld [vmem:[%s728_s0 + $0xc0] sm:$0xff]  ;;  %v44_v2 = vld [vmem:[%s728_s0 + $0xc8] sm:$0xff]  ;;  %247 = vmatprep.mubr.bf16.mxu0 %v567_v3  ;;  %288 = vmatprep.mubr.bf16.mxu1 %v567_v3  ;;  %v45_v31 = vld [vmem:[%s728_s0 + $0xd0] sm:$0xff] }
   0x2   :  { %v47_v1 = vld [vmem:[%s728_s0 + $0xe0] sm:$0xff]  ;;  %v48_v5 = vld [vmem:[%s728_s0 + $0xe8] sm:$0xff]  ;;  %563 = vset.pattern.permute.xlu1 %v567_v3  ;;  %564 = vset.pattern.permute.xlu0 %v567_v3  ;;  %v49_v32 = vld [vmem:[%s728_s0 + $0xf0] sm:$0xff] }
   0x3   :  { %v543_v4 = vcombine.high %v43_v0, %v47_v1  ;;  %v542_v6 = vcombine.low %v43_v0, %v47_v1  ;;  %v35_v7 = vld [vmem:[%s728_s0 + $0x80] sm:$0xff]  ;;  %v545_v9 = vcombine.high %v44_v2, %v48_v5  ;;  %v544_v10 = vcombine.low %v44_v2, %v48_v5  ;;  %v36_v12 = vld [vmem:[%s728_s0 + $0x88] sm:$0xff]  ;;  %v46_v33 = vld [vmem:[%s728_s0 + $0xd8] sm:$0xff] }
   0x4   :  { %v39_v8 = vld [vmem:[%s728_s0 + $0xa0] sm:$0xff]  ;;  %v40_v13 = vld [vmem:[%s728_s0 + $0xa8] sm:$0xff]  ;;  %v50_v34 = vld [vmem:[%s728_s0 + $0xf8] sm:$0xff]  ;;  %v547_v37 = vcombine.high %v45_v31, %v49_v32  ;;  %v546_v44 = vcombine.low %v45_v31, %v49_v32 }
   0x5   :  { %v535_v11 = vcombine.high %v35_v7, %v39_v8  ;;  %v27_v14 = vld [vmem:[%s728_s0 + $0x40] sm:$0xff]  ;;  %223 = vmatprep.subr.bf16.mxu0 %v543_v4  ;;  %v537_v15 = vcombine.high %v36_v12, %v40_v13  ;;  %v28_v17 = vld [vmem:[%s728_s0 + $0x48] sm:$0xff]  ;;  %264 = vmatprep.subr.bf16.mxu1 %v545_v9  ;;  %v534_v19 = vcombine.low %v35_v7, %v39_v8  ;;  %v37_v39 = vld [vmem:[%s728_s0 + $0x90] sm:$0xff] }
   0x6   :  { %v31_v16 = vld [vmem:[%s728_s0 + $0x60] sm:$0xff]  ;;  %v32_v18 = vld [vmem:[%s728_s0 + $0x68] sm:$0xff]  ;;  %224 = vmatpush1.bf16.msra.mxu0 %v542_v6  ;;  %265 = vmatpush1.bf16.msra.mxu1 %v544_v10  ;;  %v536_v20 = vcombine.low %v36_v12, %v40_v13  ;;  %v549_v38 = vcombine.high %v46_v33, %v50_v34  ;;  %v41_v40 = vld [vmem:[%s728_s0 + $0xb0] sm:$0xff]  ;;  %v548_v45 = vcombine.low %v46_v33, %v50_v34 }
   0x7   :  { %225 = vmatprep.subr.bf16.mxu0 %v535_v11  ;;  %v527_v21 = vcombine.high %v27_v14, %v31_v16  ;;  %266 = vmatprep.subr.bf16.mxu1 %v537_v15  ;;  %v529_v22 = vcombine.high %v28_v17, %v32_v18  ;;  %v19_v23 = vld [vmem:[%s728_s0] sm:$0xff]  ;;  %v20_v25 = vld [vmem:[%s728_s0 + $0x8] sm:$0xff]  ;;  %v526_v27 = vcombine.low %v27_v14, %v31_v16  ;;  %v38_v41 = vld [vmem:[%s728_s0 + $0x98] sm:$0xff] }
   0x8   :  { %v23_v24 = vld [vmem:[%s728_s0 + $0x20] sm:$0xff]  ;;  %v24_v26 = vld [vmem:[%s728_s0 + $0x28] sm:$0xff]  ;;  %v528_v28 = vcombine.low %v28_v17, %v32_v18  ;;  %v42_v42 = vld [vmem:[%s728_s0 + $0xb8] sm:$0xff]  ;;  %v539_v46 = vcombine.high %v37_v39, %v41_v40  ;;  %v538_v52 = vcombine.low %v37_v39, %v41_v40 }
   0x9   :  { %v519_v29 = vcombine.high %v19_v23, %v23_v24  ;;  %v521_v30 = vcombine.high %v20_v25, %v24_v26  ;;  %v518_v35 = vcombine.low %v19_v23, %v23_v24  ;;  %v520_v36 = vcombine.low %v20_v25, %v24_v26  ;;  %v18_v43 = vld [vmem:[%s729_s1] sm:$0xf]  ;;  %v29_v48 = vld [vmem:[%s728_s0 + $0x50] sm:$0xff]  ;;  %v30_v50 = vld [vmem:[%s728_s0 + $0x58] sm:$0xff] }
   0xa   :  { %226 = vmatpush1.bf16.msra.mxu0 %v534_v19  ;;  %267 = vmatpush1.bf16.msra.mxu1 %v536_v20  ;;  %v541_v47 = vcombine.high %v38_v41, %v42_v42  ;;  %v33_v49 = vld [vmem:[%s728_s0 + $0x70] sm:$0xff]  ;;  %v34_v51 = vld [vmem:[%s728_s0 + $0x78] sm:$0xff]  ;;  %v540_v53 = vcombine.low %v38_v41, %v42_v42  ;;  %v426_v25 = vld [vmem:[%s730_s2] sm:$0xff] }
   0xb   :  { %227 = vmatprep.subr.bf16.mxu0 %v527_v21  ;;  %268 = vmatprep.subr.bf16.mxu1 %v529_v22  ;;  %v531_v54 = vcombine.high %v29_v48, %v33_v49  ;;  %v533_v55 = vcombine.high %v30_v50, %v34_v51  ;;  %v21_v56 = vld [vmem:[%s728_s0 + $0x10] sm:$0xff]  ;;  %v22_v58 = vld [vmem:[%s728_s0 + $0x18] sm:$0xff]  ;;  %v530_v60 = vcombine.low %v29_v48, %v33_v49  ;;  %v440_v26 = vld [vmem:[%s731_s3] sm:$0xff] }
   0xc   :  { %v25_v57 = vld [vmem:[%s728_s0 + $0x30] sm:$0xff]  ;;  %v26_v59 = vld [vmem:[%s728_s0 + $0x38] sm:$0xff]  ;;  %v532_v61 = vcombine.low %v30_v50, %v34_v51  ;;  %429 = vperm.xlu1 %563, %v426_v25  }
   0xd   :  { %v523_v62 = vcombine.high %v21_v56, %v25_v57  ;;  %v525_v63 = vcombine.high %v22_v58, %v26_v59  ;;  %v522_v0 = vcombine.low %v21_v56, %v25_v57  ;;  %v524_v1 = vcombine.low %v22_v58, %v26_v59 }
   0xe   :  { %228 = vmatpush1.bf16.msra.mxu0 %v526_v27  ;;  %269 = vmatpush1.bf16.msra.mxu1 %v528_v28 }
   0xf   :  { %229 = vmatprep.subr.bf16.mxu0 %v519_v29  ;;  %270 = vmatprep.subr.bf16.mxu1 %v521_v30 }
  0x10   :  { %443 = vperm.xlu1 %563, %v440_v26  }
  0x12   :  { %230 = vmatpush1.bf16.msra.mxu0 %v518_v35  ;;  %271 = vmatpush1.bf16.msra.mxu1 %v520_v36 }
  0x13   :  { %305 = vmatprep.subr.bf16.mxu0 %v547_v37  ;;  %346 = vmatprep.subr.bf16.mxu1 %v549_v38 }
  0x15   :  { %550 = vmatmul.mubr.msk.bf16.vlgmr.msra.gmra.mxu0 %vm211_vm0, %v18_v43  ;;  %551 = vmatmul.mubr.msk.bf16.vlgmr.msra.gmra.mxu1 %vm211_vm0, %v18_v43 }
  0x16   :  { %306 = vmatpush1.bf16.msra.mxu0 %v546_v44  ;;  %347 = vmatpush1.bf16.msra.mxu1 %v548_v45 }
  0x17   :  { %307 = vmatprep.subr.bf16.mxu0 %v539_v46  ;;  %348 = vmatprep.subr.bf16.mxu1 %v541_v47 }
  0x18   :  { %329 = vmatprep.mubr.bf16.mxu0 %v567_v3  ;;  %370 = vmatprep.mubr.bf16.mxu1 %v567_v3 }
  0x1a   :  { %308 = vmatpush1.bf16.msra.mxu0 %v538_v52  ;;  %349 = vmatpush1.bf16.msra.mxu1 %v540_v53 }
  0x1b   :  { %309 = vmatprep.subr.bf16.mxu0 %v531_v54  ;;  %350 = vmatprep.subr.bf16.mxu1 %v533_v55 }
  0x1e   :  { %310 = vmatpush1.bf16.msra.mxu0 %v530_v60  ;;  %351 = vmatpush1.bf16.msra.mxu1 %v532_v61 }
  0x1f   :  { %311 = vmatprep.subr.bf16.mxu0 %v523_v62  ;;  %352 = vmatprep.subr.bf16.mxu1 %v525_v63 }
  0x22   :  { %312 = vmatpush1.bf16.msra.mxu0 %v522_v0  ;;  %353 = vmatpush1.bf16.msra.mxu1 %v524_v1 }
  0x25   :  { %552 = vmatmul.mubr.msk.bf16.vlgmr.msra.gmra.mxu0 %vm211_vm0, %v18_v43  ;;  %553 = vmatmul.mubr.msk.bf16.vlgmr.msra.gmra.mxu1 %vm211_vm0, %v18_v43 }
  0x87   :  { %v430_v55 = vpop.permute.xlu1 %429 }
  0xd5   :  { %v249_v2 = vpop.f32.mrf.mxu0  ;;  %v290_v3 = vpop.f32.mrf.mxu1 }
  0xd7   :  { %v251_v4 = vpop.f32.mrf.mxu0  ;;  %v292_v5 = vpop.f32.mrf.mxu1 }
  0xd8   :  { %v379_v9 = vadd.f32 %v251_v4, %v249_v2 }
  0xd9   :  { %v253_v6 = vpop.f32.mrf.mxu0  ;;  %v294_v7 = vpop.f32.mrf.mxu1 }
  0xda   :  { %v380_v11 = vadd.f32 %v379_v9, %v290_v3 }
  0xdb   :  { %v254_v8 = vpop.f32.mrf.mxu0  ;;  %v295_v10 = vpop.f32.mrf.mxu1 }
  0xdc   :  { %v381_v12 = vadd.f32 %v380_v11, %v292_v5 }
  0xe5   :  { %v331_v13 = vpop.f32.mrf.mxu0  ;;  %v372_v15 = vpop.f32.mrf.mxu1 }
  0xe6   :  { %v382_v14 = vadd.f32 %v381_v12, %v331_v13 }
  0xe7   :  { %v333_v16 = vpop.f32.mrf.mxu0  ;;  %v374_v18 = vpop.f32.mrf.mxu1 }
  0xe8   :  { %v383_v17 = vadd.f32 %v382_v14, %v333_v16 }
  0xe9   :  { %v335_v19 = vpop.f32.mrf.mxu0  ;;  %v376_v20 = vpop.f32.mrf.mxu1 }
  0xea   :  { %v384_v21 = vadd.f32 %v383_v17, %v372_v15 }
  0xeb   :  { %v336_v22 = vpop.f32.mrf.mxu0  ;;  %v377_v23 = vpop.f32.mrf.mxu1 }
  0xec   :  { %v385_v24 = vadd.f32 %v384_v21, %v374_v18 }
  0xee   :  { %386 = vadd.xlane.f32.xlu0 %v385_v24 }
 0x177   :  { %v387_v27 = vpop.xlane.xlu0 %386 }
 0x178   :  { %v389_v28 = vmul.f32 0.0009765625, %v387_v27 }
 0x17a   :  { %v390_v29 = vsub.f32 %v249_v2, %v389_v28  ;;  %v391_v30 = vsub.f32 %v251_v4, %v389_v28  ;;  %v392_v31 = vsub.f32 %v290_v3, %v389_v28  ;;  %v393_v32 = vsub.f32 %v292_v5, %v389_v28  ;;  %v444_v5 = vpop.permute.xlu1 %443 }
 0x17b   :  { %v394_v35 = vsub.f32 %v331_v13, %v389_v28  ;;  %v395_v38 = vsub.f32 %v333_v16, %v389_v28  ;;  %v396_v41 = vsub.f32 %v372_v15, %v389_v28  ;;  %v397_v44 = vsub.f32 %v374_v18, %v389_v28 }
 0x17c   :  { %v398_v33 = vmul.f32 %v390_v29, %v390_v29  ;;  %v399_v34 = vmul.f32 %v391_v30, %v391_v30  ;;  %v400_v36 = vmul.f32 %v392_v31, %v392_v31  ;;  %v401_v39 = vmul.f32 %v393_v32, %v393_v32 }
 0x17d   :  { %v402_v42 = vmul.f32 %v394_v35, %v394_v35  ;;  %v403_v45 = vmul.f32 %v395_v38, %v395_v38  ;;  %v404_v47 = vmul.f32 %v396_v41, %v396_v41  ;;  %v405_v49 = vmul.f32 %v397_v44, %v397_v44 }
 0x17e   :  { %v406_v37 = vadd.f32 %v399_v34, %v398_v33 }
 0x180   :  { %v407_v40 = vadd.f32 %v406_v37, %v400_v36 }
 0x182   :  { %v408_v43 = vadd.f32 %v407_v40, %v401_v39 }
 0x184   :  { %v409_v46 = vadd.f32 %v408_v43, %v402_v42 }
 0x186   :  { %v410_v48 = vadd.f32 %v409_v46, %v403_v45 }
 0x188   :  { %v411_v50 = vadd.f32 %v410_v48, %v404_v47 }
 0x18a   :  { %v412_v51 = vadd.f32 %v411_v50, %v405_v49 }
 0x18c   :  { %413 = vadd.xlane.f32.xlu0 %v412_v51 }
 0x215   :  { %v414_v52 = vpop.xlane.xlu0 %413 }
 0x216   :  { %v415_v53 = vmul.f32 0.0009765625, %v414_v52 }
 0x218   :  { %v416_v54 = vadd.f32 1e-05, %v415_v53 }
 0x21a   :  { %565 = vrsqrt.f32 %v416_v54 }
 0x227   :  { %v566_v56 = vpop.eup %565 }
 0x228   :  { %v418_v57 = vmul.f32 %v566_v56, %v390_v29  ;;  %v419_v58 = vmul.f32 %v566_v56, %v391_v30  ;;  %v420_v59 = vmul.f32 %v566_v56, %v392_v31  ;;  %v421_v60 = vmul.f32 %v566_v56, %v393_v32 }
 0x229   :  { %v422_v61 = vmul.f32 %v566_v56, %v394_v35  ;;  %v423_v62 = vmul.f32 %v566_v56, %v395_v38  ;;  %v424_v63 = vmul.f32 %v566_v56, %v396_v41  ;;  %v425_v0 = vmul.f32 %v566_v56, %v397_v44 }
 0x22a   :  { %v432_v1 = vmul.f32 %v430_v55, %v418_v57  ;;  %v433_v2 = vmul.f32 %v430_v55, %v419_v58  ;;  %v434_v3 = vmul.f32 %v430_v55, %v420_v59  ;;  %v435_v4 = vmul.f32 %v430_v55, %v421_v60 }
 0x22b   :  { %v436_v6 = vmul.f32 %v430_v55, %v422_v61  ;;  %v437_v7 = vmul.f32 %v430_v55, %v423_v62  ;;  %v438_v8 = vmul.f32 %v430_v55, %v424_v63  ;;  %v439_v9 = vmul.f32 %v430_v55, %v425_v0 }
 0x22c   :  { %v446_v10 = vadd.f32 %v444_v5, %v432_v1  ;;  %v447_v11 = vadd.f32 %v444_v5, %v433_v2  ;;  %v448_v12 = vadd.f32 %v444_v5, %v434_v3  ;;  %v449_v13 = vadd.f32 %v444_v5, %v435_v4 }
 0x22d   :  { %v450_v14 = vadd.f32 %v444_v5, %v436_v6  ;;  %v451_v15 = vadd.f32 %v444_v5, %v437_v7  ;;  %v452_v16 = vadd.f32 %v444_v5, %v438_v8  ;;  %v453_v17 = vadd.f32 %v444_v5, %v439_v9 }
 0x22e   :  { %vm454_vm1 = vcmp.ge.f32.partialorder %v446_v10, 0.0  ;;  %vm455_vm2 = vcmp.ge.f32.partialorder %v447_v11, 0.0  ;;  %vm456_vm3 = vcmp.ge.f32.partialorder %v448_v12, 0.0  ;;  %vm457_vm4 = vcmp.ge.f32.partialorder %v449_v13, 0.0 }
 0x22f   :  { %vm458_vm5 = vcmp.ge.f32.partialorder %v450_v14, 0.0  ;;  %vm459_vm6 = vcmp.ge.f32.partialorder %v451_v15, 0.0  ;;  %vm460_vm7 = vcmp.ge.f32.partialorder %v452_v16, 0.0  ;;  %vm461_vm8 = vcmp.ge.f32.partialorder %v453_v17, 0.0 }
 0x230   :  { %v462_v18 = vmul.f32 0.2, %v446_v10  ;;  %v463_v19 = vmul.f32 0.2, %v447_v11  ;;  %v464_v20 = vmul.f32 0.2, %v448_v12 }
 0x231   :  { %v465_v21 = vmul.f32 0.2, %v449_v13  ;;  %v466_v22 = vmul.f32 0.2, %v450_v14  ;;  %v467_v23 = vmul.f32 0.2, %v451_v15 }
 0x232   :  { %v468_v24 = vmul.f32 0.2, %v452_v16  ;;  %v469_v25 = vmul.f32 0.2, %v453_v17  ;;  %v470_v26 = vsel %vm454_vm1, %v446_v10, %v462_v18  ;;  %v471_v27 = vsel %vm455_vm2, %v447_v11, %v463_v19 }
 0x233   :  { %v472_v28 = vsel %vm456_vm3, %v448_v12, %v464_v20  ;;  %v473_v29 = vsel %vm457_vm4, %v449_v13, %v465_v21  ;;  %v474_v30 = vsel %vm458_vm5, %v450_v14, %v466_v22  ;;  %v475_v31 = vsel %vm459_vm6, %v451_v15, %v467_v23 }
 0x234   :  { %v476_v32 = vsel %vm460_vm7, %v452_v16, %v468_v24  ;;  %v477_v33 = vsel %vm461_vm8, %v453_v17, %v469_v25  ;;  %v558_v34 = vpack.c.bf16 %v471_v27, %v470_v26  ;;  %v559_v35 = vpack.c.bf16 %v473_v29, %v472_v28 }
 0x235   :  { %v560_v36 = vpack.c.bf16 %v475_v31, %v474_v30  ;;  %v561_v37 = vpack.c.bf16 %v477_v33, %v476_v32 }
 0x236   :  { %510 = vst [vmem:[%s732_s4] sm:$0xff] %v558_v34  ;;  %511 = vst [vmem:[%s732_s4 + $0x8] sm:$0xff] %v559_v35 }
 0x237   :  { %512 = vst [vmem:[%s732_s4 + $0x10] sm:$0xff] %v560_v36  ;;  %513 = vst [vmem:[%s732_s4 + $0x18] sm:$0xff] %v561_v37 }

// kernel: cnn_lstm_discriminator.7
= control target key start
LH: loop header
LB: loop body
LE: loop exit
PB: predicated region body
PF: predicated region fallthrough
CT: control target
= control target key end

     0   :  { %v313_v1 = vmov 0   ;;  %s408_s0 = inlined_call_operand.vmem [shape: bf16[128,256], index: 0, kind: input, shape index: {}]   ;;  %s409_s1 = inlined_call_operand.vmem [shape: bf16[16,128], index: 1, kind: input, shape index: {}]   ;;  %s410_s2 = inlined_call_operand.vmem [shape: f32[16,1], index: 2, kind: input, shape index: {}]   ;;  %s411_s3 = inlined_call_operand.vmem [shape: f32[16,1], index: 3, kind: input, shape index: {}]   ;;  %s412_s4 = inlined_call_operand.vmem [shape: bf16[16,256], index: 4, kind: output, shape index: {}]  }
   0x1   :  { %v284_v0 = vld [vmem:[%s408_s0 + $0x74] ss:$8 sps:$4 sm:$0xff]   ;;  %154 = vmatprep.mubr.bf16.mxu0 %v313_v1  ;;  %283 = vset.pattern.permute.xlu1 %v313_v1  ;;  %v286_v2 = vld [vmem:[%s408_s0 + $0x70] ss:$8 sps:$4 sm:$0xff]   ;;  %v287_v3 = vld [vmem:[%s408_s0 + $0x64] ss:$8 sps:$4 sm:$0xff]  }
   0x2   :  { %282 = vset.pattern.permute.xlu0 %v313_v1  ;;  %122 = vmatprep.subr.bf16.mxu0 %v284_v0  ;;  %v289_v4 = vld [vmem:[%s408_s0 + $0x60] ss:$8 sps:$4 sm:$0xff]   ;;  %v290_v5 = vld [vmem:[%s408_s0 + $0x54] ss:$8 sps:$4 sm:$0xff]   ;;  %v292_v6 = vld [vmem:[%s408_s0 + $0x50] ss:$8 sps:$4 sm:$0xff]  }
   0x3   :  { %123 = vmatpush1.bf16.msra.mxu0 %v286_v2  ;;  %v293_v7 = vld [vmem:[%s408_s0 + $0x44] ss:$8 sps:$4 sm:$0xff]   ;;  %v295_v8 = vld [vmem:[%s408_s0 + $0x40] ss:$8 sps:$4 sm:$0xff]   ;;  %v296_v9 = vld [vmem:[%s408_s0 + $0x34] ss:$8 sps:$4 sm:$0xff]  }
   0x4   :  { %124 = vmatprep.subr.bf16.mxu0 %v287_v3  ;;  %v298_v10 = vld [vmem:[%s408_s0 + $0x30] ss:$8 sps:$4 sm:$0xff]   ;;  %v299_v11 = vld [vmem:[%s408_s0 + $0x24] ss:$8 sps:$4 sm:$0xff]   ;;  %v301_v12 = vld [vmem:[%s408_s0 + $0x20] ss:$8 sps:$4 sm:$0xff]  }
   0x5   :  { %v302_v13 = vld [vmem:[%s408_s0 + $0x14] ss:$8 sps:$4 sm:$0xff]   ;;  %v304_v14 = vld [vmem:[%s408_s0 + $0x10] ss:$8 sps:$4 sm:$0xff]   ;;  %v305_v15 = vld [vmem:[%s408_s0 + $0x4] ss:$8 sps:$4 sm:$0xff]  }
   0x6   :  { %v307_v16 = vld [vmem:[%s408_s0] ss:$8 sps:$4 sm:$0xff]  }
   0x7   :  { %125 = vmatpush1.bf16.msra.mxu0 %v289_v4  ;;  %v308_v17 = vld [vmem:[%s409_s1] sm:$0xff]   ;;  %v199_v18 = vld [vmem:[%s410_s2 + $0x8] sm:$0xff] }
   0x8   :  { %126 = vmatprep.subr.bf16.mxu0 %v290_v5  ;;  %207 = vperm.xlu1 %283, %v199_v18   ;;  %v214_v19 = vld [vmem:[%s411_s3] sm:$0xff]  ;;  %v215_v41 = vld [vmem:[%s411_s3 + $0x8] sm:$0xff] }
   0x9   :  { %v198_v26 = vld [vmem:[%s410_s2] sm:$0xff] }
   0xb   :  { %127 = vmatpush1.bf16.msra.mxu0 %v292_v6 }
   0xc   :  { %128 = vmatprep.subr.bf16.mxu0 %v293_v7  ;;  %218 = vperm.xlu1 %283, %v214_v19  }
   0xf   :  { %129 = vmatpush1.bf16.msra.mxu0 %v295_v8 }
  0x10   :  { %130 = vmatprep.subr.bf16.mxu0 %v296_v9 }
  0x13   :  { %131 = vmatpush1.bf16.msra.mxu0 %v298_v10 }
  0x14   :  { %132 = vmatprep.subr.bf16.mxu0 %v299_v11 }
  0x17   :  { %133 = vmatpush1.bf16.msra.mxu0 %v301_v12 }
  0x18   :  { %134 = vmatprep.subr.bf16.mxu0 %v302_v13 }
  0x1b   :  { %135 = vmatpush1.bf16.msra.mxu0 %v304_v14 }
  0x1c   :  { %136 = vmatprep.subr.bf16.mxu0 %v305_v15 }
  0x1f   :  { %137 = vmatpush1.bf16.msra.mxu0 %v307_v16 }
  0x22   :  { %155 = vmatmul.mubr.bf16.vlgmr.msra.gmra.mxu0 %v308_v17 }
  0x83   :  { %v208_v42 = vpop.permute.xlu1 %207 }
  0x87   :  { %v219_v43 = vpop.permute.xlu1 %218 }
  0xe2   :  { %v156_v20 = vpop.f32.mrf.mxu0 }
  0xe4   :  { %v158_v21 = vpop.f32.mrf.mxu0 }
  0xe5   :  { %v165_v22 = vadd.f32 %v158_v21, %v156_v20 }
  0xe6   :  { %v160_v23 = vpop.f32.mrf.mxu0 }
  0xe7   :  { %166 = vadd.xlane.f32.xlu0 %v165_v22 }
  0xe8   :  { %v162_v24 = vpop.f32.mrf.mxu0 }
  0xe9   :  { %v168_v25 = vadd.f32 %v162_v24, %v160_v23 }
  0xeb   :  { %169 = vadd.xlane.f32.xlu0 %v168_v25 }
 0x101   :  { %202 = vperm.xlu0 %282, %v198_v26  }
 0x170   :  { %v167_v27 = vpop.xlane.xlu0 %166 }
 0x171   :  { %v172_v28 = vmul.f32 0.00390625, %v167_v27 }
 0x173   :  { %v174_v29 = vsub.f32 %v156_v20, %v172_v28  ;;  %v175_v30 = vsub.f32 %v158_v21, %v172_v28 }
 0x174   :  { %v170_v31 = vpop.xlane.xlu0 %169 }
 0x175   :  { %v173_v32 = vmul.f32 0.00390625, %v170_v31  ;;  %v178_v33 = vmul.f32 %v174_v29, %v174_v29  ;;  %v179_v34 = vmul.f32 %v175_v30, %v175_v30 }
 0x177   :  { %v176_v35 = vsub.f32 %v160_v23, %v173_v32  ;;  %v177_v36 = vsub.f32 %v162_v24, %v173_v32  ;;  %v182_v37 = vadd.f32 %v179_v34, %v178_v33 }
 0x179   :  { %183 = vadd.xlane.f32.xlu1 %v182_v37  ;;  %v180_v38 = vmul.f32 %v176_v35, %v176_v35  ;;  %v181_v39 = vmul.f32 %v177_v36, %v177_v36 }
 0x17b   :  { %v185_v40 = vadd.f32 %v181_v39, %v180_v38 }
 0x17c   :  { %v203_v51 = vpop.permute.xlu0 %202 }
 0x17d   :  { %186 = vadd.xlane.f32.xlu1 %v185_v40 }
 0x18e   :  { %223 = vperm.xlu1 %283, %v215_v41  }
 0x202   :  { %v184_v44 = vpop.xlane.xlu1 %183 }
 0x203   :  { %v188_v45 = vmul.f32 0.00390625, %v184_v44 }
 0x205   :  { %v190_v46 = vadd.f32 1e-05, %v188_v45 }
 0x206   :  { %v187_v47 = vpop.xlane.xlu1 %186 }
 0x207   :  { %309 = vrsqrt.f32 %v190_v46  ;;  %v189_v48 = vmul.f32 0.00390625, %v187_v47 }
 0x209   :  { %v191_v49 = vadd.f32 1e-05, %v189_v48 }
 0x20a   :  { %v224_v63 = vpop.permute.xlu1 %223 }
 0x20b   :  { %311 = vrsqrt.f32 %v191_v49 }
 0x214   :  { %v310_v50 = vpop.eup %309 }
 0x215   :  { %v194_v52 = vmul.f32 %v310_v50, %v174_v29  ;;  %v195_v53 = vmul.f32 %v310_v50, %v175_v30 }
 0x217   :  { %v210_v54 = vmul.f32 %v203_v51, %v194_v52  ;;  %v211_v55 = vmul.f32 %v203_v51, %v195_v53 }
 0x218   :  { %v312_v56 = vpop.eup %311 }
 0x219   :  { %v196_v57 = vmul.f32 %v312_v56, %v176_v35  ;;  %v197_v58 = vmul.f32 %v312_v56, %v177_v36  ;;  %v226_v59 = vadd.f32 %v219_v43, %v210_v54  ;;  %v227_v60 = vadd.f32 %v219_v43, %v211_v55 }
 0x21b   :  { %v212_v61 = vmul.f32 %v208_v42, %v196_v57  ;;  %v213_v62 = vmul.f32 %v208_v42, %v197_v58  ;;  %vm230_vm0 = vcmp.ge.f32.partialorder %v226_v59, 0.0  ;;  %vm231_vm1 = vcmp.ge.f32.partialorder %v227_v60, 0.0 }
 0x21c   :  { %v234_v0 = vmul.f32 0.2, %v226_v59  ;;  %v235_v1 = vmul.f32 0.2, %v227_v60 }
 0x21d   :  { %v228_v2 = vadd.f32 %v224_v63, %v212_v61  ;;  %v229_v3 = vadd.f32 %v224_v63, %v213_v62 }
 0x21e   :  { %v238_v4 = vsel %vm230_vm0, %v226_v59, %v234_v0  ;;  %v239_v5 = vsel %vm231_vm1, %v227_v60, %v235_v1 }
 0x21f   :  { %vm232_vm2 = vcmp.ge.f32.partialorder %v228_v2, 0.0  ;;  %vm233_vm3 = vcmp.ge.f32.partialorder %v229_v3, 0.0  ;;  %v236_v6 = vmul.f32 0.2, %v228_v2  ;;  %v237_v7 = vmul.f32 0.2, %v229_v3 }
 0x220   :  { %v279_v8 = vpack.c.bf16 %v239_v5, %v238_v4 }
 0x221   :  { %v240_v9 = vsel %vm232_vm2, %v228_v2, %v236_v6  ;;  %v241_v10 = vsel %vm233_vm3, %v229_v3, %v237_v7 }
 0x222   :  { %v280_v11 = vpack.c.bf16 %v241_v10, %v240_v9  ;;  %254 = vst [vmem:[%s412_s4] sm:$0xff] %v279_v8 }
 0x224   :  { %255 = vst [vmem:[%s412_s4 + $0x8] sm:$0xff] %v280_v11 }

// kernel: cnn_lstm_discriminator.8
= control target key start
LH: loop header
LB: loop body
LE: loop exit
PB: predicated region body
PF: predicated region fallthrough
CT: control target
= control target key end

     0   :  { %vm207_vm0 = vcmask 125952   ;;  %s362_s0 = inlined_call_operand.vmem [shape: bf16[256,16], index: 0, kind: input, shape index: {}]   ;;  %s363_s2 = inlined_call_operand.vmem [shape: f32[16,1], index: 2, kind: input, shape index: {}, may-alias: {2,3}]   ;;  %s364_s3 = inlined_call_operand.vmem [shape: f32[16,1], index: 3, kind: input, shape index: {}, may-alias: {2,3}]   ;;  %s365_s1 = inlined_call_operand.vmem [shape: bf16[16,256], index: 1, kind: input, shape index: {}]   ;;  %s366_s4 = inlined_call_operand.vmem [shape: bf16[16,16], index: 4, kind: output, shape index: {}]  }
   0x1   :  { %v258_v0 = vld [vmem:[%s362_s0 + $0x78] sm:$0xff]   ;;  %v260_v2 = vld [vmem:[%s362_s0 + $0x70] sm:$0xff]   ;;  %v262_v4 = vld [vmem:[%s362_s0 + $0x68] sm:$0xff]  }
   0x2   :  { %v259_v1 = vld [vmem:[%s362_s0 + $0x38] sm:$0xff]   ;;  %236 = vmatprep.subr.bf16.mxu0 %v258_v0  ;;  %v261_v3 = vld [vmem:[%s362_s0 + $0x30] sm:$0xff]   ;;  %v263_v5 = vld [vmem:[%s362_s0 + $0x28] sm:$0xff]  }
   0x3   :  { %237 = vmatpush3.bf16.msra.mxu0 %v259_v1  ;;  %v264_v6 = vld [vmem:[%s362_s0 + $0x60] sm:$0xff]   ;;  %v266_v8 = vld [vmem:[%s362_s0 + $0x58] sm:$0xff]   ;;  %v268_v10 = vld [vmem:[%s362_s0 + $0x50] sm:$0xff]  }
   0x4   :  { %238 = vmatprep.subr.bf16.mxu0 %v260_v2  ;;  %v265_v7 = vld [vmem:[%s362_s0 + $0x20] sm:$0xff]   ;;  %v267_v9 = vld [vmem:[%s362_s0 + $0x18] sm:$0xff]   ;;  %v269_v12 = vld [vmem:[%s362_s0 + $0x10] sm:$0xff]  }
   0x5   :  { %v276_v11 = vld [vmem:[%s365_s1 + $0x4] ss:$8 sps:$4 sm:$0xff]   ;;  %v274_v17 = vld [vmem:[%s365_s1] ss:$8 sps:$4 sm:$0xff]  }
   0x6   :  { %190 = vmatprep.mubr.bf16.mxu0 %v276_v11  ;;  %v270_v13 = vld [vmem:[%s362_s0 + $0x48] sm:$0xff]   ;;  %v272_v15 = vld [vmem:[%s362_s0 + $0x40] sm:$0xff]  }
   0x7   :  { %239 = vmatpush3.bf16.msra.mxu0 %v261_v3  ;;  %v271_v14 = vld [vmem:[%s362_s0 + $0x8] sm:$0xff]   ;;  %v273_v16 = vld [vmem:[%s362_s0] sm:$0xff]  }
   0x8   :  { %240 = vmatprep.subr.bf16.mxu0 %v262_v4 }
   0xb   :  { %241 = vmatpush3.bf16.msra.mxu0 %v263_v5 }
   0xc   :  { %242 = vmatprep.subr.bf16.mxu0 %v264_v6 }
   0xf   :  { %243 = vmatpush3.bf16.msra.mxu0 %v265_v7 }
  0x10   :  { %244 = vmatprep.subr.bf16.mxu0 %v266_v8 }
  0x13   :  { %245 = vmatpush3.bf16.msra.mxu0 %v267_v9 }
  0x14   :  { %246 = vmatprep.subr.bf16.mxu0 %v268_v10 }
  0x17   :  { %247 = vmatpush3.bf16.msra.mxu0 %v269_v12 }
  0x18   :  { %248 = vmatprep.subr.bf16.mxu0 %v270_v13 }
  0x1b   :  { %249 = vmatpush3.bf16.msra.mxu0 %v271_v14 }
  0x1c   :  { %250 = vmatprep.subr.bf16.mxu0 %v272_v15 }
  0x1f   :  { %251 = vmatpush3.bf16.msra.mxu0 %v273_v16 }
  0x22   :  { %191 = vmatmul.mubr.bf16.vlgmr.msra.gmra.mxu0 %v274_v17 }
  0xe2   :  { %v252_v18 = vpop.f32.mrf.mxu0 }
  0xe4   :  { %v253_v19 = vpop.f32.mrf.mxu0 }
  0xe5   :  { %v254_v20 = vadd.f32 %v253_v19, %v252_v18 }
  0xe6   :  { %v255_v21 = vpop.f32.mrf.mxu0 }
  0xe7   :  { %v234_v22 = vpack.c.bf16 %v254_v20, %v254_v20 }
  0xe8   :  { %v256_v23 = vpop.f32.mrf.mxu0 }
  0xe9   :  { %208 = vst.msk [vmem:[%s366_s4] sm:$0xf] %vm207_vm0, %v234_v22  ;;  %v257_v24 = vadd.f32 %v256_v23, %v255_v21 }
  0xeb   :  { %v235_v25 = vpack.c.bf16 %v257_v24, %v257_v24 }
  0xed   :  { %209 = vst.msk [vmem:[%s366_s4 + $0x4] sm:$0xf] %vm207_vm0, %v235_v25 }

// kernel: cnn_lstm_discriminator.9
= control target key start
LH: loop header
LB: loop body
LE: loop exit
PB: predicated region body
PF: predicated region fallthrough
CT: control target
= control target key end

     0   :  { %v6961_v1 = vmov 0   ;;  %v6962_v2 = vmov 0.0   ;;  %vm87_vm0 = vcmask 130048   ;;  %v42_v41 = vlaneseq  ;;  %s8389_s1 = inlined_call_operand.vmem [shape: bf16[16,512], index: 1, kind: input, shape index: {}]   ;;  %s8390_s2 = inlined_call_operand.vmem [shape: bf16[128,512], index: 2, kind: input, shape index: {}]   ;;  %s8391_s0 = inlined_call_operand.vmem [shape: bf16[16,16], index: 0, kind: input, shape index: {}]   ;;  %s8392_s3 = inlined_call_operand.vmem [shape: f32[1,512], index: 3, kind: input, shape index: {}]   ;;  %s8393_s4 = inlined_call_operand.vmem [shape: bf16[128,512], index: 4, kind: input, shape index: {}]   ;;  %s8394_s5 = inlined_call_operand.vmem [shape: bf16[128,512], index: 5, kind: input, shape index: {}]   ;;  %s8395_s6 = inlined_call_operand.vmem [shape: f32[1,512], index: 6, kind: input, shape index: {}]   ;;  %s8396_s7 = inlined_call_operand.vmem [shape: bf16[128,1], index: 7, kind: input, shape index: {}]   ;;  %s8397_s8 = inlined_call_operand.<no memory space> [shape: f32[1,1], index: 8, kind: input, shape index: {}]   ;;  %s8398_s9 = inlined_call_operand.vmem [shape: f32[16,1], index: 9, kind: output, shape index: {}]  }
   0x1   :  { %v6442_v0 = vld [vmem:[%s8389_s1 + $0x4] ss:$16 sps:$4 sm:$0xff]   ;;  %123 = vmatprep.mubr.bf16.mxu1 %v6961_v1  ;;  %417 = vmatprep.mubr.bf16.mxu0 %v6961_v1  ;;  %185 = vst [vmem:[#allocation5] sm:$0x3] %v6962_v2  ;;  %186 = vst [vmem:[#allocation6] sm:$0x3] %v6962_v2 }
   0x2   :  { %v7024_v3 = vld [vmem:[%s8390_s2 + $0xe4] ss:$16 sps:$4 sm:$0xff]   ;;  %105 = vmatprep.subr.bf16.mxu1 %v6442_v0  ;;  %v6446_v4 = vld [vmem:[%s8389_s1] ss:$16 sps:$4 sm:$0xff]   ;;  %v6452_v9 = vld [vmem:[%s8389_s1 + $0x8] ss:$16 sps:$4 sm:$0xff]  }
   0x3   :  { %v7032_v5 = vld [vmem:[%s8390_s2 + $0xe0] ss:$16 sps:$4 sm:$0xff]   ;;  %385 = vmatprep.subr.bf16.mxu0 %v7024_v3  ;;  %106 = vmatpush1.bf16.msra.mxu1 %v6446_v4  ;;  %v7042_v7 = vld [vmem:[%s8390_s2 + $0xc4] ss:$16 sps:$4 sm:$0xff]   ;;  %v6454_v10 = vld [vmem:[%s8389_s1 + $0xc] ss:$16 sps:$4 sm:$0xff]  }
   0x4   :  { %v6448_v6 = vld [vmem:[%s8391_s0] sm:$0xff]   ;;  %386 = vmatpush1.bf16.msra.mxu0 %v7032_v5  ;;  %148 = vmatprep.subr.bf16.mxu1 %v6454_v10  ;;  %v7071_v13 = vld [vmem:[%s8390_s2 + $0xec] ss:$16 sps:$4 sm:$0xff]   ;;  %v7084_v15 = vld [vmem:[%s8390_s2 + $0xe8] ss:$16 sps:$4 sm:$0xff]   ;;  %v7265_v42 = vshrl.u32 %v42_v41, 7 }
   0x5   :  { %v7047_v8 = vld [vmem:[%s8390_s2 + $0xc0] ss:$16 sps:$4 sm:$0xff]   ;;  %387 = vmatprep.subr.bf16.mxu0 %v7042_v7  ;;  %v7060_v11 = vld [vmem:[%s8390_s2 + $0xa4] ss:$16 sps:$4 sm:$0xff]   ;;  %v7095_v17 = vld [vmem:[%s8390_s2 + $0xcc] ss:$16 sps:$4 sm:$0xff]  }
   0x6   :  { %5806 = vmatmul.mubr.msk.bf16.vlgmr.msra.gmra.mxu1 %vm87_vm0, %v6448_v6  ;;  %v7066_v12 = vld [vmem:[%s8390_s2 + $0xa0] ss:$16 sps:$4 sm:$0xff]   ;;  %v7077_v14 = vld [vmem:[%s8390_s2 + $0x84] ss:$16 sps:$4 sm:$0xff]   ;;  %v7107_v19 = vld [vmem:[%s8390_s2 + $0xc8] ss:$16 sps:$4 sm:$0xff]  }
   0x7   :  { %149 = vmatpush1.bf16.msra.mxu1 %v6452_v9  ;;  %166 = vmatprep.mubr.bf16.mxu1 %v6961_v1  ;;  %v7090_v16 = vld [vmem:[%s8390_s2 + $0x80] ss:$16 sps:$4 sm:$0xff]   ;;  %v7101_v18 = vld [vmem:[%s8390_s2 + $0x64] ss:$16 sps:$4 sm:$0xff]   ;;  %v7119_v21 = vld [vmem:[%s8390_s2 + $0xac] ss:$16 sps:$4 sm:$0xff]  }
   0x8   :  { %388 = vmatpush1.bf16.msra.mxu0 %v7047_v8  ;;  %426 = vmatprep.subr.bf16.mxu1 %v7071_v13  ;;  %v7114_v20 = vld [vmem:[%s8390_s2 + $0x60] ss:$16 sps:$4 sm:$0xff]   ;;  %v7126_v22 = vld [vmem:[%s8390_s2 + $0x44] ss:$16 sps:$4 sm:$0xff]   ;;  %v7132_v23 = vld [vmem:[%s8390_s2 + $0xa8] ss:$16 sps:$4 sm:$0xff]  }
   0x9   :  { %389 = vmatprep.subr.bf16.mxu0 %v7060_v11  ;;  %v7139_v24 = vld [vmem:[%s8390_s2 + $0x40] ss:$16 sps:$4 sm:$0xff]   ;;  %v7144_v25 = vld [vmem:[%s8390_s2 + $0x8c] ss:$16 sps:$4 sm:$0xff]   ;;  %v7151_v26 = vld [vmem:[%s8390_s2 + $0x24] ss:$16 sps:$4 sm:$0xff]  }
   0xa   :  { %v7156_v27 = vld [vmem:[%s8390_s2 + $0x88] ss:$16 sps:$4 sm:$0xff]   ;;  %v7163_v28 = vld [vmem:[%s8390_s2 + $0x20] ss:$16 sps:$4 sm:$0xff]   ;;  %v7170_v29 = vld [vmem:[%s8390_s2 + $0x6c] ss:$16 sps:$4 sm:$0xff]  }
   0xb   :  { %v7175_v30 = vld [vmem:[%s8390_s2 + $0x4] ss:$16 sps:$4 sm:$0xff]   ;;  %v7180_v31 = vld [vmem:[%s8390_s2 + $0x68] ss:$16 sps:$4 sm:$0xff]   ;;  %v7185_v32 = vld [vmem:[%s8390_s2] ss:$16 sps:$4 sm:$0xff]  }
   0xc   :  { %390 = vmatpush1.bf16.msra.mxu0 %v7066_v12  ;;  %v191_v33 = vld [vmem:[#allocation5] sm:$0x3]  ;;  %v7190_v34 = vld [vmem:[%s8390_s2 + $0x4c] ss:$16 sps:$4 sm:$0xff]   ;;  %v7199_v35 = vld [vmem:[%s8390_s2 + $0x48] ss:$16 sps:$4 sm:$0xff]  }
   0xd   :  { %391 = vmatprep.subr.bf16.mxu0 %v7077_v14  ;;  %v192_v36 = vpack.c.bf16 %v191_v33, %v191_v33  ;;  %v7204_v37 = vld [vmem:[%s8390_s2 + $0x2c] ss:$16 sps:$4 sm:$0xff]   ;;  %v7214_v38 = vld [vmem:[%s8390_s2 + $0x28] ss:$16 sps:$4 sm:$0xff]   ;;  %v44_v43 = vsub.s32 0, %v7265_v42  ;;  %v48_v45 = vsub.s32 1, %v7265_v42 }
   0xe   :  { %5807 = vmatmul.mubr.msk.bf16.vlgmr.msra.gmra.mxu1 %vm87_vm0, %v6448_v6  ;;  %v7221_v39 = vld [vmem:[%s8390_s2 + $0xc] ss:$16 sps:$4 sm:$0xff]   ;;  %v7229_v40 = vld [vmem:[%s8390_s2 + $0x8] ss:$16 sps:$4 sm:$0xff]   ;;  %v40_v44 = vld [vmem:[%s8392_s3] sm:$0xf] }
   0xf   :  { %427 = vmatpush1.bf16.msra.mxu1 %v7084_v15  ;;  %458 = vmatprep.mubr.bf16.mxu1 %v6961_v1  ;;  %v45_v46 = vrot.slane %v40_v44, %v44_v43  ;;  %v49_v47 = vrot.slane %v40_v44, %v48_v45  ;;  %v52_v50 = vsub.s32 2, %v7265_v42  ;;  %v56_v53 = vsub.s32 3, %v7265_v42 }
  0x10   :  { %392 = vmatpush1.bf16.msra.mxu0 %v7090_v16  ;;  %428 = vmatprep.subr.bf16.mxu1 %v7095_v17  ;;  %vm6963_vm1 = vmmov 0   ;;  %vm5794_vm2 = vcmask 7168  }
  0x11   :  { %393 = vmatprep.subr.bf16.mxu0 %v7101_v18  ;;  %v53_v56 = vrot.slane %v40_v44, %v52_v50  ;;  %v57_v59 = vrot.slane %v40_v44, %v56_v53 }
  0x13   :  { %429 = vmatpush1.bf16.msra.mxu1 %v7107_v19 }
  0x14   :  { %394 = vmatpush1.bf16.msra.mxu0 %v7114_v20  ;;  %430 = vmatprep.subr.bf16.mxu1 %v7119_v21 }
  0x15   :  { %395 = vmatprep.subr.bf16.mxu0 %v7126_v22 }
  0x17   :  { %431 = vmatpush1.bf16.msra.mxu1 %v7132_v23 }
  0x18   :  { %396 = vmatpush1.bf16.msra.mxu0 %v7139_v24  ;;  %432 = vmatprep.subr.bf16.mxu1 %v7144_v25 }
  0x19   :  { %397 = vmatprep.subr.bf16.mxu0 %v7151_v26 }
  0x1b   :  { %433 = vmatpush1.bf16.msra.mxu1 %v7156_v27 }
  0x1c   :  { %398 = vmatpush1.bf16.msra.mxu0 %v7163_v28  ;;  %434 = vmatprep.subr.bf16.mxu1 %v7170_v29 }
  0x1d   :  { %399 = vmatprep.subr.bf16.mxu0 %v7175_v30 }
  0x1f   :  { %435 = vmatpush1.bf16.msra.mxu1 %v7180_v31 }
  0x20   :  { %400 = vmatpush1.bf16.msra.mxu0 %v7185_v32  ;;  %436 = vmatprep.subr.bf16.mxu1 %v7190_v34 }
  0x21   :  { %697 = vmatprep.subr.bf16.mxu0 %v7024_v3 }
  0x23   :  { %418 = vmatmul.mubr.bf16.vlgmr.msra.gmra.mxu0 %v192_v36  ;;  %437 = vmatpush1.bf16.msra.mxu1 %v7199_v35 }
  0x24   :  { %698 = vmatpush1.bf16.msra.mxu0 %v7032_v5  ;;  %438 = vmatprep.subr.bf16.mxu1 %v7204_v37 }
  0x25   :  { %699 = vmatprep.subr.bf16.mxu0 %v7042_v7  ;;  %729 = vmatprep.mubr.bf16.mxu0 %v6961_v1 }
  0x27   :  { %439 = vmatpush1.bf16.msra.mxu1 %v7214_v38 }
  0x28   :  { %700 = vmatpush1.bf16.msra.mxu0 %v7047_v8  ;;  %440 = vmatprep.subr.bf16.mxu1 %v7221_v39 }
  0x29   :  { %701 = vmatprep.subr.bf16.mxu0 %v7060_v11 }
  0x2b   :  { %441 = vmatpush1.bf16.msra.mxu1 %v7229_v40 }
  0x2c   :  { %702 = vmatpush1.bf16.msra.mxu0 %v7066_v12  ;;  %738 = vmatprep.subr.bf16.mxu1 %v7071_v13 }
  0x2d   :  { %703 = vmatprep.subr.bf16.mxu0 %v7077_v14 }
  0x2e   :  { %459 = vmatmul.mubr.bf16.vlgmr.msra.gmra.mxu1 %v192_v36 }
  0x2f   :  { %739 = vmatpush1.bf16.msra.mxu1 %v7084_v15  ;;  %770 = vmatprep.mubr.bf16.mxu1 %v6961_v1 }
  0x30   :  { %704 = vmatpush1.bf16.msra.mxu0 %v7090_v16  ;;  %740 = vmatprep.subr.bf16.mxu1 %v7095_v17 }
  0x31   :  { %705 = vmatprep.subr.bf16.mxu0 %v7101_v18 }
  0x33   :  { %741 = vmatpush1.bf16.msra.mxu1 %v7107_v19 }
  0x34   :  { %706 = vmatpush1.bf16.msra.mxu0 %v7114_v20  ;;  %742 = vmatprep.subr.bf16.mxu1 %v7119_v21 }
  0x35   :  { %707 = vmatprep.subr.bf16.mxu0 %v7126_v22 }
  0x37   :  { %743 = vmatpush1.bf16.msra.mxu1 %v7132_v23 }
  0x38   :  { %708 = vmatpush1.bf16.msra.mxu0 %v7139_v24  ;;  %744 = vmatprep.subr.bf16.mxu1 %v7144_v25 }
  0x39   :  { %709 = vmatprep.subr.bf16.mxu0 %v7151_v26 }
  0x3b   :  { %745 = vmatpush1.bf16.msra.mxu1 %v7156_v27 }
  0x3c   :  { %710 = vmatpush1.bf16.msra.mxu0 %v7163_v28  ;;  %746 = vmatprep.subr.bf16.mxu1 %v7170_v29 }
  0x3d   :  { %711 = vmatprep.subr.bf16.mxu0 %v7175_v30 }
  0x3f   :  { %747 = vmatpush1.bf16.msra.mxu1 %v7180_v31 }
  0x40   :  { %712 = vmatpush1.bf16.msra.mxu0 %v7185_v32  ;;  %748 = vmatprep.subr.bf16.mxu1 %v7190_v34 }
  0x41   :  { %1024 = vmatprep.subr.bf16.mxu0 %v7024_v3 }
  0x43   :  { %749 = vmatpush1.bf16.msra.mxu1 %v7199_v35 }
  0x44   :  { %750 = vmatprep.subr.bf16.mxu1 %v7204_v37 }
  0x47   :  { %751 = vmatpush1.bf16.msra.mxu1 %v7214_v38 }
  0x48   :  { %752 = vmatprep.subr.bf16.mxu1 %v7221_v39 }
  0x4b   :  { %753 = vmatpush1.bf16.msra.mxu1 %v7229_v40 }
  0x4c   :  { %1065 = vmatprep.subr.bf16.mxu1 %v7071_v13 }
  0xc6   :  { %v125_v48 = vpop.f32.mrf.mxu1 }
  0xc7   :  { %v126_v49 = vadd.f32 %v125_v48, %v45_v46 }
  0xc8   :  { %v127_v51 = vpop.f32.mrf.mxu1 }
  0xc9   :  { %177 = vst [vmem:[#allocation2 + $0x30] sm:$0xff] %v126_v49  ;;  %v128_v52 = vadd.f32 %v127_v51, %v49_v47 }
  0xca   :  { %v129_v54 = vpop.f32.mrf.mxu1 }
  0xcb   :  { %178 = vst [vmem:[#allocation2] sm:$0xff] %v128_v52  ;;  %v130_v55 = vadd.f32 %v129_v54, %v45_v46 }
  0xcc   :  { %v131_v57 = vpop.f32.mrf.mxu1 }
  0xcd   :  { %181 = vst [vmem:[#allocation2 + $0x8] sm:$0xff] %v130_v55  ;;  %v132_v58 = vadd.f32 %v131_v57, %v49_v47 }
  0xce   :  { %v168_v60 = vpop.f32.mrf.mxu1 }
  0xcf   :  { %182 = vst [vmem:[#allocation2 + $0x20] sm:$0xff] %v132_v58  ;;  %v169_v61 = vadd.f32 %v168_v60, %v53_v56 }
  0xd0   :  { %v170_v62 = vpop.f32.mrf.mxu1  ;;  %v187_v10 = vld [vmem:[#allocation2 + $0x30] sm:$0x3] }
  0xd1   :  { %179 = vst [vmem:[#allocation2 + $0x18] sm:$0xff] %v169_v61  ;;  %v171_v63 = vadd.f32 %v170_v62, %v57_v59 }
  0xd2   :  { %v172_v0 = vpop.f32.mrf.mxu1  ;;  %v188_v41 = vld [vmem:[#allocation2] sm:$0x3] }
  0xd3   :  { %180 = vst [vmem:[#allocation2 + $0x10] sm:$0xff] %v171_v63  ;;  %v173_v4 = vadd.f32 %v172_v0, %v53_v56 }
  0xd4   :  { %v174_v6 = vpop.f32.mrf.mxu1 }
  0xd5   :  { %183 = vst [vmem:[#allocation2 + $0x28] sm:$0xff] %v173_v4  ;;  %v175_v9 = vadd.f32 %v174_v6, %v57_v59 }
  0xd7   :  { %184 = vst [vmem:[#allocation2 + $0x38] sm:$0xff] %v175_v9 }
  0xd8   :  { %v189_v58 = vld [vmem:[#allocation2 + $0x18] sm:$0x3] }
  0xda   :  { %v190_v54 = vld [vmem:[#allocation2 + $0x10] sm:$0x3] }
  0xe3   :  { %v419_v33 = vpop.f32.mrf.mxu0 }
  0xe4   :  { %v467_v36 = vadd.f32 %v419_v33, %v187_v10  ;;  %v490_v10 = vld [vmem:[#allocation6] sm:$0x3] }
  0xe5   :  { %v421_v46 = vpop.f32.mrf.mxu0 }
  0xe6   :  { %v5840_v47 = vmul.f32 -1.442695, %v467_v36  ;;  %v468_v44 = vadd.f32 %v421_v46, %v188_v41 }
  0xe7   :  { %v423_v48 = vpop.f32.mrf.mxu0 }
  0xe8   :  { %6697 = vpow2.f32 %v5840_v47  ;;  %v5841_v49 = vmul.f32 -1.442695, %v468_v44 }
  0xe9   :  { %v424_v51 = vpop.f32.mrf.mxu0 }
  0xea   :  { %6699 = vpow2.f32 %v5841_v49 }
  0xee   :  { %v460_v52 = vpop.f32.mrf.mxu1 }
  0xef   :  { %v469_v61 = vadd.f32 %v460_v52, %v189_v58  ;;  %v499_v58 = vld [vmem:[#allocation2 + $0x30] sm:$0xc] }
  0xf0   :  { %v462_v55 = vpop.f32.mrf.mxu1 }
  0xf1   :  { %v470_v56 = vadd.f32 %v462_v55, %v190_v54 }
  0xf2   :  { %v464_v57 = vpop.f32.mrf.mxu1 }
  0xf3   :  { %v5842_v59 = vmul.f32 -1.442695, %v470_v56 }
  0xf4   :  { %v465_v62 = vpop.f32.mrf.mxu1 }
  0xf5   :  { %v6698_v60 = vpop.eup %6697  ;;  %6701 = vpow2.f32 %v5842_v59 }
  0xf6   :  { %v474_v63 = vadd.f32 1.0, %v6698_v60 }
  0xf7   :  { %v6700_v0 = vpop.eup %6699 }
  0xf8   :  { %6703 = vrcp.f32 %v474_v63  ;;  %v480_v4 = vadd.f32 1.0, %v6700_v0  ;;  %v500_v63 = vld [vmem:[#allocation2] sm:$0xc] }
  0xf9   :  { %6705 = vtanh.f32 %v469_v61 }
  0xfa   :  { %6707 = vrcp.f32 %v480_v4 }
 0x102   :  { %v6702_v6 = vpop.eup %6701 }
 0x103   :  { %v487_v41 = vadd.f32 1.0, %v6702_v6 }
 0x105   :  { %v6704_v9 = vpop.eup %6703  ;;  %6709 = vrcp.f32 %v487_v41 }
 0x106   :  { %v6706_v33 = vpop.eup %6705 }
 0x107   :  { %v6708_v36 = vpop.eup %6707  ;;  %v492_v47 = vmul.f32 %v6706_v33, %v6704_v9 }
 0x108   :  { %v491_v46 = vmul.f32 %v6708_v36, %v490_v10 }
 0x10a   :  { %v493_v44 = vadd.f32 %v492_v47, %v491_v46 }
 0x10c   :  { %6711 = vtanh.f32 %v493_v44  ;;  %496 = vst [vmem:[#allocation6] sm:$0x3] %v493_v44  ;;  %v501_v44 = vld [vmem:[#allocation2 + $0x18] sm:$0xc] }
 0x112   :  { %v6710_v48 = vpop.eup %6709 }
 0x119   :  { %v6712_v49 = vpop.eup %6711 }
 0x11a   :  { %v495_v51 = vmul.f32 %v6712_v49, %v6710_v48 }
 0x11c   :  { %497 = vst [vmem:[#allocation5] sm:$0x3] %v495_v51  ;;  %498 = vst [vmem:[#allocation3] sm:$0x3] %v495_v51 }
 0x123   :  { %v503_v52 = vld [vmem:[#allocation5] sm:$0x3] }
 0x124   :  { %v504_v54 = vpack.c.bf16 %v503_v52, %v503_v52 }
 0x126   :  { %730 = vmatmul.mubr.bf16.vlgmr.msra.gmra.mxu0 %v504_v54  ;;  %771 = vmatmul.mubr.bf16.vlgmr.msra.gmra.mxu1 %v504_v54 }
 0x127   :  { %1025 = vmatpush1.bf16.msra.mxu0 %v7032_v5  ;;  %1066 = vmatpush1.bf16.msra.mxu1 %v7084_v15 }
 0x128   :  { %1026 = vmatprep.subr.bf16.mxu0 %v7042_v7  ;;  %1067 = vmatprep.subr.bf16.mxu1 %v7095_v17 }
 0x129   :  { %1056 = vmatprep.mubr.bf16.mxu0 %v6961_v1  ;;  %1097 = vmatprep.mubr.bf16.mxu1 %v6961_v1 }
 0x12b   :  { %1027 = vmatpush1.bf16.msra.mxu0 %v7047_v8  ;;  %1068 = vmatpush1.bf16.msra.mxu1 %v7107_v19 }
 0x12c   :  { %1028 = vmatprep.subr.bf16.mxu0 %v7060_v11  ;;  %1069 = vmatprep.subr.bf16.mxu1 %v7119_v21 }
 0x12f   :  { %1029 = vmatpush1.bf16.msra.mxu0 %v7066_v12  ;;  %1070 = vmatpush1.bf16.msra.mxu1 %v7132_v23 }
 0x130   :  { %1030 = vmatprep.subr.bf16.mxu0 %v7077_v14  ;;  %1071 = vmatprep.subr.bf16.mxu1 %v7144_v25 }
 0x133   :  { %1031 = vmatpush1.bf16.msra.mxu0 %v7090_v16  ;;  %1072 = vmatpush1.bf16.msra.mxu1 %v7156_v27 }
 0x134   :  { %1032 = vmatprep.subr.bf16.mxu0 %v7101_v18  ;;  %1073 = vmatprep.subr.bf16.mxu1 %v7170_v29 }
 0x137   :  { %1033 = vmatpush1.bf16.msra.mxu0 %v7114_v20  ;;  %1074 = vmatpush1.bf16.msra.mxu1 %v7180_v31 }
 0x138   :  { %1034 = vmatprep.subr.bf16.mxu0 %v7126_v22  ;;  %1075 = vmatprep.subr.bf16.mxu1 %v7190_v34 }
 0x13b   :  { %1035 = vmatpush1.bf16.msra.mxu0 %v7139_v24  ;;  %1076 = vmatpush1.bf16.msra.mxu1 %v7199_v35 }
 0x13c   :  { %1036 = vmatprep.subr.bf16.mxu0 %v7151_v26  ;;  %1077 = vmatprep.subr.bf16.mxu1 %v7204_v37 }
 0x13f   :  { %1037 = vmatpush1.bf16.msra.mxu0 %v7163_v28  ;;  %1078 = vmatpush1.bf16.msra.mxu1 %v7214_v38 }
 0x140   :  { %1038 = vmatprep.subr.bf16.mxu0 %v7175_v30  ;;  %1079 = vmatprep.subr.bf16.mxu1 %v7221_v39 }
 0x143   :  { %1039 = vmatpush1.bf16.msra.mxu0 %v7185_v32  ;;  %1080 = vmatpush1.bf16.msra.mxu1 %v7229_v40 }
 0x144   :  { %1351 = vmatprep.subr.bf16.mxu0 %v7024_v3  ;;  %1392 = vmatprep.subr.bf16.mxu1 %v7071_v13  ;;  %v502_v13 = vld [vmem:[#allocation2 + $0x10] sm:$0xc] }
 0x1e6   :  { %v731_v55 = vpop.f32.mrf.mxu0  ;;  %v772_v56 = vpop.f32.mrf.mxu1 }
 0x1e7   :  { %v783_v57 = vrot.slane %v731_v55, 6  ;;  %v785_v46 = vrot.slane %v772_v56, 6  ;;  %v814_v55 = vld [vmem:[#allocation6] sm:$0x3] }
 0x1e8   :  { %v733_v59 = vpop.f32.mrf.mxu0  ;;  %v774_v60 = vpop.f32.mrf.mxu1 }
 0x1e9   :  { %v791_v61 = vadd.f32 %v783_v57, %v499_v58  ;;  %v784_v62 = vrot.slane %v733_v59, 6  ;;  %v786_v3 = vrot.slane %v774_v60, 6  ;;  %v793_v49 = vadd.f32 %v785_v46, %v501_v44 }
 0x1ea   :  { %v735_v0 = vpop.f32.mrf.mxu0  ;;  %v776_v4 = vpop.f32.mrf.mxu1 }
 0x1eb   :  { %v5875_v6 = vmul.f32 -1.442695, %v791_v61  ;;  %v792_v9 = vadd.f32 %v784_v62, %v500_v63  ;;  %v794_v41 = vadd.f32 %v786_v3, %v502_v13  ;;  %v816_v61 = vrot.slane %v814_v55, 6  ;;  %v7353_v55 = vld [vmem:[%s8390_s2 + $0xe4] ss:$16 sps:$4 sm:$0xff]  }
 0x1ec   :  { %v736_v10 = vpop.f32.mrf.mxu0  ;;  %v777_v33 = vpop.f32.mrf.mxu1 }
 0x1ed   :  { %6713 = vpow2.f32 %v5875_v6  ;;  %v5876_v36 = vmul.f32 -1.442695, %v792_v9  ;;  %v5877_v47 = vmul.f32 -1.442695, %v794_v41 }
 0x1ef   :  { %6715 = vpow2.f32 %v5876_v36 }
 0x1f0   :  { %6717 = vpow2.f32 %v5877_v47 }
 0x1fa   :  { %v6714_v48 = vpop.eup %6713 }
 0x1fb   :  { %v798_v51 = vadd.f32 1.0, %v6714_v48 }
 0x1fc   :  { %v6716_v52 = vpop.eup %6715 }
 0x1fd   :  { %6719 = vrcp.f32 %v798_v51  ;;  %v804_v54 = vadd.f32 1.0, %v6716_v52  ;;  %v6718_v57 = vpop.eup %6717 }
 0x1fe   :  { %6721 = vtanh.f32 %v793_v49  ;;  %v811_v62 = vadd.f32 1.0, %v6718_v57  ;;  %v7358_v57 = vld [vmem:[%s8390_s2 + $0xec] ss:$16 sps:$4 sm:$0xff]  }
 0x1ff   :  { %6723 = vrcp.f32 %v804_v54 }
 0x200   :  { %6725 = vrcp.f32 %v811_v62  ;;  %v7387_v62 = vld [vmem:[%s8390_s2 + $0xc0] ss:$16 sps:$4 sm:$0xff]  }
 0x20a   :  { %v6720_v58 = vpop.eup %6719 }
 0x20b   :  { %v6722_v59 = vpop.eup %6721 }
 0x20c   :  { %v6724_v60 = vpop.eup %6723  ;;  %v819_v63 = vmul.f32 %v6722_v59, %v6720_v58  ;;  %v7363_v58 = vld [vmem:[%s8390_s2 + $0xe0] ss:$16 sps:$4 sm:$0xff]   ;;  %v7368_v59 = vld [vmem:[%s8390_s2 + $0xe8] ss:$16 sps:$4 sm:$0xff]  }
 0x20d   :  { %v818_v56 = vmul.f32 %v6724_v60, %v816_v61  ;;  %v6726_v4 = vpop.eup %6725  ;;  %v7377_v61 = vld [vmem:[%s8390_s2 + $0xc4] ss:$16 sps:$4 sm:$0xff]   ;;  %v7382_v60 = vld [vmem:[%s8390_s2 + $0xcc] ss:$16 sps:$4 sm:$0xff]  }
 0x20f   :  { %v820_v0 = vadd.f32 %v819_v63, %v818_v56  ;;  %v7392_v63 = vld [vmem:[%s8390_s2 + $0xc8] ss:$16 sps:$4 sm:$0xff]   ;;  %v7401_v56 = vld [vmem:[%s8390_s2 + $0xa4] ss:$16 sps:$4 sm:$0xff]  }
 0x211   :  { %6727 = vtanh.f32 %v820_v0  ;;  %823 = vst [vmem:[#allocation6 - $0x2] sm:$0xc] %v820_v0  ;;  %v7406_v0 = vld [vmem:[%s8390_s2 + $0xac] ss:$16 sps:$4 sm:$0xff]  }
 0x21e   :  { %v6728_v6 = vpop.eup %6727 }
 0x21f   :  { %v822_v9 = vmul.f32 %v6728_v6, %v6726_v4  ;;  %v7411_v4 = vld [vmem:[%s8390_s2 + $0xa0] ss:$16 sps:$4 sm:$0xff]   ;;  %v7416_v6 = vld [vmem:[%s8390_s2 + $0xa8] ss:$16 sps:$4 sm:$0xff]  }
 0x221   :  { %824 = vst [vmem:[#allocation5 - $0x2] sm:$0xc] %v822_v9  ;;  %825 = vst [vmem:[#allocation3] sm:$0xc] %v822_v9  ;;  %v7425_v9 = vld [vmem:[%s8390_s2 + $0x84] ss:$16 sps:$4 sm:$0xff]  }
 0x228   :  { %v830_v10 = vld [vmem:[#allocation5] sm:$0x3] }
 0x229   :  { %v831_v33 = vpack.c.bf16 %v830_v10, %v830_v10  ;;  %v7430_v10 = vld [vmem:[%s8390_s2 + $0x8c] ss:$16 sps:$4 sm:$0xff]  }
 0x22b   :  { %1057 = vmatmul.mubr.bf16.vlgmr.msra.gmra.mxu0 %v831_v33  ;;  %1098 = vmatmul.mubr.bf16.vlgmr.msra.gmra.mxu1 %v831_v33  ;;  %v7435_v33 = vld [vmem:[%s8390_s2 + $0x80] ss:$16 sps:$4 sm:$0xff]  }
 0x22c   :  { %1352 = vmatpush1.bf16.msra.mxu0 %v7032_v5  ;;  %1393 = vmatpush1.bf16.msra.mxu1 %v7084_v15 }
 0x22d   :  { %1353 = vmatprep.subr.bf16.mxu0 %v7042_v7  ;;  %1394 = vmatprep.subr.bf16.mxu1 %v7095_v17  ;;  %v827_v17 = vld [vmem:[#allocation2] sm:$0x30] }
 0x22e   :  { %1383 = vmatprep.mubr.bf16.mxu0 %v6961_v1  ;;  %1424 = vmatprep.mubr.bf16.mxu1 %v6961_v1 }
 0x230   :  { %1354 = vmatpush1.bf16.msra.mxu0 %v7047_v8  ;;  %1395 = vmatpush1.bf16.msra.mxu1 %v7107_v19 }
 0x231   :  { %1355 = vmatprep.subr.bf16.mxu0 %v7060_v11  ;;  %1396 = vmatprep.subr.bf16.mxu1 %v7119_v21  ;;  %v826_v11 = vld [vmem:[#allocation2 + $0x30] sm:$0x30] }
 0x234   :  { %1356 = vmatpush1.bf16.msra.mxu0 %v7066_v12  ;;  %1397 = vmatpush1.bf16.msra.mxu1 %v7132_v23 }
 0x235   :  { %1357 = vmatprep.subr.bf16.mxu0 %v7077_v14  ;;  %1398 = vmatprep.subr.bf16.mxu1 %v7144_v25 }
 0x238   :  { %1358 = vmatpush1.bf16.msra.mxu0 %v7090_v16  ;;  %1399 = vmatpush1.bf16.msra.mxu1 %v7156_v27 }
 0x239   :  { %1359 = vmatprep.subr.bf16.mxu0 %v7101_v18  ;;  %1400 = vmatprep.subr.bf16.mxu1 %v7170_v29 }
 0x23c   :  { %1360 = vmatpush1.bf16.msra.mxu0 %v7114_v20  ;;  %1401 = vmatpush1.bf16.msra.mxu1 %v7180_v31 }
 0x23d   :  { %1361 = vmatprep.subr.bf16.mxu0 %v7126_v22  ;;  %1402 = vmatprep.subr.bf16.mxu1 %v7190_v34 }
 0x240   :  { %1362 = vmatpush1.bf16.msra.mxu0 %v7139_v24  ;;  %1403 = vmatpush1.bf16.msra.mxu1 %v7199_v35 }
 0x241   :  { %1363 = vmatprep.subr.bf16.mxu0 %v7151_v26  ;;  %1404 = vmatprep.subr.bf16.mxu1 %v7204_v37  ;;  %v829_v26 = vld [vmem:[#allocation2 + $0x10] sm:$0x30] }
 0x244   :  { %1364 = vmatpush1.bf16.msra.mxu0 %v7163_v28  ;;  %1405 = vmatpush1.bf16.msra.mxu1 %v7214_v38  ;;  %v1141_v38 = vld [vmem:[#allocation6] sm:$0x3] }
 0x245   :  { %1365 = vmatprep.subr.bf16.mxu0 %v7175_v30  ;;  %1406 = vmatprep.subr.bf16.mxu1 %v7221_v39  ;;  %v828_v30 = vld [vmem:[#allocation2 + $0x18] sm:$0x30]  ;;  %v1143_v3 = vrot.slane %v1141_v38, 4 }
 0x248   :  { %1366 = vmatpush1.bf16.msra.mxu0 %v7185_v32  ;;  %1407 = vmatpush1.bf16.msra.mxu1 %v7229_v40 }
 0x249   :  { %1678 = vmatprep.subr.bf16.mxu0 %v7353_v55  ;;  %1719 = vmatprep.subr.bf16.mxu1 %v7358_v57 }
 0x2eb   :  { %v1058_v5 = vpop.f32.mrf.mxu0  ;;  %v1099_v7 = vpop.f32.mrf.mxu1 }
 0x2ec   :  { %v1110_v8 = vrot.slane %v1058_v5, 4  ;;  %v1112_v28 = vrot.slane %v1099_v7, 4  ;;  %v7440_v5 = vld [vmem:[%s8390_s2 + $0x88] ss:$16 sps:$4 sm:$0xff]   ;;  %v7449_v7 = vld [vmem:[%s8390_s2 + $0x64] ss:$16 sps:$4 sm:$0xff]  }
 0x2ed   :  { %v1060_v12 = vpop.f32.mrf.mxu0  ;;  %v1101_v14 = vpop.f32.mrf.mxu1 }
 0x2ee   :  { %v1118_v15 = vadd.f32 %v1110_v8, %v826_v11  ;;  %v1111_v16 = vrot.slane %v1060_v12, 4  ;;  %v1113_v25 = vrot.slane %v1101_v14, 4  ;;  %v1120_v32 = vadd.f32 %v1112_v28, %v828_v30  ;;  %v7454_v8 = vld [vmem:[%s8390_s2 + $0x6c] ss:$16 sps:$4 sm:$0xff]   ;;  %v7459_v11 = vld [vmem:[%s8390_s2 + $0x60] ss:$16 sps:$4 sm:$0xff]  }
 0x2ef   :  { %v1062_v18 = vpop.f32.mrf.mxu0  ;;  %v1103_v19 = vpop.f32.mrf.mxu1  ;;  %v7464_v12 = vld [vmem:[%s8390_s2 + $0x68] ss:$16 sps:$4 sm:$0xff]   ;;  %v7473_v14 = vld [vmem:[%s8390_s2 + $0x44] ss:$16 sps:$4 sm:$0xff]  }
 0x2f0   :  { %v5910_v20 = vmul.f32 -1.442695, %v1118_v15  ;;  %v1119_v21 = vadd.f32 %v1111_v16, %v827_v17  ;;  %v1121_v27 = vadd.f32 %v1113_v25, %v829_v26  ;;  %v7478_v15 = vld [vmem:[%s8390_s2 + $0x4c] ss:$16 sps:$4 sm:$0xff]   ;;  %v7483_v16 = vld [vmem:[%s8390_s2 + $0x40] ss:$16 sps:$4 sm:$0xff]  }
 0x2f1   :  { %v1063_v22 = vpop.f32.mrf.mxu0  ;;  %v1104_v23 = vpop.f32.mrf.mxu1  ;;  %v7488_v17 = vld [vmem:[%s8390_s2 + $0x48] ss:$16 sps:$4 sm:$0xff]   ;;  %v7497_v18 = vld [vmem:[%s8390_s2 + $0x20] ss:$16 sps:$4 sm:$0xff]   ;;  %v7502_v19 = vld [vmem:[%s8390_s2 + $0x24] ss:$16 sps:$4 sm:$0xff]  }
 0x2f2   :  { %6729 = vpow2.f32 %v5910_v20  ;;  %v5911_v24 = vmul.f32 -1.442695, %v1119_v21  ;;  %v5912_v29 = vmul.f32 -1.442695, %v1121_v27  ;;  %v7507_v20 = vld [vmem:[%s8390_s2 + $0x28] ss:$16 sps:$4 sm:$0xff]  }
 0x2f3   :  { %v7512_v21 = vld [vmem:[%s8390_s2 + $0x2c] ss:$16 sps:$4 sm:$0xff]   ;;  %v7517_v22 = vld [vmem:[%s8390_s2 + $0x4] ss:$16 sps:$4 sm:$0xff]   ;;  %v7536_v25 = vld [vmem:[%s8390_s2 + $0x8] ss:$16 sps:$4 sm:$0xff]  }
 0x2f4   :  { %6731 = vpow2.f32 %v5911_v24  ;;  %v7523_v23 = vld [vmem:[%s8390_s2 + $0xc] ss:$16 sps:$4 sm:$0xff]   ;;  %v7531_v24 = vld [vmem:[%s8390_s2] ss:$16 sps:$4 sm:$0xff]  }
 0x2f5   :  { %6733 = vpow2.f32 %v5912_v29  ;;  %v1153_v29 = vld [vmem:[#allocation2 + $0x30] sm:$0xc0] }
 0x2ff   :  { %v6730_v31 = vpop.eup %6729 }
 0x300   :  { %v1125_v34 = vadd.f32 1.0, %v6730_v31 }
 0x301   :  { %v6732_v35 = vpop.eup %6731 }
 0x302   :  { %6735 = vrcp.f32 %v1125_v34  ;;  %v1131_v37 = vadd.f32 1.0, %v6732_v35  ;;  %v6734_v39 = vpop.eup %6733  ;;  %v1154_v35 = vld [vmem:[#allocation2] sm:$0xc0] }
 0x303   :  { %6737 = vtanh.f32 %v1120_v32  ;;  %v1138_v41 = vadd.f32 1.0, %v6734_v39 }
 0x304   :  { %6739 = vrcp.f32 %v1131_v37 }
 0x305   :  { %6741 = vrcp.f32 %v1138_v41 }
 0x30f   :  { %v6736_v40 = vpop.eup %6735 }
 0x310   :  { %v6738_v36 = vpop.eup %6737 }
 0x311   :  { %v6740_v13 = vpop.eup %6739  ;;  %v1146_v46 = vmul.f32 %v6738_v36, %v6736_v40 }
 0x312   :  { %v1145_v47 = vmul.f32 %v6740_v13, %v1143_v3  ;;  %v6742_v48 = vpop.eup %6741 }
 0x314   :  { %v1147_v44 = vadd.f32 %v1146_v46, %v1145_v47  ;;  %v1156_v46 = vld [vmem:[#allocation2 + $0x10] sm:$0xc0] }
 0x316   :  { %6743 = vtanh.f32 %v1147_v44  ;;  %1150 = vst [vmem:[#allocation6 - $0x4] sm:$0x30] %v1147_v44 }
 0x323   :  { %v6744_v49 = vpop.eup %6743 }
 0x324   :  { %v1149_v51 = vmul.f32 %v6744_v49, %v6742_v48  ;;  %v1155_v49 = vld [vmem:[#allocation2 + $0x18] sm:$0xc0] }
 0x326   :  { %1151 = vst [vmem:[#allocation5 - $0x4] sm:$0x30] %v1149_v51  ;;  %1152 = vst [vmem:[#allocation3] sm:$0x30] %v1149_v51 }
 0x32d   :  { %v1157_v52 = vld [vmem:[#allocation5] sm:$0x3] }
 0x32e   :  { %v1158_v54 = vpack.c.bf16 %v1157_v52, %v1157_v52 }
 0x330   :  { %1384 = vmatmul.mubr.bf16.vlgmr.msra.gmra.mxu0 %v1158_v54  ;;  %1425 = vmatmul.mubr.bf16.vlgmr.msra.gmra.mxu1 %v1158_v54 }
 0x331   :  { %1710 = vmatprep.mubr.bf16.mxu0 %v6961_v1  ;;  %1751 = vmatprep.mubr.bf16.mxu1 %v6961_v1 }
 0x332   :  { %1679 = vmatpush1.bf16.msra.mxu0 %v7363_v58  ;;  %1720 = vmatpush1.bf16.msra.mxu1 %v7368_v59 }
 0x333   :  { %1680 = vmatprep.subr.bf16.mxu0 %v7377_v61  ;;  %1721 = vmatprep.subr.bf16.mxu1 %v7382_v60 }
 0x336   :  { %1681 = vmatpush1.bf16.msra.mxu0 %v7387_v62  ;;  %1722 = vmatpush1.bf16.msra.mxu1 %v7392_v63 }
 0x337   :  { %1682 = vmatprep.subr.bf16.mxu0 %v7401_v56  ;;  %1723 = vmatprep.subr.bf16.mxu1 %v7406_v0 }
 0x33a   :  { %1683 = vmatpush1.bf16.msra.mxu0 %v7411_v4  ;;  %1724 = vmatpush1.bf16.msra.mxu1 %v7416_v6 }
 0x33b   :  { %1684 = vmatprep.subr.bf16.mxu0 %v7425_v9  ;;  %1725 = vmatprep.subr.bf16.mxu1 %v7430_v10 }
 0x33e   :  { %1685 = vmatpush1.bf16.msra.mxu0 %v7435_v33  ;;  %1726 = vmatpush1.bf16.msra.mxu1 %v7440_v5 }
 0x33f   :  { %1686 = vmatprep.subr.bf16.mxu0 %v7449_v7  ;;  %1727 = vmatprep.subr.bf16.mxu1 %v7454_v8 }
 0x342   :  { %1687 = vmatpush1.bf16.msra.mxu0 %v7459_v11  ;;  %1728 = vmatpush1.bf16.msra.mxu1 %v7464_v12 }
 0x343   :  { %1688 = vmatprep.subr.bf16.mxu0 %v7473_v14  ;;  %1729 = vmatprep.subr.bf16.mxu1 %v7478_v15 }
 0x346   :  { %1689 = vmatpush1.bf16.msra.mxu0 %v7483_v16  ;;  %1730 = vmatpush1.bf16.msra.mxu1 %v7488_v17 }
 0x347   :  { %1690 = vmatprep.subr.bf16.mxu0 %v7502_v19  ;;  %1731 = vmatprep.subr.bf16.mxu1 %v7512_v21 }
 0x34a   :  { %1691 = vmatpush1.bf16.msra.mxu0 %v7497_v18  ;;  %1732 = vmatpush1.bf16.msra.mxu1 %v7507_v20 }
 0x34b   :  { %1692 = vmatprep.subr.bf16.mxu0 %v7517_v22  ;;  %1733 = vmatprep.subr.bf16.mxu1 %v7523_v23 }
 0x34e   :  { %1693 = vmatpush1.bf16.msra.mxu0 %v7531_v24  ;;  %1734 = vmatpush1.bf16.msra.mxu1 %v7536_v25 }
 0x34f   :  { %1990 = vmatprep.subr.bf16.mxu0 %v7353_v55  ;;  %2031 = vmatprep.subr.bf16.mxu1 %v7358_v57 }
 0x3f0   :  { %v1385_v26 = vpop.f32.mrf.mxu0  ;;  %v1426_v27 = vpop.f32.mrf.mxu1 }
 0x3f1   :  { %v1437_v28 = vrot.slane %v1385_v26, 2  ;;  %v1439_v44 = vrot.slane %v1426_v27, 2 }
 0x3f2   :  { %v1387_v30 = vpop.f32.mrf.mxu0  ;;  %v1428_v31 = vpop.f32.mrf.mxu1 }
 0x3f3   :  { %v1445_v32 = vadd.f32 %v1437_v28, %v1153_v29  ;;  %v1438_v34 = vrot.slane %v1387_v30, 2  ;;  %v1440_v41 = vrot.slane %v1428_v31, 2  ;;  %v1447_v52 = vadd.f32 %v1439_v44, %v1155_v49  ;;  %v1468_v29 = vld [vmem:[#allocation6] sm:$0x3]  ;;  %v1481_v49 = vld [vmem:[#allocation2 + $0x20] sm:$0x3] }
 0x3f4   :  { %v1389_v37 = vpop.f32.mrf.mxu0  ;;  %v1430_v38 = vpop.f32.mrf.mxu1 }
 0x3f5   :  { %v5945_v39 = vmul.f32 -1.442695, %v1445_v32  ;;  %v1446_v40 = vadd.f32 %v1438_v34, %v1154_v35  ;;  %v1448_v47 = vadd.f32 %v1440_v41, %v1156_v46  ;;  %v1470_v35 = vrot.slane %v1468_v29, 2  ;;  %v1480_v46 = vld [vmem:[#allocation2 + $0x8] sm:$0x3] }
 0x3f6   :  { %v1390_v36 = vpop.f32.mrf.mxu0  ;;  %v1431_v3 = vpop.f32.mrf.mxu1 }
 0x3f7   :  { %6745 = vpow2.f32 %v5945_v39  ;;  %v5946_v13 = vmul.f32 -1.442695, %v1446_v40  ;;  %v5947_v48 = vmul.f32 -1.442695, %v1448_v47 }
 0x3f9   :  { %6747 = vpow2.f32 %v5946_v13 }
 0x3fa   :  { %6749 = vpow2.f32 %v5947_v48 }
 0x404   :  { %v6746_v51 = vpop.eup %6745 }
 0x405   :  { %v1452_v54 = vadd.f32 1.0, %v6746_v51 }
 0x406   :  { %v6748_v26 = vpop.eup %6747 }
 0x407   :  { %6751 = vrcp.f32 %v1452_v54  ;;  %v1458_v28 = vadd.f32 1.0, %v6748_v26  ;;  %v6750_v30 = vpop.eup %6749 }
 0x408   :  { %6753 = vtanh.f32 %v1447_v52  ;;  %v1465_v37 = vadd.f32 1.0, %v6750_v30 }
 0x409   :  { %6755 = vrcp.f32 %v1458_v28 }
 0x40a   :  { %6757 = vrcp.f32 %v1465_v37 }
 0x414   :  { %v6752_v32 = vpop.eup %6751 }
 0x415   :  { %v6754_v34 = vpop.eup %6753 }
 0x416   :  { %v6756_v31 = vpop.eup %6755  ;;  %v1473_v38 = vmul.f32 %v6754_v34, %v6752_v32 }
 0x417   :  { %v1472_v27 = vmul.f32 %v6756_v31, %v1470_v35  ;;  %v6758_v40 = vpop.eup %6757  ;;  %v1483_v35 = vld [vmem:[#allocation2 + $0x38] sm:$0x3] }
 0x419   :  { %v1474_v39 = vadd.f32 %v1473_v38, %v1472_v27  ;;  %v1482_v38 = vld [vmem:[#allocation2 + $0x28] sm:$0x3] }
 0x41b   :  { %6759 = vtanh.f32 %v1474_v39  ;;  %1477 = vst [vmem:[#allocation6 - $0x6] sm:$0xc0] %v1474_v39 }
 0x428   :  { %v6760_v36 = vpop.eup %6759 }
 0x429   :  { %v1476_v3 = vmul.f32 %v6760_v36, %v6758_v40 }
 0x42b   :  { %1478 = vst [vmem:[#allocation5 - $0x6] sm:$0xc0] %v1476_v3  ;;  %1479 = vst [vmem:[#allocation3] sm:$0xc0] %v1476_v3 }
 0x432   :  { %v1484_v13 = vld [vmem:[#allocation5] sm:$0x3] }
 0x433   :  { %v1485_v41 = vpack.c.bf16 %v1484_v13, %v1484_v13 }
 0x435   :  { %1711 = vmatmul.mubr.bf16.vlgmr.msra.gmra.mxu0 %v1485_v41  ;;  %1752 = vmatmul.mubr.bf16.vlgmr.msra.gmra.mxu1 %v1485_v41 }
 0x436   :  { %1991 = vmatpush1.bf16.msra.mxu0 %v7363_v58  ;;  %2032 = vmatpush1.bf16.msra.mxu1 %v7368_v59 }
 0x437   :  { %1992 = vmatprep.subr.bf16.mxu0 %v7377_v61  ;;  %2033 = vmatprep.subr.bf16.mxu1 %v7382_v60 }
 0x438   :  { %2022 = vmatprep.mubr.bf16.mxu0 %v6961_v1  ;;  %2063 = vmatprep.mubr.bf16.mxu1 %v6961_v1 }
 0x43a   :  { %1993 = vmatpush1.bf16.msra.mxu0 %v7387_v62  ;;  %2034 = vmatpush1.bf16.msra.mxu1 %v7392_v63 }
 0x43b   :  { %1994 = vmatprep.subr.bf16.mxu0 %v7401_v56  ;;  %2035 = vmatprep.subr.bf16.mxu1 %v7406_v0 }
 0x43e   :  { %1995 = vmatpush1.bf16.msra.mxu0 %v7411_v4  ;;  %2036 = vmatpush1.bf16.msra.mxu1 %v7416_v6 }
 0x43f   :  { %1996 = vmatprep.subr.bf16.mxu0 %v7425_v9  ;;  %2037 = vmatprep.subr.bf16.mxu1 %v7430_v10 }
 0x442   :  { %1997 = vmatpush1.bf16.msra.mxu0 %v7435_v33  ;;  %2038 = vmatpush1.bf16.msra.mxu1 %v7440_v5 }
 0x443   :  { %1998 = vmatprep.subr.bf16.mxu0 %v7449_v7  ;;  %2039 = vmatprep.subr.bf16.mxu1 %v7454_v8 }
 0x446   :  { %1999 = vmatpush1.bf16.msra.mxu0 %v7459_v11  ;;  %2040 = vmatpush1.bf16.msra.mxu1 %v7464_v12 }
 0x447   :  { %2000 = vmatprep.subr.bf16.mxu0 %v7473_v14  ;;  %2041 = vmatprep.subr.bf16.mxu1 %v7478_v15 }
 0x44a   :  { %2001 = vmatpush1.bf16.msra.mxu0 %v7483_v16  ;;  %2042 = vmatpush1.bf16.msra.mxu1 %v7488_v17 }
 0x44b   :  { %2002 = vmatprep.subr.bf16.mxu0 %v7502_v19  ;;  %2043 = vmatprep.subr.bf16.mxu1 %v7512_v21 }
 0x44e   :  { %2003 = vmatpush1.bf16.msra.mxu0 %v7497_v18  ;;  %2044 = vmatpush1.bf16.msra.mxu1 %v7507_v20 }
 0x44f   :  { %2004 = vmatprep.subr.bf16.mxu0 %v7517_v22  ;;  %2045 = vmatprep.subr.bf16.mxu1 %v7523_v23 }
 0x452   :  { %2005 = vmatpush1.bf16.msra.mxu0 %v7531_v24  ;;  %2046 = vmatpush1.bf16.msra.mxu1 %v7536_v25 }
 0x453   :  { %2317 = vmatprep.subr.bf16.mxu0 %v7353_v55  ;;  %2358 = vmatprep.subr.bf16.mxu1 %v7358_v57 }
 0x4f5   :  { %v1712_v47 = vpop.f32.mrf.mxu0  ;;  %v1753_v44 = vpop.f32.mrf.mxu1 }
 0x4f6   :  { %v1760_v48 = vadd.f32 %v1712_v47, %v1480_v46  ;;  %v1762_v39 = vadd.f32 %v1753_v44, %v1482_v38 }
 0x4f7   :  { %v1714_v51 = vpop.f32.mrf.mxu0  ;;  %v1755_v52 = vpop.f32.mrf.mxu1 }
 0x4f8   :  { %v5980_v54 = vmul.f32 -1.442695, %v1760_v48  ;;  %v1761_v26 = vadd.f32 %v1714_v51, %v1481_v49  ;;  %v1763_v31 = vadd.f32 %v1755_v52, %v1483_v35  ;;  %v1783_v48 = vld [vmem:[#allocation6] sm:$0x3] }
 0x4f9   :  { %v1716_v28 = vpop.f32.mrf.mxu0  ;;  %v1757_v29 = vpop.f32.mrf.mxu1 }
 0x4fa   :  { %6761 = vpow2.f32 %v5980_v54  ;;  %v5981_v30 = vmul.f32 -1.442695, %v1761_v26  ;;  %v5982_v37 = vmul.f32 -1.442695, %v1763_v31  ;;  %v1792_v31 = vld [vmem:[#allocation2 + $0x8] sm:$0xc] }
 0x4fb   :  { %v1717_v32 = vpop.f32.mrf.mxu0  ;;  %v1758_v34 = vpop.f32.mrf.mxu1 }
 0x4fc   :  { %6763 = vpow2.f32 %v5981_v30 }
 0x4fd   :  { %6765 = vpow2.f32 %v5982_v37 }
 0x507   :  { %v6762_v27 = vpop.eup %6761 }
 0x508   :  { %v1767_v40 = vadd.f32 1.0, %v6762_v27 }
 0x509   :  { %v6764_v36 = vpop.eup %6763 }
 0x50a   :  { %6767 = vrcp.f32 %v1767_v40  ;;  %v1773_v3 = vadd.f32 1.0, %v6764_v36  ;;  %v6766_v13 = vpop.eup %6765  ;;  %v1793_v40 = vld [vmem:[#allocation2 + $0x20] sm:$0xc] }
 0x50b   :  { %6769 = vtanh.f32 %v1762_v39  ;;  %v1780_v49 = vadd.f32 1.0, %v6766_v13 }
 0x50c   :  { %6771 = vrcp.f32 %v1773_v3 }
 0x50d   :  { %6773 = vrcp.f32 %v1780_v49 }
 0x517   :  { %v6768_v41 = vpop.eup %6767 }
 0x518   :  { %v6770_v46 = vpop.eup %6769 }
 0x519   :  { %v6772_v47 = vpop.eup %6771  ;;  %v1785_v51 = vmul.f32 %v6770_v46, %v6768_v41 }
 0x51a   :  { %v1784_v54 = vmul.f32 %v6772_v47, %v1783_v48  ;;  %v6774_v44 = vpop.eup %6773 }
 0x51c   :  { %v1786_v52 = vadd.f32 %v1785_v51, %v1784_v54 }
 0x51e   :  { %6775 = vtanh.f32 %v1786_v52  ;;  %1789 = vst [vmem:[#allocation6] sm:$0x3] %v1786_v52  ;;  %v1794_v52 = vld [vmem:[#allocation2 + $0x28] sm:$0xc] }
 0x52b   :  { %v6776_v26 = vpop.eup %6775 }
 0x52c   :  { %v1788_v28 = vmul.f32 %v6776_v26, %v6774_v44 }
 0x52e   :  { %1790 = vst [vmem:[#allocation5] sm:$0x3] %v1788_v28  ;;  %1791 = vst [vmem:[#allocation3 + $0x8] sm:$0x3] %v1788_v28 }
 0x535   :  { %v1796_v29 = vld [vmem:[#allocation5] sm:$0x3] }
 0x536   :  { %v1797_v30 = vpack.c.bf16 %v1796_v29, %v1796_v29 }
 0x538   :  { %2023 = vmatmul.mubr.bf16.vlgmr.msra.gmra.mxu0 %v1797_v30  ;;  %2064 = vmatmul.mubr.bf16.vlgmr.msra.gmra.mxu1 %v1797_v30 }
 0x539   :  { %2318 = vmatpush1.bf16.msra.mxu0 %v7363_v58  ;;  %2359 = vmatpush1.bf16.msra.mxu1 %v7368_v59 }
 0x53a   :  { %2319 = vmatprep.subr.bf16.mxu0 %v7377_v61  ;;  %2360 = vmatprep.subr.bf16.mxu1 %v7382_v60 }
 0x53b   :  { %2349 = vmatprep.mubr.bf16.mxu0 %v6961_v1  ;;  %2390 = vmatprep.mubr.bf16.mxu1 %v6961_v1 }
 0x53d   :  { %2320 = vmatpush1.bf16.msra.mxu0 %v7387_v62  ;;  %2361 = vmatpush1.bf16.msra.mxu1 %v7392_v63 }
 0x53e   :  { %2321 = vmatprep.subr.bf16.mxu0 %v7401_v56  ;;  %2362 = vmatprep.subr.bf16.mxu1 %v7406_v0 }
 0x541   :  { %2322 = vmatpush1.bf16.msra.mxu0 %v7411_v4  ;;  %2363 = vmatpush1.bf16.msra.mxu1 %v7416_v6 }
 0x542   :  { %2323 = vmatprep.subr.bf16.mxu0 %v7425_v9  ;;  %2364 = vmatprep.subr.bf16.mxu1 %v7430_v10 }
 0x545   :  { %2324 = vmatpush1.bf16.msra.mxu0 %v7435_v33  ;;  %2365 = vmatpush1.bf16.msra.mxu1 %v7440_v5 }
 0x546   :  { %2325 = vmatprep.subr.bf16.mxu0 %v7449_v7  ;;  %2366 = vmatprep.subr.bf16.mxu1 %v7454_v8 }
 0x549   :  { %2326 = vmatpush1.bf16.msra.mxu0 %v7459_v11  ;;  %2367 = vmatpush1.bf16.msra.mxu1 %v7464_v12 }
 0x54a   :  { %2327 = vmatprep.subr.bf16.mxu0 %v7473_v14  ;;  %2368 = vmatprep.subr.bf16.mxu1 %v7478_v15 }
 0x54d   :  { %2328 = vmatpush1.bf16.msra.mxu0 %v7483_v16  ;;  %2369 = vmatpush1.bf16.msra.mxu1 %v7488_v17 }
 0x54e   :  { %2329 = vmatprep.subr.bf16.mxu0 %v7502_v19  ;;  %2370 = vmatprep.subr.bf16.mxu1 %v7512_v21 }
 0x551   :  { %2330 = vmatpush1.bf16.msra.mxu0 %v7497_v18  ;;  %2371 = vmatpush1.bf16.msra.mxu1 %v7507_v20 }
 0x552   :  { %2331 = vmatprep.subr.bf16.mxu0 %v7517_v22  ;;  %2372 = vmatprep.subr.bf16.mxu1 %v7523_v23 }
 0x555   :  { %2332 = vmatpush1.bf16.msra.mxu0 %v7531_v24  ;;  %2373 = vmatpush1.bf16.msra.mxu1 %v7536_v25 }
 0x556   :  { %2644 = vmatprep.subr.bf16.mxu0 %v7353_v55  ;;  %2685 = vmatprep.subr.bf16.mxu1 %v7358_v57  ;;  %v1795_v57 = vld [vmem:[#allocation2 + $0x38] sm:$0xc] }
 0x5f8   :  { %v2024_v32 = vpop.f32.mrf.mxu0  ;;  %v2065_v34 = vpop.f32.mrf.mxu1 }
 0x5f9   :  { %v2076_v35 = vrot.slane %v2024_v32, 6  ;;  %v2078_v51 = vrot.slane %v2065_v34, 6  ;;  %v2107_v32 = vld [vmem:[#allocation6] sm:$0x3] }
 0x5fa   :  { %v2026_v37 = vpop.f32.mrf.mxu0  ;;  %v2067_v38 = vpop.f32.mrf.mxu1 }
 0x5fb   :  { %v2084_v27 = vadd.f32 %v2076_v35, %v1792_v31  ;;  %v2077_v39 = vrot.slane %v2026_v37, 6  ;;  %v2079_v55 = vrot.slane %v2067_v38, 6  ;;  %v2086_v26 = vadd.f32 %v2078_v51, %v1794_v52 }
 0x5fc   :  { %v2028_v36 = vpop.f32.mrf.mxu0  ;;  %v2069_v3 = vpop.f32.mrf.mxu1 }
 0x5fd   :  { %v6015_v13 = vmul.f32 -1.442695, %v2084_v27  ;;  %v2085_v41 = vadd.f32 %v2077_v39, %v1793_v40  ;;  %v2087_v49 = vadd.f32 %v2079_v55, %v1795_v57  ;;  %v2109_v27 = vrot.slane %v2107_v32, 6  ;;  %v6547_v32 = vld [vmem:[%s8393_s4 + $0xe4] ss:$16 sps:$4 sm:$0xff]  }
 0x5fe   :  { %v2029_v46 = vpop.f32.mrf.mxu0  ;;  %v2070_v47 = vpop.f32.mrf.mxu1 }
 0x5ff   :  { %6777 = vpow2.f32 %v6015_v13  ;;  %v6016_v48 = vmul.f32 -1.442695, %v2085_v41  ;;  %v6017_v54 = vmul.f32 -1.442695, %v2087_v49 }
 0x601   :  { %6779 = vpow2.f32 %v6016_v48 }
 0x602   :  { %6781 = vpow2.f32 %v6017_v54 }
 0x60c   :  { %v6778_v44 = vpop.eup %6777 }
 0x60d   :  { %v2091_v28 = vadd.f32 1.0, %v6778_v44 }
 0x60e   :  { %v6780_v29 = vpop.eup %6779 }
 0x60f   :  { %6783 = vrcp.f32 %v2091_v28  ;;  %v2097_v30 = vadd.f32 1.0, %v6780_v29  ;;  %v6782_v35 = vpop.eup %6781 }
 0x610   :  { %6785 = vtanh.f32 %v2086_v26  ;;  %v2104_v39 = vadd.f32 1.0, %v6782_v35  ;;  %v6545_v35 = vld [vmem:[%s8393_s4 + $0xe0] ss:$16 sps:$4 sm:$0xff]  }
 0x611   :  { %6787 = vrcp.f32 %v2097_v30 }
 0x612   :  { %6789 = vrcp.f32 %v2104_v39  ;;  %v6551_v39 = vld [vmem:[%s8393_s4 + $0xc0] ss:$16 sps:$4 sm:$0xff]  }
 0x61c   :  { %v6784_v31 = vpop.eup %6783 }
 0x61d   :  { %v6786_v37 = vpop.eup %6785 }
 0x61e   :  { %v6788_v38 = vpop.eup %6787  ;;  %v2112_v40 = vmul.f32 %v6786_v37, %v6784_v31  ;;  %v6548_v31 = vld [vmem:[%s8393_s4 + $0xe8] ss:$16 sps:$4 sm:$0xff]   ;;  %v6550_v37 = vld [vmem:[%s8393_s4 + $0xec] ss:$16 sps:$4 sm:$0xff]  }
 0x61f   :  { %v2111_v34 = vmul.f32 %v6788_v38, %v2109_v27  ;;  %v6790_v3 = vpop.eup %6789  ;;  %v6553_v27 = vld [vmem:[%s8393_s4 + $0xc4] ss:$16 sps:$4 sm:$0xff]   ;;  %v6556_v38 = vld [vmem:[%s8393_s4 + $0xcc] ss:$16 sps:$4 sm:$0xff]  }
 0x621   :  { %v2113_v36 = vadd.f32 %v2112_v40, %v2111_v34  ;;  %v6554_v40 = vld [vmem:[%s8393_s4 + $0xc8] ss:$16 sps:$4 sm:$0xff]   ;;  %v6559_v34 = vld [vmem:[%s8393_s4 + $0xa4] ss:$16 sps:$4 sm:$0xff]  }
 0x623   :  { %6791 = vtanh.f32 %v2113_v36  ;;  %2116 = vst [vmem:[#allocation6 - $0x2] sm:$0xc] %v2113_v36  ;;  %v6562_v36 = vld [vmem:[%s8393_s4 + $0xac] ss:$16 sps:$4 sm:$0xff]  }
 0x630   :  { %v6792_v13 = vpop.eup %6791 }
 0x631   :  { %v2115_v41 = vmul.f32 %v6792_v13, %v6790_v3  ;;  %v6557_v3 = vld [vmem:[%s8393_s4 + $0xa0] ss:$16 sps:$4 sm:$0xff]   ;;  %v6560_v13 = vld [vmem:[%s8393_s4 + $0xa8] ss:$16 sps:$4 sm:$0xff]  }
 0x633   :  { %2117 = vst [vmem:[#allocation5 - $0x2] sm:$0xc] %v2115_v41  ;;  %2118 = vst [vmem:[#allocation3 + $0x8] sm:$0xc] %v2115_v41  ;;  %v6565_v41 = vld [vmem:[%s8393_s4 + $0x84] ss:$16 sps:$4 sm:$0xff]  }
 0x63a   :  { %v2123_v46 = vld [vmem:[#allocation5] sm:$0x3] }
 0x63b   :  { %v2124_v47 = vpack.c.bf16 %v2123_v46, %v2123_v46  ;;  %v6568_v46 = vld [vmem:[%s8393_s4 + $0x8c] ss:$16 sps:$4 sm:$0xff]  }
 0x63d   :  { %2350 = vmatmul.mubr.bf16.vlgmr.msra.gmra.mxu0 %v2124_v47  ;;  %2391 = vmatmul.mubr.bf16.vlgmr.msra.gmra.mxu1 %v2124_v47  ;;  %v6563_v47 = vld [vmem:[%s8393_s4 + $0x80] ss:$16 sps:$4 sm:$0xff]  }
 0x63e   :  { %2645 = vmatpush1.bf16.msra.mxu0 %v7363_v58  ;;  %2686 = vmatpush1.bf16.msra.mxu1 %v7368_v59 }
 0x63f   :  { %2646 = vmatprep.subr.bf16.mxu0 %v7377_v61  ;;  %2687 = vmatprep.subr.bf16.mxu1 %v7382_v60  ;;  %v2119_v60 = vld [vmem:[#allocation2 + $0x8] sm:$0x30] }
 0x640   :  { %2676 = vmatprep.mubr.bf16.mxu0 %v6961_v1  ;;  %2717 = vmatprep.mubr.bf16.mxu1 %v6961_v1 }
 0x642   :  { %2647 = vmatpush1.bf16.msra.mxu0 %v7387_v62  ;;  %2688 = vmatpush1.bf16.msra.mxu1 %v7392_v63 }
 0x643   :  { %2648 = vmatprep.subr.bf16.mxu0 %v7401_v56  ;;  %2689 = vmatprep.subr.bf16.mxu1 %v7406_v0 }
 0x646   :  { %2649 = vmatpush1.bf16.msra.mxu0 %v7411_v4  ;;  %2690 = vmatpush1.bf16.msra.mxu1 %v7416_v6  ;;  %v2120_v4 = vld [vmem:[#allocation2 + $0x20] sm:$0x30] }
 0x647   :  { %2650 = vmatprep.subr.bf16.mxu0 %v7425_v9  ;;  %2691 = vmatprep.subr.bf16.mxu1 %v7430_v10 }
 0x64a   :  { %2651 = vmatpush1.bf16.msra.mxu0 %v7435_v33  ;;  %2692 = vmatpush1.bf16.msra.mxu1 %v7440_v5 }
 0x64b   :  { %2652 = vmatprep.subr.bf16.mxu0 %v7449_v7  ;;  %2693 = vmatprep.subr.bf16.mxu1 %v7454_v8 }
 0x64e   :  { %2653 = vmatpush1.bf16.msra.mxu0 %v7459_v11  ;;  %2694 = vmatpush1.bf16.msra.mxu1 %v7464_v12  ;;  %v2122_v12 = vld [vmem:[#allocation2 + $0x38] sm:$0x30] }
 0x64f   :  { %2654 = vmatprep.subr.bf16.mxu0 %v7473_v14  ;;  %2695 = vmatprep.subr.bf16.mxu1 %v7478_v15 }
 0x652   :  { %2655 = vmatpush1.bf16.msra.mxu0 %v7483_v16  ;;  %2696 = vmatpush1.bf16.msra.mxu1 %v7488_v17  ;;  %v2121_v17 = vld [vmem:[#allocation2 + $0x28] sm:$0x30] }
 0x653   :  { %2656 = vmatprep.subr.bf16.mxu0 %v7502_v19  ;;  %2697 = vmatprep.subr.bf16.mxu1 %v7512_v21 }
 0x656   :  { %2657 = vmatpush1.bf16.msra.mxu0 %v7497_v18  ;;  %2698 = vmatpush1.bf16.msra.mxu1 %v7507_v20 }
 0x657   :  { %2658 = vmatprep.subr.bf16.mxu0 %v7517_v22  ;;  %2699 = vmatprep.subr.bf16.mxu1 %v7523_v23  ;;  %v2434_v23 = vld [vmem:[#allocation6] sm:$0x3] }
 0x658   :  { %v2436_v55 = vrot.slane %v2434_v23, 4  ;;  %v2447_v23 = vld [vmem:[#allocation2 + $0x20] sm:$0xc0] }
 0x65a   :  { %2659 = vmatpush1.bf16.msra.mxu0 %v7531_v24  ;;  %2700 = vmatpush1.bf16.msra.mxu1 %v7536_v25 }
 0x65b   :  { %2990 = vmatprep.subr.bf16.mxu0 %v6547_v32  ;;  %3033 = vmatprep.subr.bf16.mxu1 %v6550_v37 }
 0x6fd   :  { %v2351_v58 = vpop.f32.mrf.mxu0  ;;  %v2392_v59 = vpop.f32.mrf.mxu1 }
 0x6fe   :  { %v2403_v61 = vrot.slane %v2351_v58, 4  ;;  %v2405_v15 = vrot.slane %v2392_v59, 4  ;;  %v6566_v58 = vld [vmem:[%s8393_s4 + $0x88] ss:$16 sps:$4 sm:$0xff]   ;;  %v6571_v59 = vld [vmem:[%s8393_s4 + $0x64] ss:$16 sps:$4 sm:$0xff]  }
 0x6ff   :  { %v2353_v62 = vpop.f32.mrf.mxu0  ;;  %v2394_v63 = vpop.f32.mrf.mxu1 }
 0x700   :  { %v2411_v56 = vadd.f32 %v2403_v61, %v2119_v60  ;;  %v2404_v0 = vrot.slane %v2353_v62, 4  ;;  %v2406_v11 = vrot.slane %v2394_v63, 4  ;;  %v2413_v19 = vadd.f32 %v2405_v15, %v2121_v17  ;;  %v6574_v61 = vld [vmem:[%s8393_s4 + $0x6c] ss:$16 sps:$4 sm:$0xff]   ;;  %v6569_v60 = vld [vmem:[%s8393_s4 + $0x60] ss:$16 sps:$4 sm:$0xff]  }
 0x701   :  { %v2355_v6 = vpop.f32.mrf.mxu0  ;;  %v2396_v9 = vpop.f32.mrf.mxu1  ;;  %v6572_v62 = vld [vmem:[%s8393_s4 + $0x68] ss:$16 sps:$4 sm:$0xff]   ;;  %v6577_v63 = vld [vmem:[%s8393_s4 + $0x44] ss:$16 sps:$4 sm:$0xff]  }
 0x702   :  { %v6050_v10 = vmul.f32 -1.442695, %v2411_v56  ;;  %v2412_v33 = vadd.f32 %v2404_v0, %v2120_v4  ;;  %v2414_v14 = vadd.f32 %v2406_v11, %v2122_v12  ;;  %v6580_v56 = vld [vmem:[%s8393_s4 + $0x4c] ss:$16 sps:$4 sm:$0xff]   ;;  %v6575_v0 = vld [vmem:[%s8393_s4 + $0x40] ss:$16 sps:$4 sm:$0xff]  }
 0x703   :  { %v2356_v5 = vpop.f32.mrf.mxu0  ;;  %v2397_v7 = vpop.f32.mrf.mxu1  ;;  %v6578_v4 = vld [vmem:[%s8393_s4 + $0x48] ss:$16 sps:$4 sm:$0xff]   ;;  %v6583_v6 = vld [vmem:[%s8393_s4 + $0x24] ss:$16 sps:$4 sm:$0xff]   ;;  %v6586_v9 = vld [vmem:[%s8393_s4 + $0x2c] ss:$16 sps:$4 sm:$0xff]  }
 0x704   :  { %6793 = vpow2.f32 %v6050_v10  ;;  %v6051_v8 = vmul.f32 -1.442695, %v2412_v33  ;;  %v6052_v16 = vmul.f32 -1.442695, %v2414_v14  ;;  %v6581_v10 = vld [vmem:[%s8393_s4 + $0x20] ss:$16 sps:$4 sm:$0xff]  }
 0x705   :  { %v6584_v33 = vld [vmem:[%s8393_s4 + $0x28] ss:$16 sps:$4 sm:$0xff]   ;;  %v6589_v5 = vld [vmem:[%s8393_s4 + $0x4] ss:$16 sps:$4 sm:$0xff]   ;;  %v6592_v7 = vld [vmem:[%s8393_s4 + $0xc] ss:$16 sps:$4 sm:$0xff]  }
 0x706   :  { %6795 = vpow2.f32 %v6051_v8  ;;  %v6587_v8 = vld [vmem:[%s8393_s4] ss:$16 sps:$4 sm:$0xff]   ;;  %v7742_v11 = vld [vmem:[%s8394_s5 + $0xe4] ss:$16 sps:$4 sm:$0xff]   ;;  %v6590_v12 = vld [vmem:[%s8393_s4 + $0x8] ss:$16 sps:$4 sm:$0xff]  }
 0x707   :  { %6797 = vpow2.f32 %v6052_v16  ;;  %v7750_v14 = vld [vmem:[%s8394_s5 + $0xec] ss:$16 sps:$4 sm:$0xff]  }
 0x711   :  { %v6794_v18 = vpop.eup %6793 }
 0x712   :  { %v2418_v20 = vadd.f32 1.0, %v6794_v18  ;;  %v2446_v18 = vld [vmem:[#allocation2 + $0x8] sm:$0xc0] }
 0x713   :  { %v6796_v21 = vpop.eup %6795 }
 0x714   :  { %6799 = vrcp.f32 %v2418_v20  ;;  %v2424_v22 = vadd.f32 1.0, %v6796_v21  ;;  %v6798_v24 = vpop.eup %6797 }
 0x715   :  { %6801 = vtanh.f32 %v2413_v19  ;;  %v2431_v49 = vadd.f32 1.0, %v6798_v24 }
 0x716   :  { %6803 = vrcp.f32 %v2424_v22 }
 0x717   :  { %6805 = vrcp.f32 %v2431_v49 }
 0x721   :  { %v6800_v25 = vpop.eup %6799 }
 0x722   :  { %v6802_v48 = vpop.eup %6801 }
 0x723   :  { %v6804_v57 = vpop.eup %6803  ;;  %v2439_v51 = vmul.f32 %v6802_v48, %v6800_v25 }
 0x724   :  { %v2438_v54 = vmul.f32 %v6804_v57, %v2436_v55  ;;  %v6806_v44 = vpop.eup %6805 }
 0x726   :  { %v2440_v52 = vadd.f32 %v2439_v51, %v2438_v54 }
 0x728   :  { %6807 = vtanh.f32 %v2440_v52  ;;  %2443 = vst [vmem:[#allocation6 - $0x4] sm:$0x30] %v2440_v52  ;;  %v2449_v52 = vld [vmem:[#allocation2 + $0x38] sm:$0xc0] }
 0x735   :  { %v6808_v26 = vpop.eup %6807 }
 0x736   :  { %v2442_v28 = vmul.f32 %v6808_v26, %v6806_v44 }
 0x738   :  { %2444 = vst [vmem:[#allocation5 - $0x4] sm:$0x30] %v2442_v28  ;;  %2445 = vst [vmem:[#allocation3 + $0x8] sm:$0x30] %v2442_v28 }
 0x73f   :  { %v2450_v29 = vld [vmem:[#allocation5] sm:$0x3] }
 0x740   :  { %v2451_v30 = vpack.c.bf16 %v2450_v29, %v2450_v29  ;;  %v2448_v29 = vld [vmem:[#allocation2 + $0x28] sm:$0xc0] }
 0x742   :  { %2677 = vmatmul.mubr.bf16.vlgmr.msra.gmra.mxu0 %v2451_v30  ;;  %2718 = vmatmul.mubr.bf16.vlgmr.msra.gmra.mxu1 %v2451_v30 }
 0x743   :  { %3022 = vmatprep.mubr.bf16.mxu0 %v6961_v1  ;;  %3065 = vmatprep.mubr.bf16.mxu1 %v6961_v1 }
 0x744   :  { %2991 = vmatpush1.bf16.msra.mxu0 %v6545_v35  ;;  %3034 = vmatpush1.bf16.msra.mxu1 %v6548_v31 }
 0x745   :  { %2992 = vmatprep.subr.bf16.mxu0 %v6553_v27  ;;  %3035 = vmatprep.subr.bf16.mxu1 %v6556_v38  ;;  %v2761_v27 = vld [vmem:[#allocation6] sm:$0x3] }
 0x748   :  { %2993 = vmatpush1.bf16.msra.mxu0 %v6551_v39  ;;  %3036 = vmatpush1.bf16.msra.mxu1 %v6554_v40 }
 0x749   :  { %2994 = vmatprep.subr.bf16.mxu0 %v6559_v34  ;;  %3037 = vmatprep.subr.bf16.mxu1 %v6562_v36  ;;  %v2763_v34 = vrot.slane %v2761_v27, 2 }
 0x74c   :  { %2995 = vmatpush1.bf16.msra.mxu0 %v6557_v3  ;;  %3038 = vmatpush1.bf16.msra.mxu1 %v6560_v13 }
 0x74d   :  { %2996 = vmatprep.subr.bf16.mxu0 %v6565_v41  ;;  %3039 = vmatprep.subr.bf16.mxu1 %v6568_v46 }
 0x750   :  { %2997 = vmatpush1.bf16.msra.mxu0 %v6563_v47  ;;  %3040 = vmatpush1.bf16.msra.mxu1 %v6566_v58 }
 0x751   :  { %2998 = vmatprep.subr.bf16.mxu0 %v6571_v59  ;;  %3041 = vmatprep.subr.bf16.mxu1 %v6574_v61  ;;  %v2773_v61 = vld [vmem:[#allocation3] sm:$0xff] }
 0x754   :  { %2999 = vmatpush1.bf16.msra.mxu0 %v6569_v60  ;;  %3042 = vmatpush1.bf16.msra.mxu1 %v6572_v62  ;;  %v7759_v60 = vld [vmem:[%s8394_s5 + $0xe0] ss:$16 sps:$4 sm:$0xff]   ;;  %v7764_v62 = vld [vmem:[%s8394_s5 + $0xe8] ss:$16 sps:$4 sm:$0xff]  }
 0x755   :  { %3000 = vmatprep.subr.bf16.mxu0 %v6577_v63  ;;  %3043 = vmatprep.subr.bf16.mxu1 %v6580_v56 }
 0x758   :  { %3001 = vmatpush1.bf16.msra.mxu0 %v6575_v0  ;;  %3044 = vmatpush1.bf16.msra.mxu1 %v6578_v4  ;;  %v7769_v0 = vld [vmem:[%s8394_s5 + $0xc4] ss:$16 sps:$4 sm:$0xff]   ;;  %v7774_v4 = vld [vmem:[%s8394_s5 + $0xcc] ss:$16 sps:$4 sm:$0xff]  }
 0x759   :  { %3002 = vmatprep.subr.bf16.mxu0 %v6583_v6  ;;  %3045 = vmatprep.subr.bf16.mxu1 %v6586_v9  ;;  %v7781_v6 = vld [vmem:[%s8394_s5 + $0xc0] ss:$16 sps:$4 sm:$0xff]   ;;  %v7786_v9 = vld [vmem:[%s8394_s5 + $0xc8] ss:$16 sps:$4 sm:$0xff]  }
 0x75c   :  { %3003 = vmatpush1.bf16.msra.mxu0 %v6581_v10  ;;  %3046 = vmatpush1.bf16.msra.mxu1 %v6584_v33  ;;  %v7793_v10 = vld [vmem:[%s8394_s5 + $0xa4] ss:$16 sps:$4 sm:$0xff]   ;;  %v7798_v33 = vld [vmem:[%s8394_s5 + $0xac] ss:$16 sps:$4 sm:$0xff]  }
 0x75d   :  { %3004 = vmatprep.subr.bf16.mxu0 %v6589_v5  ;;  %3047 = vmatprep.subr.bf16.mxu1 %v6592_v7  ;;  %v7807_v5 = vld [vmem:[%s8394_s5 + $0xa0] ss:$16 sps:$4 sm:$0xff]   ;;  %v7812_v7 = vld [vmem:[%s8394_s5 + $0xa8] ss:$16 sps:$4 sm:$0xff]  }
 0x760   :  { %3005 = vmatpush1.bf16.msra.mxu0 %v6587_v8  ;;  %3048 = vmatpush1.bf16.msra.mxu1 %v6590_v12  ;;  %v7819_v8 = vld [vmem:[%s8394_s5 + $0x84] ss:$16 sps:$4 sm:$0xff]   ;;  %v7824_v12 = vld [vmem:[%s8394_s5 + $0x8c] ss:$16 sps:$4 sm:$0xff]  }
 0x761   :  { %3284 = vmatprep.subr.bf16.mxu0 %v7742_v11  ;;  %3325 = vmatprep.subr.bf16.mxu1 %v7750_v14 }
 0x802   :  { %v2678_v15 = vpop.f32.mrf.mxu0  ;;  %v2719_v16 = vpop.f32.mrf.mxu1 }
 0x803   :  { %v2730_v17 = vrot.slane %v2678_v15, 2  ;;  %v2732_v26 = vrot.slane %v2719_v16, 2  ;;  %v7831_v15 = vld [vmem:[%s8394_s5 + $0x80] ss:$16 sps:$4 sm:$0xff]   ;;  %v7836_v16 = vld [vmem:[%s8394_s5 + $0x88] ss:$16 sps:$4 sm:$0xff]  }
 0x804   :  { %v2680_v19 = vpop.f32.mrf.mxu0  ;;  %v2721_v20 = vpop.f32.mrf.mxu1 }
 0x805   :  { %v2738_v21 = vadd.f32 %v2730_v17, %v2446_v18  ;;  %v2731_v22 = vrot.slane %v2680_v19, 2  ;;  %v2733_v54 = vrot.slane %v2721_v20, 2  ;;  %v2740_v32 = vadd.f32 %v2732_v26, %v2448_v29  ;;  %v7843_v17 = vld [vmem:[%s8394_s5 + $0x64] ss:$16 sps:$4 sm:$0xff]   ;;  %v7848_v18 = vld [vmem:[%s8394_s5 + $0x6c] ss:$16 sps:$4 sm:$0xff]  }
 0x806   :  { %v2682_v24 = vpop.f32.mrf.mxu0  ;;  %v2723_v25 = vpop.f32.mrf.mxu1  ;;  %v7855_v19 = vld [vmem:[%s8394_s5 + $0x60] ss:$16 sps:$4 sm:$0xff]   ;;  %v7860_v20 = vld [vmem:[%s8394_s5 + $0x68] ss:$16 sps:$4 sm:$0xff]  }
 0x807   :  { %v6085_v48 = vmul.f32 -1.442695, %v2738_v21  ;;  %v2739_v55 = vadd.f32 %v2731_v22, %v2447_v23  ;;  %v2741_v44 = vadd.f32 %v2733_v54, %v2449_v52  ;;  %v7867_v21 = vld [vmem:[%s8394_s5 + $0x44] ss:$16 sps:$4 sm:$0xff]   ;;  %v7872_v22 = vld [vmem:[%s8394_s5 + $0x4c] ss:$16 sps:$4 sm:$0xff]  }
 0x808   :  { %v2683_v57 = vpop.f32.mrf.mxu0  ;;  %v2724_v49 = vpop.f32.mrf.mxu1  ;;  %v7879_v23 = vld [vmem:[%s8394_s5 + $0x40] ss:$16 sps:$4 sm:$0xff]   ;;  %v7884_v24 = vld [vmem:[%s8394_s5 + $0x48] ss:$16 sps:$4 sm:$0xff]   ;;  %v7891_v25 = vld [vmem:[%s8394_s5 + $0x24] ss:$16 sps:$4 sm:$0xff]  }
 0x809   :  { %6809 = vpow2.f32 %v6085_v48  ;;  %v6086_v51 = vmul.f32 -1.442695, %v2739_v55  ;;  %v6087_v28 = vmul.f32 -1.442695, %v2741_v44  ;;  %v7896_v48 = vld [vmem:[%s8394_s5 + $0x2c] ss:$16 sps:$4 sm:$0xff]  }
 0x80a   :  { %v7903_v55 = vld [vmem:[%s8394_s5 + $0x20] ss:$16 sps:$4 sm:$0xff]   ;;  %v7908_v57 = vld [vmem:[%s8394_s5 + $0x28] ss:$16 sps:$4 sm:$0xff]   ;;  %v7915_v49 = vld [vmem:[%s8394_s5 + $0x4] ss:$16 sps:$4 sm:$0xff]  }
 0x80b   :  { %6811 = vpow2.f32 %v6086_v51  ;;  %v7920_v51 = vld [vmem:[%s8394_s5 + $0xc] ss:$16 sps:$4 sm:$0xff]   ;;  %v7927_v54 = vld [vmem:[%s8394_s5] ss:$16 sps:$4 sm:$0xff]   ;;  %v7932_v52 = vld [vmem:[%s8394_s5 + $0x8] ss:$16 sps:$4 sm:$0xff]  }
 0x80c   :  { %6813 = vpow2.f32 %v6087_v28  ;;  %v2808_v28 = vld [vmem:[%s8395_s6] sm:$0xf] }
 0x80d   :  { %v2813_v29 = vrot.slane %v2808_v28, %v44_v43 }
 0x816   :  { %v6810_v30 = vpop.eup %6809 }
 0x817   :  { %v2745_v35 = vadd.f32 1.0, %v6810_v30  ;;  %v2821_v30 = vrot.slane %v2808_v28, %v52_v50 }
 0x818   :  { %v6812_v31 = vpop.eup %6811 }
 0x819   :  { %6815 = vrcp.f32 %v2745_v35  ;;  %v2751_v37 = vadd.f32 1.0, %v6812_v31  ;;  %v6814_v38 = vpop.eup %6813  ;;  %v2825_v35 = vrot.slane %v2808_v28, %v56_v53 }
 0x81a   :  { %6817 = vtanh.f32 %v2740_v32  ;;  %v2758_v3 = vadd.f32 1.0, %v6814_v38  ;;  %v2817_v32 = vrot.slane %v2808_v28, %v48_v45 }
 0x81b   :  { %6819 = vrcp.f32 %v2751_v37 }
 0x81c   :  { %6821 = vrcp.f32 %v2758_v3 }
 0x826   :  { %v6816_v39 = vpop.eup %6815 }
 0x827   :  { %v6818_v40 = vpop.eup %6817 }
 0x828   :  { %v6820_v36 = vpop.eup %6819  ;;  %v2766_v13 = vmul.f32 %v6818_v40, %v6816_v39 }
 0x829   :  { %v2765_v41 = vmul.f32 %v6820_v36, %v2763_v34  ;;  %v6822_v47 = vpop.eup %6821 }
 0x82b   :  { %v2767_v46 = vadd.f32 %v2766_v13, %v2765_v41 }
 0x82d   :  { %6823 = vtanh.f32 %v2767_v46  ;;  %2770 = vst [vmem:[#allocation6 - $0x6] sm:$0xc0] %v2767_v46 }
 0x82e   :  { %3085 = vst [vmem:[#allocation6] sm:$0x3] %v6962_v2 }
 0x83a   :  { %v6824_v58 = vpop.eup %6823 }
 0x83b   :  { %v2769_v59 = vmul.f32 %v6824_v58, %v6822_v47 }
 0x83d   :  { %2771 = vst [vmem:[#allocation5 - $0x6] sm:$0xc0] %v2769_v59  ;;  %2772 = vst [vmem:[#allocation3 + $0x8] sm:$0xc0] %v2769_v59 }
 0x83e   :  { %3084 = vst [vmem:[#allocation5] sm:$0x3] %v6962_v2 }
 0x844   :  { %v2774_v63 = vld [vmem:[#allocation3 + $0x8] sm:$0xff] }
 0x845   :  { %v2775_v56 = vpack.c.bf16 %v2774_v63, %v2773_v61  ;;  %v3090_v44 = vld [vmem:[#allocation5] sm:$0x3] }
 0x846   :  { %v3091_v26 = vpack.c.bf16 %v3090_v44, %v3090_v44 }
 0x847   :  { %3023 = vmatmul.mubr.bf16.vlgmr.msra.gmra.mxu0 %v2775_v56  ;;  %3066 = vmatmul.mubr.bf16.vlgmr.msra.gmra.mxu1 %v2775_v56 }
 0x848   :  { %3285 = vmatpush1.bf16.msra.mxu0 %v7759_v60  ;;  %3326 = vmatpush1.bf16.msra.mxu1 %v7764_v62 }
 0x849   :  { %3286 = vmatprep.subr.bf16.mxu0 %v7769_v0  ;;  %3327 = vmatprep.subr.bf16.mxu1 %v7774_v4 }
 0x84a   :  { %3316 = vmatprep.mubr.bf16.mxu0 %v6961_v1  ;;  %3357 = vmatprep.mubr.bf16.mxu1 %v6961_v1 }
 0x84c   :  { %3287 = vmatpush1.bf16.msra.mxu0 %v7781_v6  ;;  %3328 = vmatpush1.bf16.msra.mxu1 %v7786_v9 }
 0x84d   :  { %3288 = vmatprep.subr.bf16.mxu0 %v7793_v10  ;;  %3329 = vmatprep.subr.bf16.mxu1 %v7798_v33 }
 0x850   :  { %3289 = vmatpush1.bf16.msra.mxu0 %v7807_v5  ;;  %3330 = vmatpush1.bf16.msra.mxu1 %v7812_v7 }
 0x851   :  { %3290 = vmatprep.subr.bf16.mxu0 %v7819_v8  ;;  %3331 = vmatprep.subr.bf16.mxu1 %v7824_v12 }
 0x854   :  { %3291 = vmatpush1.bf16.msra.mxu0 %v7831_v15  ;;  %3332 = vmatpush1.bf16.msra.mxu1 %v7836_v16 }
 0x855   :  { %3292 = vmatprep.subr.bf16.mxu0 %v7843_v17  ;;  %3333 = vmatprep.subr.bf16.mxu1 %v7848_v18 }
 0x858   :  { %3293 = vmatpush1.bf16.msra.mxu0 %v7855_v19  ;;  %3334 = vmatpush1.bf16.msra.mxu1 %v7860_v20 }
 0x859   :  { %3294 = vmatprep.subr.bf16.mxu0 %v7867_v21  ;;  %3335 = vmatprep.subr.bf16.mxu1 %v7872_v22 }
 0x85c   :  { %3295 = vmatpush1.bf16.msra.mxu0 %v7879_v23  ;;  %3336 = vmatpush1.bf16.msra.mxu1 %v7884_v24 }
 0x85d   :  { %3296 = vmatprep.subr.bf16.mxu0 %v7891_v25  ;;  %3337 = vmatprep.subr.bf16.mxu1 %v7896_v48 }
 0x860   :  { %3297 = vmatpush1.bf16.msra.mxu0 %v7903_v55  ;;  %3338 = vmatpush1.bf16.msra.mxu1 %v7908_v57 }
 0x861   :  { %3298 = vmatprep.subr.bf16.mxu0 %v7915_v49  ;;  %3339 = vmatprep.subr.bf16.mxu1 %v7920_v51 }
 0x864   :  { %3299 = vmatpush1.bf16.msra.mxu0 %v7927_v54  ;;  %3340 = vmatpush1.bf16.msra.mxu1 %v7932_v52 }
 0x865   :  { %3596 = vmatprep.subr.bf16.mxu0 %v7742_v11  ;;  %3637 = vmatprep.subr.bf16.mxu1 %v7750_v14 }
 0x867   :  { %3317 = vmatmul.mubr.bf16.vlgmr.msra.gmra.mxu0 %v3091_v26  ;;  %3358 = vmatmul.mubr.bf16.vlgmr.msra.gmra.mxu1 %v3091_v26 }
 0x868   :  { %3597 = vmatpush1.bf16.msra.mxu0 %v7759_v60  ;;  %3638 = vmatpush1.bf16.msra.mxu1 %v7764_v62 }
 0x869   :  { %3598 = vmatprep.subr.bf16.mxu0 %v7769_v0  ;;  %3639 = vmatprep.subr.bf16.mxu1 %v7774_v4 }
 0x86a   :  { %3628 = vmatprep.mubr.bf16.mxu0 %v6961_v1  ;;  %3669 = vmatprep.mubr.bf16.mxu1 %v6961_v1 }
 0x86c   :  { %3599 = vmatpush1.bf16.msra.mxu0 %v7781_v6  ;;  %3640 = vmatpush1.bf16.msra.mxu1 %v7786_v9 }
 0x86d   :  { %3600 = vmatprep.subr.bf16.mxu0 %v7793_v10  ;;  %3641 = vmatprep.subr.bf16.mxu1 %v7798_v33 }
 0x870   :  { %3601 = vmatpush1.bf16.msra.mxu0 %v7807_v5  ;;  %3642 = vmatpush1.bf16.msra.mxu1 %v7812_v7 }
 0x871   :  { %3602 = vmatprep.subr.bf16.mxu0 %v7819_v8  ;;  %3643 = vmatprep.subr.bf16.mxu1 %v7824_v12 }
 0x874   :  { %3603 = vmatpush1.bf16.msra.mxu0 %v7831_v15  ;;  %3644 = vmatpush1.bf16.msra.mxu1 %v7836_v16 }
 0x875   :  { %3604 = vmatprep.subr.bf16.mxu0 %v7843_v17  ;;  %3645 = vmatprep.subr.bf16.mxu1 %v7848_v18 }
 0x878   :  { %3605 = vmatpush1.bf16.msra.mxu0 %v7855_v19  ;;  %3646 = vmatpush1.bf16.msra.mxu1 %v7860_v20 }
 0x879   :  { %3606 = vmatprep.subr.bf16.mxu0 %v7867_v21  ;;  %3647 = vmatprep.subr.bf16.mxu1 %v7872_v22 }
 0x87c   :  { %3607 = vmatpush1.bf16.msra.mxu0 %v7879_v23  ;;  %3648 = vmatpush1.bf16.msra.mxu1 %v7884_v24 }
 0x87d   :  { %3608 = vmatprep.subr.bf16.mxu0 %v7891_v25  ;;  %3649 = vmatprep.subr.bf16.mxu1 %v7896_v48 }
 0x880   :  { %3609 = vmatpush1.bf16.msra.mxu0 %v7903_v55  ;;  %3650 = vmatpush1.bf16.msra.mxu1 %v7908_v57 }
 0x881   :  { %3610 = vmatprep.subr.bf16.mxu0 %v7915_v49  ;;  %3651 = vmatprep.subr.bf16.mxu1 %v7920_v51 }
 0x884   :  { %3611 = vmatpush1.bf16.msra.mxu0 %v7927_v54  ;;  %3652 = vmatpush1.bf16.msra.mxu1 %v7932_v52 }
 0x885   :  { %3923 = vmatprep.subr.bf16.mxu0 %v7742_v11  ;;  %3964 = vmatprep.subr.bf16.mxu1 %v7750_v14 }
 0x907   :  { %v3024_v31 = vpop.f32.mrf.mxu0  ;;  %v3067_v37 = vpop.f32.mrf.mxu1 }
 0x908   :  { %v3025_v27 = vadd.f32 %v3024_v31, %v2813_v29  ;;  %v3068_v38 = vadd.f32 %v3067_v37, %v2821_v30 }
 0x909   :  { %v3026_v39 = vpop.f32.mrf.mxu0  ;;  %v3069_v40 = vpop.f32.mrf.mxu1 }
 0x90a   :  { %3076 = vst [vmem:[#allocation2 + $0x30] sm:$0xff] %v3025_v27  ;;  %3078 = vst [vmem:[#allocation2 + $0x18] sm:$0xff] %v3068_v38  ;;  %v3027_v34 = vadd.f32 %v3026_v39, %v2817_v32  ;;  %v3070_v36 = vadd.f32 %v3069_v40, %v2825_v35 }
 0x90b   :  { %v3028_v43 = vpop.f32.mrf.mxu0  ;;  %v3071_v3 = vpop.f32.mrf.mxu1 }
 0x90c   :  { %3077 = vst [vmem:[#allocation2] sm:$0xff] %v3027_v34  ;;  %3079 = vst [vmem:[#allocation2 + $0x10] sm:$0xff] %v3070_v36  ;;  %v3029_v50 = vadd.f32 %v3028_v43, %v2813_v29  ;;  %v3072_v13 = vadd.f32 %v3071_v3, %v2821_v30 }
 0x90d   :  { %v3030_v45 = vpop.f32.mrf.mxu0  ;;  %v3073_v41 = vpop.f32.mrf.mxu1 }
 0x90e   :  { %3080 = vst [vmem:[#allocation2 + $0x8] sm:$0xff] %v3029_v50  ;;  %3082 = vst [vmem:[#allocation2 + $0x28] sm:$0xff] %v3072_v13  ;;  %v3031_v42 = vadd.f32 %v3030_v45, %v2817_v32  ;;  %v3074_v53 = vadd.f32 %v3073_v41, %v2825_v35  ;;  %v3389_v13 = vld [vmem:[#allocation6] sm:$0x3] }
 0x910   :  { %3081 = vst [vmem:[#allocation2 + $0x20] sm:$0xff] %v3031_v42  ;;  %3083 = vst [vmem:[#allocation2 + $0x38] sm:$0xff] %v3074_v53 }
 0x911   :  { %v3086_v46 = vld [vmem:[#allocation2 + $0x30] sm:$0x3]  ;;  %v3088_v38 = vld [vmem:[#allocation2 + $0x18] sm:$0x3] }
 0x913   :  { %v3087_v61 = vld [vmem:[#allocation2] sm:$0x3]  ;;  %v3089_v32 = vld [vmem:[#allocation2 + $0x10] sm:$0x3] }
 0x927   :  { %v3318_v47 = vpop.f32.mrf.mxu0  ;;  %v3359_v58 = vpop.f32.mrf.mxu1 }
 0x928   :  { %v3366_v59 = vadd.f32 %v3318_v47, %v3086_v46  ;;  %v3368_v40 = vadd.f32 %v3359_v58, %v3088_v38 }
 0x929   :  { %v3320_v63 = vpop.f32.mrf.mxu0  ;;  %v3361_v56 = vpop.f32.mrf.mxu1 }
 0x92a   :  { %v6152_v44 = vmul.f32 -1.442695, %v3366_v59  ;;  %v3367_v26 = vadd.f32 %v3320_v63, %v3087_v61  ;;  %v3369_v35 = vadd.f32 %v3361_v56, %v3089_v32 }
 0x92b   :  { %v3322_v28 = vpop.f32.mrf.mxu0  ;;  %v3363_v29 = vpop.f32.mrf.mxu1 }
 0x92c   :  { %6825 = vpow2.f32 %v6152_v44  ;;  %v6153_v30 = vmul.f32 -1.442695, %v3367_v26  ;;  %v6154_v27 = vmul.f32 -1.442695, %v3369_v35  ;;  %v3398_v29 = vld [vmem:[#allocation2 + $0x30] sm:$0xc] }
 0x92d   :  { %v3323_v31 = vpop.f32.mrf.mxu0  ;;  %v3364_v37 = vpop.f32.mrf.mxu1  ;;  %v3399_v35 = vld [vmem:[#allocation2] sm:$0xc] }
 0x92e   :  { %6827 = vpow2.f32 %v6153_v30 }
 0x92f   :  { %6829 = vpow2.f32 %v6154_v27 }
 0x939   :  { %v6826_v39 = vpop.eup %6825 }
 0x93a   :  { %v3373_v34 = vadd.f32 1.0, %v6826_v39 }
 0x93b   :  { %v6828_v36 = vpop.eup %6827 }
 0x93c   :  { %6831 = vrcp.f32 %v3373_v34  ;;  %v3379_v43 = vadd.f32 1.0, %v6828_v36  ;;  %v6830_v3 = vpop.eup %6829 }
 0x93d   :  { %6833 = vtanh.f32 %v3368_v40  ;;  %v3386_v42 = vadd.f32 1.0, %v6830_v3 }
 0x93e   :  { %6835 = vrcp.f32 %v3379_v43 }
 0x93f   :  { %6837 = vrcp.f32 %v3386_v42 }
 0x949   :  { %v6832_v50 = vpop.eup %6831 }
 0x94a   :  { %v6834_v45 = vpop.eup %6833 }
 0x94b   :  { %v6836_v41 = vpop.eup %6835  ;;  %v3391_v53 = vmul.f32 %v6834_v45, %v6832_v50  ;;  %v3400_v45 = vld [vmem:[#allocation2 + $0x18] sm:$0xc] }
 0x94c   :  { %v3390_v46 = vmul.f32 %v6836_v41, %v3389_v13  ;;  %v6838_v58 = vpop.eup %6837 }
 0x94e   :  { %v3392_v47 = vadd.f32 %v3391_v53, %v3390_v46 }
 0x950   :  { %6839 = vtanh.f32 %v3392_v47  ;;  %3395 = vst [vmem:[#allocation6] sm:$0x3] %v3392_v47 }
 0x95d   :  { %v6840_v59 = vpop.eup %6839 }
 0x95e   :  { %v3394_v61 = vmul.f32 %v6840_v59, %v6838_v58  ;;  %v3713_v58 = vld [vmem:[#allocation6] sm:$0x3] }
 0x960   :  { %3397 = vst [vmem:[#allocation4] sm:$0x3] %v3394_v61  ;;  %3396 = vst [vmem:[#allocation5] sm:$0x3] %v3394_v61 }
 0x967   :  { %v3402_v63 = vld [vmem:[#allocation5] sm:$0x3] }
 0x968   :  { %v3403_v56 = vpack.c.bf16 %v3402_v63, %v3402_v63 }
 0x96a   :  { %3629 = vmatmul.mubr.bf16.vlgmr.msra.gmra.mxu0 %v3403_v56  ;;  %3670 = vmatmul.mubr.bf16.vlgmr.msra.gmra.mxu1 %v3403_v56  ;;  %v3715_v56 = vrot.slane %v3713_v58, 6  ;;  %v8085_v58 = vld [vmem:[%s8394_s5 + $0xcc] ss:$16 sps:$4 sm:$0xff]  }
 0x96b   :  { %3924 = vmatpush1.bf16.msra.mxu0 %v7759_v60  ;;  %3965 = vmatpush1.bf16.msra.mxu1 %v7764_v62 }
 0x96c   :  { %3925 = vmatprep.subr.bf16.mxu0 %v7769_v0  ;;  %3966 = vmatprep.subr.bf16.mxu1 %v7774_v4 }
 0x96d   :  { %3955 = vmatprep.mubr.bf16.mxu0 %v6961_v1  ;;  %3996 = vmatprep.mubr.bf16.mxu1 %v6961_v1 }
 0x96f   :  { %3926 = vmatpush1.bf16.msra.mxu0 %v7781_v6  ;;  %3967 = vmatpush1.bf16.msra.mxu1 %v7786_v9 }
 0x970   :  { %3927 = vmatprep.subr.bf16.mxu0 %v7793_v10  ;;  %3968 = vmatprep.subr.bf16.mxu1 %v7798_v33 }
 0x973   :  { %3928 = vmatpush1.bf16.msra.mxu0 %v7807_v5  ;;  %3969 = vmatpush1.bf16.msra.mxu1 %v7812_v7 }
 0x974   :  { %3929 = vmatprep.subr.bf16.mxu0 %v7819_v8  ;;  %3970 = vmatprep.subr.bf16.mxu1 %v7824_v12 }
 0x977   :  { %3930 = vmatpush1.bf16.msra.mxu0 %v7831_v15  ;;  %3971 = vmatpush1.bf16.msra.mxu1 %v7836_v16 }
 0x978   :  { %3931 = vmatprep.subr.bf16.mxu0 %v7843_v17  ;;  %3972 = vmatprep.subr.bf16.mxu1 %v7848_v18 }
 0x97b   :  { %3932 = vmatpush1.bf16.msra.mxu0 %v7855_v19  ;;  %3973 = vmatpush1.bf16.msra.mxu1 %v7860_v20 }
 0x97c   :  { %3933 = vmatprep.subr.bf16.mxu0 %v7867_v21  ;;  %3974 = vmatprep.subr.bf16.mxu1 %v7872_v22 }
 0x97f   :  { %3934 = vmatpush1.bf16.msra.mxu0 %v7879_v23  ;;  %3975 = vmatpush1.bf16.msra.mxu1 %v7884_v24 }
 0x980   :  { %3935 = vmatprep.subr.bf16.mxu0 %v7891_v25  ;;  %3976 = vmatprep.subr.bf16.mxu1 %v7896_v48 }
 0x983   :  { %3936 = vmatpush1.bf16.msra.mxu0 %v7903_v55  ;;  %3977 = vmatpush1.bf16.msra.mxu1 %v7908_v57 }
 0x984   :  { %3937 = vmatprep.subr.bf16.mxu0 %v7915_v49  ;;  %3978 = vmatprep.subr.bf16.mxu1 %v7920_v51 }
 0x987   :  { %3938 = vmatpush1.bf16.msra.mxu0 %v7927_v54  ;;  %3979 = vmatpush1.bf16.msra.mxu1 %v7932_v52 }
 0x988   :  { %4250 = vmatprep.subr.bf16.mxu0 %v7742_v11  ;;  %4291 = vmatprep.subr.bf16.mxu1 %v7750_v14  ;;  %v3401_v14 = vld [vmem:[#allocation2 + $0x10] sm:$0xc] }
 0xa2a   :  { %v3630_v44 = vpop.f32.mrf.mxu0  ;;  %v3671_v26 = vpop.f32.mrf.mxu1 }
 0xa2b   :  { %v3682_v28 = vrot.slane %v3630_v44, 6  ;;  %v3684_v50 = vrot.slane %v3671_v26, 6 }
 0xa2c   :  { %v3632_v30 = vpop.f32.mrf.mxu0  ;;  %v3673_v31 = vpop.f32.mrf.mxu1 }
 0xa2d   :  { %v3690_v37 = vadd.f32 %v3682_v28, %v3398_v29  ;;  %v3683_v32 = vrot.slane %v3632_v30, 6  ;;  %v3685_v11 = vrot.slane %v3673_v31, 6  ;;  %v3692_v42 = vadd.f32 %v3684_v50, %v3400_v45 }
 0xa2e   :  { %v3634_v27 = vpop.f32.mrf.mxu0  ;;  %v3675_v38 = vpop.f32.mrf.mxu1 }
 0xa2f   :  { %v6187_v39 = vmul.f32 -1.442695, %v3690_v37  ;;  %v3691_v40 = vadd.f32 %v3683_v32, %v3399_v35  ;;  %v3693_v3 = vadd.f32 %v3685_v11, %v3401_v14 }
 0xa30   :  { %v3635_v34 = vpop.f32.mrf.mxu0  ;;  %v3676_v36 = vpop.f32.mrf.mxu1 }
 0xa31   :  { %6841 = vpow2.f32 %v6187_v39  ;;  %v6188_v43 = vmul.f32 -1.442695, %v3691_v40  ;;  %v6189_v13 = vmul.f32 -1.442695, %v3693_v3 }
 0xa33   :  { %6843 = vpow2.f32 %v6188_v43 }
 0xa34   :  { %6845 = vpow2.f32 %v6189_v13 }
 0xa3e   :  { %v6842_v41 = vpop.eup %6841 }
 0xa3f   :  { %v3697_v53 = vadd.f32 1.0, %v6842_v41  ;;  %v8056_v41 = vld [vmem:[%s8394_s5 + $0xe4] ss:$16 sps:$4 sm:$0xff]  }
 0xa40   :  { %v6844_v46 = vpop.eup %6843 }
 0xa41   :  { %6847 = vrcp.f32 %v3697_v53  ;;  %v3703_v47 = vadd.f32 1.0, %v6844_v46  ;;  %v6846_v59 = vpop.eup %6845  ;;  %v8066_v53 = vld [vmem:[%s8394_s5 + $0xe0] ss:$16 sps:$4 sm:$0xff]   ;;  %v8071_v46 = vld [vmem:[%s8394_s5 + $0xe8] ss:$16 sps:$4 sm:$0xff]  }
 0xa42   :  { %6849 = vtanh.f32 %v3692_v42  ;;  %v3710_v28 = vadd.f32 1.0, %v6846_v59  ;;  %v8061_v42 = vld [vmem:[%s8394_s5 + $0xec] ss:$16 sps:$4 sm:$0xff]   ;;  %v8090_v59 = vld [vmem:[%s8394_s5 + $0xc0] ss:$16 sps:$4 sm:$0xff]  }
 0xa43   :  { %6851 = vrcp.f32 %v3703_v47  ;;  %v8080_v47 = vld [vmem:[%s8394_s5 + $0xc4] ss:$16 sps:$4 sm:$0xff]  }
 0xa44   :  { %6853 = vrcp.f32 %v3710_v28  ;;  %v8119_v28 = vld [vmem:[%s8394_s5 + $0xa8] ss:$16 sps:$4 sm:$0xff]  }
 0xa4e   :  { %v6848_v61 = vpop.eup %6847 }
 0xa4f   :  { %v6850_v63 = vpop.eup %6849 }
 0xa50   :  { %v6852_v44 = vpop.eup %6851  ;;  %v3718_v29 = vmul.f32 %v6850_v63, %v6848_v61  ;;  %v8095_v61 = vld [vmem:[%s8394_s5 + $0xc8] ss:$16 sps:$4 sm:$0xff]   ;;  %v8104_v63 = vld [vmem:[%s8394_s5 + $0xa4] ss:$16 sps:$4 sm:$0xff]  }
 0xa51   :  { %v3717_v26 = vmul.f32 %v6852_v44, %v3715_v56  ;;  %v6854_v31 = vpop.eup %6853  ;;  %v8109_v56 = vld [vmem:[%s8394_s5 + $0xac] ss:$16 sps:$4 sm:$0xff]   ;;  %v8114_v44 = vld [vmem:[%s8394_s5 + $0xa0] ss:$16 sps:$4 sm:$0xff]  }
 0xa53   :  { %v3719_v30 = vadd.f32 %v3718_v29, %v3717_v26  ;;  %v8128_v29 = vld [vmem:[%s8394_s5 + $0x84] ss:$16 sps:$4 sm:$0xff]   ;;  %v8133_v26 = vld [vmem:[%s8394_s5 + $0x8c] ss:$16 sps:$4 sm:$0xff]  }
 0xa55   :  { %6855 = vtanh.f32 %v3719_v30  ;;  %3722 = vst [vmem:[#allocation6 - $0x2] sm:$0xc] %v3719_v30  ;;  %v8138_v30 = vld [vmem:[%s8394_s5 + $0x80] ss:$16 sps:$4 sm:$0xff]  }
 0xa62   :  { %v6856_v37 = vpop.eup %6855 }
 0xa63   :  { %v3721_v32 = vmul.f32 %v6856_v37, %v6854_v31  ;;  %v8143_v31 = vld [vmem:[%s8394_s5 + $0x88] ss:$16 sps:$4 sm:$0xff]   ;;  %v8152_v37 = vld [vmem:[%s8394_s5 + $0x64] ss:$16 sps:$4 sm:$0xff]  }
 0xa65   :  { %3724 = vst [vmem:[#allocation4] sm:$0xc] %v3721_v32  ;;  %3723 = vst [vmem:[#allocation5 - $0x2] sm:$0xc] %v3721_v32  ;;  %v8157_v32 = vld [vmem:[%s8394_s5 + $0x6c] ss:$16 sps:$4 sm:$0xff]  }
 0xa6c   :  { %v3729_v35 = vld [vmem:[#allocation5] sm:$0x3] }
 0xa6d   :  { %v3730_v27 = vpack.c.bf16 %v3729_v35, %v3729_v35  ;;  %v8162_v35 = vld [vmem:[%s8394_s5 + $0x60] ss:$16 sps:$4 sm:$0xff]  }
 0xa6f   :  { %3956 = vmatmul.mubr.bf16.vlgmr.msra.gmra.mxu0 %v3730_v27  ;;  %3997 = vmatmul.mubr.bf16.vlgmr.msra.gmra.mxu1 %v3730_v27  ;;  %v8167_v27 = vld [vmem:[%s8394_s5 + $0x68] ss:$16 sps:$4 sm:$0xff]  }
 0xa70   :  { %4251 = vmatpush1.bf16.msra.mxu0 %v7759_v60  ;;  %4292 = vmatpush1.bf16.msra.mxu1 %v7764_v62 }
 0xa71   :  { %4252 = vmatprep.subr.bf16.mxu0 %v7769_v0  ;;  %4293 = vmatprep.subr.bf16.mxu1 %v7774_v4  ;;  %v3725_v4 = vld [vmem:[#allocation2 + $0x30] sm:$0x30] }
 0xa72   :  { %4282 = vmatprep.mubr.bf16.mxu0 %v6961_v1  ;;  %4323 = vmatprep.mubr.bf16.mxu1 %v6961_v1 }
 0xa74   :  { %4253 = vmatpush1.bf16.msra.mxu0 %v7781_v6  ;;  %4294 = vmatpush1.bf16.msra.mxu1 %v7786_v9 }
 0xa75   :  { %4254 = vmatprep.subr.bf16.mxu0 %v7793_v10  ;;  %4295 = vmatprep.subr.bf16.mxu1 %v7798_v33 }
 0xa78   :  { %4255 = vmatpush1.bf16.msra.mxu0 %v7807_v5  ;;  %4296 = vmatpush1.bf16.msra.mxu1 %v7812_v7  ;;  %v3726_v5 = vld [vmem:[#allocation2] sm:$0x30] }
 0xa79   :  { %4256 = vmatprep.subr.bf16.mxu0 %v7819_v8  ;;  %4297 = vmatprep.subr.bf16.mxu1 %v7824_v12 }
 0xa7c   :  { %4257 = vmatpush1.bf16.msra.mxu0 %v7831_v15  ;;  %4298 = vmatpush1.bf16.msra.mxu1 %v7836_v16 }
 0xa7d   :  { %4258 = vmatprep.subr.bf16.mxu0 %v7843_v17  ;;  %4299 = vmatprep.subr.bf16.mxu1 %v7848_v18 }
 0xa80   :  { %4259 = vmatpush1.bf16.msra.mxu0 %v7855_v19  ;;  %4300 = vmatpush1.bf16.msra.mxu1 %v7860_v20  ;;  %v3728_v20 = vld [vmem:[#allocation2 + $0x10] sm:$0x30] }
 0xa81   :  { %4260 = vmatprep.subr.bf16.mxu0 %v7867_v21  ;;  %4301 = vmatprep.subr.bf16.mxu1 %v7872_v22 }
 0xa84   :  { %4261 = vmatpush1.bf16.msra.mxu0 %v7879_v23  ;;  %4302 = vmatpush1.bf16.msra.mxu1 %v7884_v24  ;;  %v3727_v24 = vld [vmem:[#allocation2 + $0x18] sm:$0x30] }
 0xa85   :  { %4262 = vmatprep.subr.bf16.mxu0 %v7891_v25  ;;  %4303 = vmatprep.subr.bf16.mxu1 %v7896_v48 }
 0xa88   :  { %4263 = vmatpush1.bf16.msra.mxu0 %v7903_v55  ;;  %4304 = vmatpush1.bf16.msra.mxu1 %v7908_v57 }
 0xa89   :  { %4264 = vmatprep.subr.bf16.mxu0 %v7915_v49  ;;  %4305 = vmatprep.subr.bf16.mxu1 %v7920_v51  ;;  %v4040_v51 = vld [vmem:[#allocation6] sm:$0x3] }
 0xa8a   :  { %v4042_v39 = vrot.slane %v4040_v51, 4 }
 0xa8c   :  { %4265 = vmatpush1.bf16.msra.mxu0 %v7927_v54  ;;  %4306 = vmatpush1.bf16.msra.mxu1 %v7932_v52 }
 0xa8d   :  { %4577 = vmatprep.subr.bf16.mxu0 %v8056_v41  ;;  %4618 = vmatprep.subr.bf16.mxu1 %v8061_v42 }
 0xb2f   :  { %v3957_v60 = vpop.f32.mrf.mxu0  ;;  %v3998_v62 = vpop.f32.mrf.mxu1 }
 0xb30   :  { %v4009_v0 = vrot.slane %v3957_v60, 4  ;;  %v4011_v22 = vrot.slane %v3998_v62, 4  ;;  %v8176_v60 = vld [vmem:[%s8394_s5 + $0x44] ss:$16 sps:$4 sm:$0xff]   ;;  %v8181_v62 = vld [vmem:[%s8394_s5 + $0x4c] ss:$16 sps:$4 sm:$0xff]  }
 0xb31   :  { %v3959_v6 = vpop.f32.mrf.mxu0  ;;  %v4000_v9 = vpop.f32.mrf.mxu1 }
 0xb32   :  { %v4017_v10 = vadd.f32 %v4009_v0, %v3725_v4  ;;  %v4010_v33 = vrot.slane %v3959_v6, 4  ;;  %v4012_v19 = vrot.slane %v4000_v9, 4  ;;  %v4019_v48 = vadd.f32 %v4011_v22, %v3727_v24  ;;  %v8186_v0 = vld [vmem:[%s8394_s5 + $0x40] ss:$16 sps:$4 sm:$0xff]   ;;  %v8191_v4 = vld [vmem:[%s8394_s5 + $0x48] ss:$16 sps:$4 sm:$0xff]  }
 0xb33   :  { %v3961_v7 = vpop.f32.mrf.mxu0  ;;  %v4002_v8 = vpop.f32.mrf.mxu1  ;;  %v8198_v6 = vld [vmem:[%s8394_s5 + $0x24] ss:$16 sps:$4 sm:$0xff]   ;;  %v8203_v9 = vld [vmem:[%s8394_s5 + $0x2c] ss:$16 sps:$4 sm:$0xff]  }
 0xb34   :  { %v6222_v12 = vmul.f32 -1.442695, %v4017_v10  ;;  %v4018_v15 = vadd.f32 %v4010_v33, %v3726_v5  ;;  %v4020_v21 = vadd.f32 %v4012_v19, %v3728_v20  ;;  %v8210_v10 = vld [vmem:[%s8394_s5 + $0x20] ss:$16 sps:$4 sm:$0xff]   ;;  %v8215_v33 = vld [vmem:[%s8394_s5 + $0x28] ss:$16 sps:$4 sm:$0xff]  }
 0xb35   :  { %v3962_v16 = vpop.f32.mrf.mxu0  ;;  %v4003_v17 = vpop.f32.mrf.mxu1  ;;  %v8222_v5 = vld [vmem:[%s8394_s5 + $0x4] ss:$16 sps:$4 sm:$0xff]   ;;  %v8227_v7 = vld [vmem:[%s8394_s5 + $0xc] ss:$16 sps:$4 sm:$0xff]   ;;  %v8234_v8 = vld [vmem:[%s8394_s5] ss:$16 sps:$4 sm:$0xff]  }
 0xb36   :  { %6857 = vpow2.f32 %v6222_v12  ;;  %v6223_v18 = vmul.f32 -1.442695, %v4018_v15  ;;  %v6224_v23 = vmul.f32 -1.442695, %v4020_v21  ;;  %v8239_v12 = vld [vmem:[%s8394_s5 + $0x8] ss:$16 sps:$4 sm:$0xff]  }
 0xb38   :  { %6859 = vpow2.f32 %v6223_v18  ;;  %v4052_v18 = vld [vmem:[#allocation2 + $0x30] sm:$0xc0] }
 0xb39   :  { %6861 = vpow2.f32 %v6224_v23  ;;  %v4053_v23 = vld [vmem:[#allocation2] sm:$0xc0] }
 0xb43   :  { %v6858_v25 = vpop.eup %6857 }
 0xb44   :  { %v4024_v55 = vadd.f32 1.0, %v6858_v25 }
 0xb45   :  { %v6860_v57 = vpop.eup %6859 }
 0xb46   :  { %6863 = vrcp.f32 %v4024_v55  ;;  %v4030_v49 = vadd.f32 1.0, %v6860_v57  ;;  %v6862_v54 = vpop.eup %6861 }
 0xb47   :  { %6865 = vtanh.f32 %v4019_v48  ;;  %v4037_v34 = vadd.f32 1.0, %v6862_v54 }
 0xb48   :  { %6867 = vrcp.f32 %v4030_v49 }
 0xb49   :  { %6869 = vrcp.f32 %v4037_v34  ;;  %v4054_v34 = vld [vmem:[#allocation2 + $0x18] sm:$0xc0] }
 0xb53   :  { %v6864_v52 = vpop.eup %6863 }
 0xb54   :  { %v6866_v38 = vpop.eup %6865 }
 0xb55   :  { %v6868_v40 = vpop.eup %6867  ;;  %v4045_v36 = vmul.f32 %v6866_v38, %v6864_v52  ;;  %v4055_v52 = vld [vmem:[#allocation2 + $0x10] sm:$0xc0] }
 0xb56   :  { %v4044_v43 = vmul.f32 %v6868_v40, %v4042_v39  ;;  %v6870_v14 = vpop.eup %6869 }
 0xb58   :  { %v4046_v11 = vadd.f32 %v4045_v36, %v4044_v43 }
 0xb5a   :  { %6871 = vtanh.f32 %v4046_v11  ;;  %4049 = vst [vmem:[#allocation6 - $0x4] sm:$0x30] %v4046_v11 }
 0xb67   :  { %v6872_v3 = vpop.eup %6871 }
 0xb68   :  { %v4048_v50 = vmul.f32 %v6872_v3, %v6870_v14 }
 0xb6a   :  { %4051 = vst [vmem:[#allocation4] sm:$0x30] %v4048_v50  ;;  %4050 = vst [vmem:[#allocation5 - $0x4] sm:$0x30] %v4048_v50  ;;  %v4367_v50 = vld [vmem:[#allocation6] sm:$0x3] }
 0xb71   :  { %v4056_v13 = vld [vmem:[#allocation5] sm:$0x3] }
 0xb72   :  { %v4057_v45 = vpack.c.bf16 %v4056_v13, %v4056_v13 }
 0xb74   :  { %4283 = vmatmul.mubr.bf16.vlgmr.msra.gmra.mxu0 %v4057_v45  ;;  %4324 = vmatmul.mubr.bf16.vlgmr.msra.gmra.mxu1 %v4057_v45 }
 0xb75   :  { %4609 = vmatprep.mubr.bf16.mxu0 %v6961_v1  ;;  %4650 = vmatprep.mubr.bf16.mxu1 %v6961_v1 }
 0xb76   :  { %4578 = vmatpush1.bf16.msra.mxu0 %v8066_v53  ;;  %4619 = vmatpush1.bf16.msra.mxu1 %v8071_v46 }
 0xb77   :  { %4579 = vmatprep.subr.bf16.mxu0 %v8080_v47  ;;  %4620 = vmatprep.subr.bf16.mxu1 %v8085_v58 }
 0xb7a   :  { %4580 = vmatpush1.bf16.msra.mxu0 %v8090_v59  ;;  %4621 = vmatpush1.bf16.msra.mxu1 %v8095_v61 }
 0xb7b   :  { %4581 = vmatprep.subr.bf16.mxu0 %v8104_v63  ;;  %4622 = vmatprep.subr.bf16.mxu1 %v8109_v56 }
 0xb7e   :  { %4582 = vmatpush1.bf16.msra.mxu0 %v8114_v44  ;;  %4623 = vmatpush1.bf16.msra.mxu1 %v8119_v28 }
 0xb7f   :  { %4583 = vmatprep.subr.bf16.mxu0 %v8128_v29  ;;  %4624 = vmatprep.subr.bf16.mxu1 %v8133_v26 }
 0xb82   :  { %4584 = vmatpush1.bf16.msra.mxu0 %v8138_v30  ;;  %4625 = vmatpush1.bf16.msra.mxu1 %v8143_v31 }
 0xb83   :  { %4585 = vmatprep.subr.bf16.mxu0 %v8152_v37  ;;  %4626 = vmatprep.subr.bf16.mxu1 %v8157_v32 }
 0xb86   :  { %4586 = vmatpush1.bf16.msra.mxu0 %v8162_v35  ;;  %4627 = vmatpush1.bf16.msra.mxu1 %v8167_v27 }
 0xb87   :  { %4587 = vmatprep.subr.bf16.mxu0 %v8176_v60  ;;  %4628 = vmatprep.subr.bf16.mxu1 %v8181_v62 }
 0xb8a   :  { %4588 = vmatpush1.bf16.msra.mxu0 %v8186_v0  ;;  %4629 = vmatpush1.bf16.msra.mxu1 %v8191_v4 }
 0xb8b   :  { %4589 = vmatprep.subr.bf16.mxu0 %v8198_v6  ;;  %4630 = vmatprep.subr.bf16.mxu1 %v8203_v9 }
 0xb8e   :  { %4590 = vmatpush1.bf16.msra.mxu0 %v8210_v10  ;;  %4631 = vmatpush1.bf16.msra.mxu1 %v8215_v33 }
 0xb8f   :  { %4591 = vmatprep.subr.bf16.mxu0 %v8222_v5  ;;  %4632 = vmatprep.subr.bf16.mxu1 %v8227_v7 }
 0xb92   :  { %4592 = vmatpush1.bf16.msra.mxu0 %v8234_v8  ;;  %4633 = vmatpush1.bf16.msra.mxu1 %v8239_v12 }
 0xb93   :  { %4889 = vmatprep.subr.bf16.mxu0 %v8056_v41  ;;  %4930 = vmatprep.subr.bf16.mxu1 %v8061_v42 }
 0xc34   :  { %v4284_v15 = vpop.f32.mrf.mxu0  ;;  %v4325_v16 = vpop.f32.mrf.mxu1 }
 0xc35   :  { %v4336_v17 = vrot.slane %v4284_v15, 2  ;;  %v4338_v39 = vrot.slane %v4325_v16, 2 }
 0xc36   :  { %v4286_v19 = vpop.f32.mrf.mxu0  ;;  %v4327_v20 = vpop.f32.mrf.mxu1 }
 0xc37   :  { %v4344_v21 = vadd.f32 %v4336_v17, %v4052_v18  ;;  %v4337_v22 = vrot.slane %v4286_v19, 2  ;;  %v4339_v54 = vrot.slane %v4327_v20, 2  ;;  %v4346_v43 = vadd.f32 %v4338_v39, %v4054_v34 }
 0xc38   :  { %v4288_v24 = vpop.f32.mrf.mxu0  ;;  %v4329_v25 = vpop.f32.mrf.mxu1  ;;  %v4369_v17 = vrot.slane %v4367_v50, 2 }
 0xc39   :  { %v6257_v48 = vmul.f32 -1.442695, %v4344_v21  ;;  %v4345_v55 = vadd.f32 %v4337_v22, %v4053_v23  ;;  %v4347_v38 = vadd.f32 %v4339_v54, %v4055_v52  ;;  %v4380_v54 = vld [vmem:[#allocation2 + $0x20] sm:$0x3] }
 0xc3a   :  { %v4289_v57 = vpop.f32.mrf.mxu0  ;;  %v4330_v49 = vpop.f32.mrf.mxu1 }
 0xc3b   :  { %6873 = vpow2.f32 %v6257_v48  ;;  %v6258_v51 = vmul.f32 -1.442695, %v4345_v55  ;;  %v6259_v40 = vmul.f32 -1.442695, %v4347_v38  ;;  %v4379_v55 = vld [vmem:[#allocation2 + $0x8] sm:$0x3] }
 0xc3d   :  { %6875 = vpow2.f32 %v6258_v51 }
 0xc3e   :  { %6877 = vpow2.f32 %v6259_v40 }
 0xc48   :  { %v6874_v36 = vpop.eup %6873 }
 0xc49   :  { %v4351_v11 = vadd.f32 1.0, %v6874_v36 }
 0xc4a   :  { %v6876_v14 = vpop.eup %6875 }
 0xc4b   :  { %6879 = vrcp.f32 %v4351_v11  ;;  %v4357_v3 = vadd.f32 1.0, %v6876_v14  ;;  %v6878_v13 = vpop.eup %6877 }
 0xc4c   :  { %6881 = vtanh.f32 %v4346_v43  ;;  %v4364_v19 = vadd.f32 1.0, %v6878_v13 }
 0xc4d   :  { %6883 = vrcp.f32 %v4357_v3  ;;  %v4382_v3 = vld [vmem:[#allocation2 + $0x38] sm:$0x3] }
 0xc4e   :  { %6885 = vrcp.f32 %v4364_v19 }
 0xc58   :  { %v6880_v45 = vpop.eup %6879 }
 0xc59   :  { %v6882_v15 = vpop.eup %6881 }
 0xc5a   :  { %v6884_v18 = vpop.eup %6883  ;;  %v4372_v20 = vmul.f32 %v6882_v15, %v6880_v45  ;;  %v4381_v45 = vld [vmem:[#allocation2 + $0x28] sm:$0x3] }
 0xc5b   :  { %v4371_v16 = vmul.f32 %v6884_v18, %v4369_v17  ;;  %v6886_v22 = vpop.eup %6885 }
 0xc5d   :  { %v4373_v21 = vadd.f32 %v4372_v20, %v4371_v16 }
 0xc5f   :  { %6887 = vtanh.f32 %v4373_v21  ;;  %4376 = vst [vmem:[#allocation6 - $0x6] sm:$0xc0] %v4373_v21 }
 0xc6c   :  { %v6888_v23 = vpop.eup %6887 }
 0xc6d   :  { %v4375_v24 = vmul.f32 %v6888_v23, %v6886_v22 }
 0xc6f   :  { %4378 = vst [vmem:[#allocation4] sm:$0xc0] %v4375_v24  ;;  %4377 = vst [vmem:[#allocation5 - $0x6] sm:$0xc0] %v4375_v24  ;;  %v4682_v24 = vld [vmem:[#allocation6] sm:$0x3] }
 0xc76   :  { %v4383_v25 = vld [vmem:[#allocation5] sm:$0x3] }
 0xc77   :  { %v4384_v48 = vpack.c.bf16 %v4383_v25, %v4383_v25 }
 0xc79   :  { %4610 = vmatmul.mubr.bf16.vlgmr.msra.gmra.mxu0 %v4384_v48  ;;  %4651 = vmatmul.mubr.bf16.vlgmr.msra.gmra.mxu1 %v4384_v48 }
 0xc7a   :  { %4890 = vmatpush1.bf16.msra.mxu0 %v8066_v53  ;;  %4931 = vmatpush1.bf16.msra.mxu1 %v8071_v46 }
 0xc7b   :  { %4891 = vmatprep.subr.bf16.mxu0 %v8080_v47  ;;  %4932 = vmatprep.subr.bf16.mxu1 %v8085_v58 }
 0xc7c   :  { %4921 = vmatprep.mubr.bf16.mxu0 %v6961_v1  ;;  %4962 = vmatprep.mubr.bf16.mxu1 %v6961_v1 }
 0xc7e   :  { %4892 = vmatpush1.bf16.msra.mxu0 %v8090_v59  ;;  %4933 = vmatpush1.bf16.msra.mxu1 %v8095_v61 }
 0xc7f   :  { %4893 = vmatprep.subr.bf16.mxu0 %v8104_v63  ;;  %4934 = vmatprep.subr.bf16.mxu1 %v8109_v56 }
 0xc82   :  { %4894 = vmatpush1.bf16.msra.mxu0 %v8114_v44  ;;  %4935 = vmatpush1.bf16.msra.mxu1 %v8119_v28 }
 0xc83   :  { %4895 = vmatprep.subr.bf16.mxu0 %v8128_v29  ;;  %4936 = vmatprep.subr.bf16.mxu1 %v8133_v26 }
 0xc86   :  { %4896 = vmatpush1.bf16.msra.mxu0 %v8138_v30  ;;  %4937 = vmatpush1.bf16.msra.mxu1 %v8143_v31 }
 0xc87   :  { %4897 = vmatprep.subr.bf16.mxu0 %v8152_v37  ;;  %4938 = vmatprep.subr.bf16.mxu1 %v8157_v32 }
 0xc8a   :  { %4898 = vmatpush1.bf16.msra.mxu0 %v8162_v35  ;;  %4939 = vmatpush1.bf16.msra.mxu1 %v8167_v27 }
 0xc8b   :  { %4899 = vmatprep.subr.bf16.mxu0 %v8176_v60  ;;  %4940 = vmatprep.subr.bf16.mxu1 %v8181_v62 }
 0xc8e   :  { %4900 = vmatpush1.bf16.msra.mxu0 %v8186_v0  ;;  %4941 = vmatpush1.bf16.msra.mxu1 %v8191_v4 }
 0xc8f   :  { %4901 = vmatprep.subr.bf16.mxu0 %v8198_v6  ;;  %4942 = vmatprep.subr.bf16.mxu1 %v8203_v9 }
 0xc92   :  { %4902 = vmatpush1.bf16.msra.mxu0 %v8210_v10  ;;  %4943 = vmatpush1.bf16.msra.mxu1 %v8215_v33 }
 0xc93   :  { %4903 = vmatprep.subr.bf16.mxu0 %v8222_v5  ;;  %4944 = vmatprep.subr.bf16.mxu1 %v8227_v7 }
 0xc96   :  { %4904 = vmatpush1.bf16.msra.mxu0 %v8234_v8  ;;  %4945 = vmatpush1.bf16.msra.mxu1 %v8239_v12 }
 0xc97   :  { %5216 = vmatprep.subr.bf16.mxu0 %v8056_v41  ;;  %5257 = vmatprep.subr.bf16.mxu1 %v8061_v42 }
 0xd39   :  { %v4611_v57 = vpop.f32.mrf.mxu0  ;;  %v4652_v49 = vpop.f32.mrf.mxu1 }
 0xd3a   :  { %v4659_v51 = vadd.f32 %v4611_v57, %v4379_v55  ;;  %v4661_v17 = vadd.f32 %v4652_v49, %v4381_v45 }
 0xd3b   :  { %v4613_v52 = vpop.f32.mrf.mxu0  ;;  %v4654_v38 = vpop.f32.mrf.mxu1 }
 0xd3c   :  { %v6292_v39 = vmul.f32 -1.442695, %v4659_v51  ;;  %v4660_v40 = vadd.f32 %v4613_v52, %v4380_v54  ;;  %v4662_v50 = vadd.f32 %v4654_v38, %v4382_v3 }
 0xd3d   :  { %v4615_v34 = vpop.f32.mrf.mxu0  ;;  %v4656_v36 = vpop.f32.mrf.mxu1 }
 0xd3e   :  { %6889 = vpow2.f32 %v6292_v39  ;;  %v6293_v43 = vmul.f32 -1.442695, %v4660_v40  ;;  %v6294_v13 = vmul.f32 -1.442695, %v4662_v50  ;;  %v4691_v36 = vld [vmem:[#allocation2 + $0x8] sm:$0xc] }
 0xd3f   :  { %v4616_v11 = vpop.f32.mrf.mxu0  ;;  %v4657_v14 = vpop.f32.mrf.mxu1  ;;  %v4692_v50 = vld [vmem:[#allocation2 + $0x20] sm:$0xc] }
 0xd40   :  { %6891 = vpow2.f32 %v6293_v43 }
 0xd41   :  { %6893 = vpow2.f32 %v6294_v13 }
 0xd4b   :  { %v6890_v15 = vpop.eup %6889 }
 0xd4c   :  { %v4666_v18 = vadd.f32 1.0, %v6890_v15 }
 0xd4d   :  { %v6892_v19 = vpop.eup %6891 }
 0xd4e   :  { %6895 = vrcp.f32 %v4666_v18  ;;  %v4672_v20 = vadd.f32 1.0, %v6892_v19  ;;  %v6894_v16 = vpop.eup %6893 }
 0xd4f   :  { %6897 = vtanh.f32 %v4661_v17  ;;  %v4679_v25 = vadd.f32 1.0, %v6894_v16 }
 0xd50   :  { %6899 = vrcp.f32 %v4672_v20 }
 0xd51   :  { %6901 = vrcp.f32 %v4679_v25 }
 0xd5b   :  { %v6896_v21 = vpop.eup %6895 }
 0xd5c   :  { %v6898_v22 = vpop.eup %6897 }
 0xd5d   :  { %v6900_v23 = vpop.eup %6899  ;;  %v4684_v48 = vmul.f32 %v6898_v22, %v6896_v21 }
 0xd5e   :  { %v4683_v55 = vmul.f32 %v6900_v23, %v4682_v24  ;;  %v6902_v49 = vpop.eup %6901  ;;  %v4693_v23 = vld [vmem:[#allocation2 + $0x28] sm:$0xc] }
 0xd60   :  { %v4685_v57 = vadd.f32 %v4684_v48, %v4683_v55 }
 0xd62   :  { %6903 = vtanh.f32 %v4685_v57  ;;  %4688 = vst [vmem:[#allocation6] sm:$0x3] %v4685_v57 }
 0xd6f   :  { %v6904_v51 = vpop.eup %6903 }
 0xd70   :  { %v4687_v54 = vmul.f32 %v6904_v51, %v6902_v49  ;;  %v5006_v49 = vld [vmem:[#allocation6] sm:$0x3] }
 0xd72   :  { %4690 = vst [vmem:[#allocation4 + $0x8] sm:$0x3] %v4687_v54  ;;  %4689 = vst [vmem:[#allocation5] sm:$0x3] %v4687_v54 }
 0xd79   :  { %v4695_v52 = vld [vmem:[#allocation5] sm:$0x3] }
 0xd7a   :  { %v4696_v38 = vpack.c.bf16 %v4695_v52, %v4695_v52 }
 0xd7c   :  { %4922 = vmatmul.mubr.bf16.vlgmr.msra.gmra.mxu0 %v4696_v38  ;;  %4963 = vmatmul.mubr.bf16.vlgmr.msra.gmra.mxu1 %v4696_v38  ;;  %v5008_v38 = vrot.slane %v5006_v49, 6  ;;  %v6695_v49 = vld [vmem:[%s8396_s7 + $0x8] sm:$0xff]  }
 0xd7d   :  { %5217 = vmatpush1.bf16.msra.mxu0 %v8066_v53  ;;  %5258 = vmatpush1.bf16.msra.mxu1 %v8071_v46 }
 0xd7e   :  { %5218 = vmatprep.subr.bf16.mxu0 %v8080_v47  ;;  %5259 = vmatprep.subr.bf16.mxu1 %v8085_v58 }
 0xd7f   :  { %5248 = vmatprep.mubr.bf16.mxu0 %v6961_v1  ;;  %5289 = vmatprep.mubr.bf16.mxu1 %v6961_v1 }
 0xd81   :  { %5219 = vmatpush1.bf16.msra.mxu0 %v8090_v59  ;;  %5260 = vmatpush1.bf16.msra.mxu1 %v8095_v61 }
 0xd82   :  { %5220 = vmatprep.subr.bf16.mxu0 %v8104_v63  ;;  %5261 = vmatprep.subr.bf16.mxu1 %v8109_v56 }
 0xd85   :  { %5221 = vmatpush1.bf16.msra.mxu0 %v8114_v44  ;;  %5262 = vmatpush1.bf16.msra.mxu1 %v8119_v28 }
 0xd86   :  { %5222 = vmatprep.subr.bf16.mxu0 %v8128_v29  ;;  %5263 = vmatprep.subr.bf16.mxu1 %v8133_v26 }
 0xd89   :  { %5223 = vmatpush1.bf16.msra.mxu0 %v8138_v30  ;;  %5264 = vmatpush1.bf16.msra.mxu1 %v8143_v31 }
 0xd8a   :  { %5224 = vmatprep.subr.bf16.mxu0 %v8152_v37  ;;  %5265 = vmatprep.subr.bf16.mxu1 %v8157_v32 }
 0xd8d   :  { %5225 = vmatpush1.bf16.msra.mxu0 %v8162_v35  ;;  %5266 = vmatpush1.bf16.msra.mxu1 %v8167_v27 }
 0xd8e   :  { %5226 = vmatprep.subr.bf16.mxu0 %v8176_v60  ;;  %5267 = vmatprep.subr.bf16.mxu1 %v8181_v62 }
 0xd91   :  { %5227 = vmatpush1.bf16.msra.mxu0 %v8186_v0  ;;  %5268 = vmatpush1.bf16.msra.mxu1 %v8191_v4 }
 0xd92   :  { %5228 = vmatprep.subr.bf16.mxu0 %v8198_v6  ;;  %5269 = vmatprep.subr.bf16.mxu1 %v8203_v9 }
 0xd95   :  { %5229 = vmatpush1.bf16.msra.mxu0 %v8210_v10  ;;  %5270 = vmatpush1.bf16.msra.mxu1 %v8215_v33 }
 0xd96   :  { %5230 = vmatprep.subr.bf16.mxu0 %v8222_v5  ;;  %5271 = vmatprep.subr.bf16.mxu1 %v8227_v7 }
 0xd99   :  { %5231 = vmatpush1.bf16.msra.mxu0 %v8234_v8  ;;  %5272 = vmatpush1.bf16.msra.mxu1 %v8239_v12 }
 0xd9a   :  { %5543 = vmatprep.subr.bf16.mxu0 %v8056_v41  ;;  %5584 = vmatprep.subr.bf16.mxu1 %v8061_v42  ;;  %v4694_v42 = vld [vmem:[#allocation2 + $0x38] sm:$0xc] }
 0xe3c   :  { %v4923_v39 = vpop.f32.mrf.mxu0  ;;  %v4964_v40 = vpop.f32.mrf.mxu1 }
 0xe3d   :  { %v4975_v34 = vrot.slane %v4923_v39, 6  ;;  %v4977_v21 = vrot.slane %v4964_v40, 6 }
 0xe3e   :  { %v4925_v43 = vpop.f32.mrf.mxu0  ;;  %v4966_v11 = vpop.f32.mrf.mxu1 }
 0xe3f   :  { %v4983_v14 = vadd.f32 %v4975_v34, %v4691_v36  ;;  %v4976_v3 = vrot.slane %v4925_v43, 6  ;;  %v4978_v41 = vrot.slane %v4966_v11, 6  ;;  %v4985_v25 = vadd.f32 %v4977_v21, %v4693_v23  ;;  %v6689_v23 = vld [vmem:[%s8396_s7 + $0x38] sm:$0xff]  }
 0xe40   :  { %v4927_v13 = vpop.f32.mrf.mxu0  ;;  %v4968_v45 = vpop.f32.mrf.mxu1 }
 0xe41   :  { %v6327_v15 = vmul.f32 -1.442695, %v4983_v14  ;;  %v4984_v17 = vadd.f32 %v4976_v3, %v4692_v50  ;;  %v4986_v16 = vadd.f32 %v4978_v41, %v4694_v42 }
 0xe42   :  { %v4928_v18 = vpop.f32.mrf.mxu0  ;;  %v4969_v19 = vpop.f32.mrf.mxu1 }
 0xe43   :  { %6905 = vpow2.f32 %v6327_v15  ;;  %v6328_v20 = vmul.f32 -1.442695, %v4984_v17  ;;  %v6329_v22 = vmul.f32 -1.442695, %v4986_v16 }
 0xe45   :  { %6907 = vpow2.f32 %v6328_v20 }
 0xe46   :  { %6909 = vpow2.f32 %v6329_v22 }
 0xe50   :  { %v6906_v24 = vpop.eup %6905 }
 0xe51   :  { %v4990_v48 = vadd.f32 1.0, %v6906_v24  ;;  %v6690_v24 = vld [vmem:[%s8396_s7 + $0x30] sm:$0xff]  }
 0xe52   :  { %v6908_v55 = vpop.eup %6907 }
 0xe53   :  { %6911 = vrcp.f32 %v4990_v48  ;;  %v4996_v57 = vadd.f32 1.0, %v6908_v55  ;;  %v6910_v51 = vpop.eup %6909  ;;  %v6692_v48 = vld [vmem:[%s8396_s7 + $0x20] sm:$0xff]   ;;  %v6693_v55 = vld [vmem:[%s8396_s7 + $0x18] sm:$0xff]  }
 0xe54   :  { %6913 = vtanh.f32 %v4985_v25  ;;  %v5003_v34 = vadd.f32 1.0, %v6910_v51  ;;  %v6691_v25 = vld [vmem:[%s8396_s7 + $0x28] sm:$0xff]   ;;  %v6696_v51 = vld [vmem:[%s8396_s7] sm:$0xff]  }
 0xe55   :  { %6915 = vrcp.f32 %v4996_v57  ;;  %v6694_v57 = vld [vmem:[%s8396_s7 + $0x10] sm:$0xff]  }
 0xe56   :  { %6917 = vrcp.f32 %v5003_v34 }
 0xe60   :  { %v6912_v54 = vpop.eup %6911 }
 0xe61   :  { %v6914_v52 = vpop.eup %6913 }
 0xe62   :  { %v6916_v39 = vpop.eup %6915  ;;  %v5011_v36 = vmul.f32 %v6914_v52, %v6912_v54 }
 0xe63   :  { %v5010_v40 = vmul.f32 %v6916_v39, %v5008_v38  ;;  %v6918_v11 = vpop.eup %6917  ;;  %v5345_v39 = vld [vmem:[#allocation2 + $0x8] sm:$0xc0] }
 0xe65   :  { %v5012_v43 = vadd.f32 %v5011_v36, %v5010_v40 }
 0xe67   :  { %6919 = vtanh.f32 %v5012_v43  ;;  %5015 = vst [vmem:[#allocation6 - $0x2] sm:$0xc] %v5012_v43 }
 0xe74   :  { %v6920_v14 = vpop.eup %6919 }
 0xe75   :  { %v5014_v3 = vmul.f32 %v6920_v14, %v6918_v11  ;;  %v5346_v11 = vld [vmem:[#allocation2 + $0x20] sm:$0xc0] }
 0xe77   :  { %5017 = vst [vmem:[#allocation4 + $0x8] sm:$0xc] %v5014_v3  ;;  %5016 = vst [vmem:[#allocation5 - $0x2] sm:$0xc] %v5014_v3 }
 0xe7e   :  { %v5022_v50 = vld [vmem:[#allocation5] sm:$0x3] }
 0xe7f   :  { %v5023_v13 = vpack.c.bf16 %v5022_v50, %v5022_v50 }
 0xe81   :  { %5249 = vmatmul.mubr.bf16.vlgmr.msra.gmra.mxu0 %v5023_v13  ;;  %5290 = vmatmul.mubr.bf16.vlgmr.msra.gmra.mxu1 %v5023_v13 }
 0xe82   :  { %5544 = vmatpush1.bf16.msra.mxu0 %v8066_v53  ;;  %5585 = vmatpush1.bf16.msra.mxu1 %v8071_v46 }
 0xe83   :  { %5545 = vmatprep.subr.bf16.mxu0 %v8080_v47  ;;  %5586 = vmatprep.subr.bf16.mxu1 %v8085_v58  ;;  %v5018_v47 = vld [vmem:[#allocation2 + $0x8] sm:$0x30] }
 0xe84   :  { %5575 = vmatprep.mubr.bf16.mxu0 %v6961_v1  ;;  %5616 = vmatprep.mubr.bf16.mxu1 %v6961_v1 }
 0xe86   :  { %5546 = vmatpush1.bf16.msra.mxu0 %v8090_v59  ;;  %5587 = vmatpush1.bf16.msra.mxu1 %v8095_v61 }
 0xe87   :  { %5547 = vmatprep.subr.bf16.mxu0 %v8104_v63  ;;  %5588 = vmatprep.subr.bf16.mxu1 %v8109_v56  ;;  %v5019_v56 = vld [vmem:[#allocation2 + $0x20] sm:$0x30] }
 0xe8a   :  { %5548 = vmatpush1.bf16.msra.mxu0 %v8114_v44  ;;  %5589 = vmatpush1.bf16.msra.mxu1 %v8119_v28 }
 0xe8b   :  { %5549 = vmatprep.subr.bf16.mxu0 %v8128_v29  ;;  %5590 = vmatprep.subr.bf16.mxu1 %v8133_v26 }
 0xe8e   :  { %5550 = vmatpush1.bf16.msra.mxu0 %v8138_v30  ;;  %5591 = vmatpush1.bf16.msra.mxu1 %v8143_v31 }
 0xe8f   :  { %5551 = vmatprep.subr.bf16.mxu0 %v8152_v37  ;;  %5592 = vmatprep.subr.bf16.mxu1 %v8157_v32 }
 0xe92   :  { %5552 = vmatpush1.bf16.msra.mxu0 %v8162_v35  ;;  %5593 = vmatpush1.bf16.msra.mxu1 %v8167_v27  ;;  %v5021_v35 = vld [vmem:[#allocation2 + $0x38] sm:$0x30] }
 0xe93   :  { %5553 = vmatprep.subr.bf16.mxu0 %v8176_v60  ;;  %5594 = vmatprep.subr.bf16.mxu1 %v8181_v62 }
 0xe96   :  { %5554 = vmatpush1.bf16.msra.mxu0 %v8186_v0  ;;  %5595 = vmatpush1.bf16.msra.mxu1 %v8191_v4  ;;  %v5020_v0 = vld [vmem:[#allocation2 + $0x28] sm:$0x30] }
 0xe97   :  { %5555 = vmatprep.subr.bf16.mxu0 %v8198_v6  ;;  %5596 = vmatprep.subr.bf16.mxu1 %v8203_v9 }
 0xe9a   :  { %5556 = vmatpush1.bf16.msra.mxu0 %v8210_v10  ;;  %5597 = vmatpush1.bf16.msra.mxu1 %v8215_v33 }
 0xe9b   :  { %5557 = vmatprep.subr.bf16.mxu0 %v8222_v5  ;;  %5598 = vmatprep.subr.bf16.mxu1 %v8227_v7  ;;  %v5333_v5 = vld [vmem:[#allocation6] sm:$0x3] }
 0xe9c   :  { %v5335_v45 = vrot.slane %v5333_v5, 4 }
 0xe9e   :  { %5558 = vmatpush1.bf16.msra.mxu0 %v8234_v8  ;;  %5599 = vmatpush1.bf16.msra.mxu1 %v8239_v12 }
 0xe9f   :  { %6419 = vmatprep.subr.bf16.mxu0 %v6962_v2 }
 0xf41   :  { %v5250_v1 = vpop.f32.mrf.mxu0  ;;  %v5291_v53 = vpop.f32.mrf.mxu1 }
 0xf42   :  { %v5302_v46 = vrot.slane %v5250_v1, 4  ;;  %v5304_v60 = vrot.slane %v5291_v53, 4 }
 0xf43   :  { %v5252_v58 = vpop.f32.mrf.mxu0  ;;  %v5293_v59 = vpop.f32.mrf.mxu1 }
 0xf44   :  { %v5310_v61 = vadd.f32 %v5302_v46, %v5018_v47  ;;  %v5303_v63 = vrot.slane %v5252_v58, 4  ;;  %v5305_v32 = vrot.slane %v5293_v59, 4  ;;  %v5312_v6 = vadd.f32 %v5304_v60, %v5020_v0  ;;  %v5348_v47 = vld [vmem:[#allocation2 + $0x38] sm:$0xc0] }
 0xf45   :  { %v5254_v44 = vpop.f32.mrf.mxu0  ;;  %v5295_v28 = vpop.f32.mrf.mxu1 }
 0xf46   :  { %v6362_v29 = vmul.f32 -1.442695, %v5310_v61  ;;  %v5311_v26 = vadd.f32 %v5303_v63, %v5019_v56  ;;  %v5313_v27 = vadd.f32 %v5305_v32, %v5021_v35  ;;  %v5347_v63 = vld [vmem:[#allocation2 + $0x28] sm:$0xc0] }
 0xf47   :  { %v5255_v30 = vpop.f32.mrf.mxu0  ;;  %v5296_v31 = vpop.f32.mrf.mxu1 }
 0xf48   :  { %6921 = vpow2.f32 %v6362_v29  ;;  %v6363_v37 = vmul.f32 -1.442695, %v5311_v26  ;;  %v6364_v62 = vmul.f32 -1.442695, %v5313_v27 }
 0xf4a   :  { %6923 = vpow2.f32 %v6363_v37 }
 0xf4b   :  { %6925 = vpow2.f32 %v6364_v62 }
 0xf55   :  { %v6922_v4 = vpop.eup %6921 }
 0xf56   :  { %v5317_v9 = vadd.f32 1.0, %v6922_v4 }
 0xf57   :  { %v6924_v10 = vpop.eup %6923 }
 0xf58   :  { %6927 = vrcp.f32 %v5317_v9  ;;  %v5323_v33 = vadd.f32 1.0, %v6924_v10  ;;  %v6926_v7 = vpop.eup %6925 }
 0xf59   :  { %6929 = vtanh.f32 %v5312_v6  ;;  %v5330_v17 = vadd.f32 1.0, %v6926_v7 }
 0xf5a   :  { %6931 = vrcp.f32 %v5323_v33  ;;  %v5672_v33 = vld [vmem:[#allocation4] sm:$0xff] }
 0xf5b   :  { %6933 = vrcp.f32 %v5330_v17 }
 0xf65   :  { %v6928_v8 = vpop.eup %6927 }
 0xf66   :  { %v6930_v12 = vpop.eup %6929 }
 0xf67   :  { %v6932_v15 = vpop.eup %6931  ;;  %v5338_v18 = vmul.f32 %v6930_v12, %v6928_v8  ;;  %v5692_v8 = vstv %s8397_s8 }
 0xf68   :  { %v5337_v19 = vmul.f32 %v6932_v15, %v5335_v45  ;;  %v6934_v41 = vpop.eup %6933 }
 0xf6a   :  { %v5339_v20 = vadd.f32 %v5338_v18, %v5337_v19 }
 0xf6c   :  { %6935 = vtanh.f32 %v5339_v20  ;;  %5342 = vst [vmem:[#allocation6 - $0x4] sm:$0x30] %v5339_v20 }
 0xf73   :  { %v5660_v30 = vld [vmem:[#allocation6] sm:$0x3] }
 0xf74   :  { %v5662_v35 = vrot.slane %v5660_v30, 2 }
 0xf79   :  { %v6936_v42 = vpop.eup %6935 }
 0xf7a   :  { %v5341_v16 = vmul.f32 %v6936_v42, %v6934_v41 }
 0xf7c   :  { %5344 = vst [vmem:[#allocation4 + $0x8] sm:$0x30] %v5341_v16  ;;  %5343 = vst [vmem:[#allocation5 - $0x4] sm:$0x30] %v5341_v16 }
 0xf83   :  { %v5349_v21 = vld [vmem:[#allocation5] sm:$0x3] }
 0xf84   :  { %v5350_v22 = vpack.c.bf16 %v5349_v21, %v5349_v21 }
 0xf86   :  { %5576 = vmatmul.mubr.bf16.vlgmr.msra.gmra.mxu0 %v5350_v22  ;;  %5617 = vmatmul.mubr.bf16.vlgmr.msra.gmra.mxu1 %v5350_v22 }
 0xf87   :  { %6420 = vmatpush3.bf16.msra.mxu0 %v6689_v23  ;;  %6435 = vmatprep.mubr.msk.bf16.mxu0 %vm6963_vm1, %v6962_v2 }
 0xf88   :  { %6421 = vmatprep.subr.bf16.mxu0 %v6962_v2 }
 0xf8b   :  { %6422 = vmatpush3.bf16.msra.mxu0 %v6690_v24 }
 0xf8c   :  { %6423 = vmatprep.subr.bf16.mxu0 %v6962_v2 }
 0xf8f   :  { %6424 = vmatpush3.bf16.msra.mxu0 %v6691_v25 }
 0xf90   :  { %6425 = vmatprep.subr.bf16.mxu0 %v6962_v2 }
 0xf93   :  { %6426 = vmatpush3.bf16.msra.mxu0 %v6692_v48 }
 0xf94   :  { %6427 = vmatprep.subr.bf16.mxu0 %v6962_v2 }
 0xf97   :  { %6428 = vmatpush3.bf16.msra.mxu0 %v6693_v55 }
 0xf98   :  { %6429 = vmatprep.subr.bf16.mxu0 %v6962_v2 }
 0xf9b   :  { %6430 = vmatpush3.bf16.msra.mxu0 %v6694_v57 }
 0xf9c   :  { %6431 = vmatprep.subr.bf16.mxu0 %v6962_v2 }
 0xf9f   :  { %6432 = vmatpush3.bf16.msra.mxu0 %v6695_v49 }
 0xfa0   :  { %6433 = vmatprep.subr.bf16.mxu0 %v6962_v2 }
 0xfa3   :  { %6434 = vmatpush3.bf16.msra.mxu0 %v6696_v51 }
0x1046   :  { %v5577_v54 = vpop.f32.mrf.mxu0  ;;  %v5618_v52 = vpop.f32.mrf.mxu1 }
0x1047   :  { %v5629_v38 = vrot.slane %v5577_v54, 2  ;;  %v5631_v59 = vrot.slane %v5618_v52, 2 }
0x1048   :  { %v5579_v34 = vpop.f32.mrf.mxu0  ;;  %v5620_v36 = vpop.f32.mrf.mxu1 }
0x1049   :  { %v5637_v40 = vadd.f32 %v5629_v38, %v5345_v39  ;;  %v5630_v43 = vrot.slane %v5579_v34, 2  ;;  %v5632_v2 = vrot.slane %v5620_v36, 2  ;;  %v5639_v44 = vadd.f32 %v5631_v59, %v5347_v63 }
0x104a   :  { %v5581_v14 = vpop.f32.mrf.mxu0  ;;  %v5622_v3 = vpop.f32.mrf.mxu1 }
0x104b   :  { %v6397_v50 = vmul.f32 -1.442695, %v5637_v40  ;;  %v5638_v13 = vadd.f32 %v5630_v43, %v5346_v11  ;;  %v5640_v58 = vadd.f32 %v5632_v2, %v5348_v47 }
0x104c   :  { %v5582_v1 = vpop.f32.mrf.mxu0  ;;  %v5623_v53 = vpop.f32.mrf.mxu1 }
0x104d   :  { %6937 = vpow2.f32 %v6397_v50  ;;  %v6398_v46 = vmul.f32 -1.442695, %v5638_v13  ;;  %v6399_v61 = vmul.f32 -1.442695, %v5640_v58 }
0x104f   :  { %6939 = vpow2.f32 %v6398_v46 }
0x1050   :  { %6941 = vpow2.f32 %v6399_v61 }
0x105a   :  { %v6938_v56 = vpop.eup %6937 }
0x105b   :  { %v5644_v28 = vadd.f32 1.0, %v6938_v56 }
0x105c   :  { %v6940_v29 = vpop.eup %6939 }
0x105d   :  { %6943 = vrcp.f32 %v5644_v28  ;;  %v5650_v26 = vadd.f32 1.0, %v6940_v29  ;;  %v6942_v31 = vpop.eup %6941 }
0x105e   :  { %6945 = vtanh.f32 %v5639_v44  ;;  %v5657_v60 = vadd.f32 1.0, %v6942_v31 }
0x105f   :  { %6947 = vrcp.f32 %v5650_v26 }
0x1060   :  { %6949 = vrcp.f32 %v5657_v60 }
0x106a   :  { %v6944_v37 = vpop.eup %6943 }
0x106b   :  { %v6946_v32 = vpop.eup %6945 }
0x106c   :  { %v6948_v27 = vpop.eup %6947  ;;  %v5665_v62 = vmul.f32 %v6946_v32, %v6944_v37 }
0x106d   :  { %v5664_v0 = vmul.f32 %v6948_v27, %v5662_v35  ;;  %v6950_v6 = vpop.eup %6949 }
0x106f   :  { %v5666_v4 = vadd.f32 %v5665_v62, %v5664_v0 }
0x1071   :  { %6951 = vtanh.f32 %v5666_v4  ;;  %5669 = vst [vmem:[#allocation6 - $0x6] sm:$0xc0] %v5666_v4 }
0x107e   :  { %v6952_v9 = vpop.eup %6951 }
0x107f   :  { %v5668_v10 = vmul.f32 %v6952_v9, %v6950_v6 }
0x1081   :  { %5670 = vst [vmem:[#allocation5 - $0x6] sm:$0xc0] %v5668_v10  ;;  %5671 = vst [vmem:[#allocation4 + $0x8] sm:$0xc0] %v5668_v10 }
0x1088   :  { %v5673_v5 = vld [vmem:[#allocation4 + $0x8] sm:$0xff] }
0x1089   :  { %v5674_v7 = vpack.c.bf16 %v5673_v5, %v5672_v33 }
0x108b   :  { %6436 = vmatmul.mubr.bf16.vlgmr.msra.gmra.mxu0 %v5674_v7 }
0x114b   :  { %v5775_v12 = vpop.f32.mrf.mxu0 }
0x114c   :  { %v5776_v45 = vadd.f32 %v5775_v12, %v5692_v8 }
0x114d   :  { %v6437_v15 = vpop.f32.mrf.mxu0 }
0x114e   :  { %v6408_v17 = vmul.f32 -1.442695, %v5776_v45 }
0x114f   :  { %v5778_v18 = vpop.f32.mrf.mxu0 }
0x1150   :  { %6953 = vpow2.f32 %v6408_v17  ;;  %v5779_v19 = vadd.f32 %v5778_v18, %v5692_v8 }
0x1151   :  { %v6438_v20 = vpop.f32.mrf.mxu0 }
0x1152   :  { %v6409_v41 = vmul.f32 -1.442695, %v5779_v19 }
0x1154   :  { %6955 = vpow2.f32 %v6409_v41 }
0x115d   :  { %v6954_v42 = vpop.eup %6953 }
0x115e   :  { %v5788_v16 = vadd.f32 1.0, %v6954_v42 }
0x1160   :  { %6957 = vrcp.f32 %v5788_v16 }
0x1161   :  { %v6956_v21 = vpop.eup %6955 }
0x1162   :  { %v5789_v22 = vadd.f32 1.0, %v6956_v21 }
0x1164   :  { %6959 = vrcp.f32 %v5789_v22 }
0x116d   :  { %v6958_v23 = vpop.eup %6957 }
0x116e   :  { %5795 = vst.msk [vmem:[%s8398_s9] sm:$0xff] %vm5794_vm2, %v6958_v23 }
0x1171   :  { %v6960_v24 = vpop.eup %6959 }
0x1172   :  { %5796 = vst.msk [vmem:[%s8398_s9 + $0x8] sm:$0xff] %vm5794_vm2, %v6960_v24 }

</bundles_post_ra>
